<compile_context>
chip_gen: v7x
topology: tpu7x:2x2x1
jax: 0.10.0
libtpu: 0.0.40
codegen_flags: <defaults>
</compile_context>

<pallas_src>
import jax
import jax.numpy as jnp
from jax import lax
from jax.experimental import pallas as pl
from jax.experimental.pallas import tpu as pltpu


def _round_up(x, m):
    return (x + m - 1) // m * m


def _choose_b_tile(b):
    """Batch rows per grid step.  Multiples of 16 keep bf16 (16,128) tiles whole
    (so the in-kernel (T,Bt,Hp)->(T*Bt,Hp) flatten is a pure layout no-op); cap
    at 128 MXU rows and keep >=2 tiles for megacore when the batch allows it."""
    b16 = _round_up(b, 16)
    if b16 <= 16:
        return 16
    return min(128, _round_up((b16 + 1) // 2, 16))


def _vmem_limit_bytes():
    """~7/8 of physical per-core VMEM (56 MiB on v7x, 112 MiB on v5e/v6e),
    leaving headroom for compiler scratch / pipeline buffers."""
    try:
        phys = getattr(pltpu.get_tpu_info(), "vmem_capacity_bytes", None)
    except Exception:
        phys = None
    if not phys:
        return 64 * 1024 * 1024          # known-safe fallback
    return min(int(phys) * 7 // 8, 112 * 1024 * 1024)


def encoder_gru_kernel(emb_ref, lens_ref, w_ih_ref, w_hh_ref, bias_ref, b_hn_ref,
                       out_ref, hid_ref, gi_ref, bwd_ref):
    """Fused bidirectional GRU over one batch tile (all shapes lane/sublane padded).

    emb_ref : (T, Bt, Hp)    bf16  embedded tokens (zero-padded batch / hidden)
    lens_ref: (Bt, 1)        i32   valid length per batch row
    w_ih_ref: (Hp, 6Hp)      bf16  [W_ih_fwd | W_ih_bwd], gates [r, z, n]
    w_hh_ref: (Hp, 6Hp)      bf16  [W_hh_fwd | W_hh_bwd]
    bias_ref: (1, 6Hp)       f32   b_ih + [b_hr, b_hz, 0] per direction
    b_hn_ref: (1, 2Hp)       f32   n-gate hidden bias (stays inside r*(...))
    out_ref : (T, Bt, Hp)    f32   fwd + bwd outputs, padded steps zeroed
    hid_ref : (2, Bt, Hp)    f32   final hidden [fwd, bwd]
    gi_ref  : (T*Bt, 6Hp)    bf16  VMEM scratch: fused input projection
    bwd_ref : (T, Bt, Hp)    f32   VMEM scratch: raw (masked) backward outputs
    """
    T, B, Hp = emb_ref.shape
    H3 = 3 * Hp

    # ---- Prologue: input projection for BOTH directions as one big MXU matmul,
    # hoisted off the serial path.  Bt is a multiple of 16 and Hp of 128, so the
    # flatten is a pure layout no-op; result lives only in VMEM (no HBM round-trip).
    x2d = emb_ref[...].reshape(T * B, Hp)                       # bf16
    gi_ref[...] = jnp.dot(x2d, w_ih_ref[...],
                          preferred_element_type=jnp.float32).astype(gi_ref.dtype)

    # Hoist weight loads / bias broadcasts out of the recurrence
    # (JAX does not CSE broadcast_in_dim; with the loop unrolled it would repeat).
    w_hh_f = w_hh_ref[:, :H3]
    w_hh_b = w_hh_ref[:, H3:]
    bias_f = jnp.broadcast_to(bias_ref[:, :H3], (B, H3))
    bias_b = jnp.broadcast_to(bias_ref[:, H3:], (B, H3))
    b_hn_f = jnp.broadcast_to(b_hn_ref[:, :Hp], (B, Hp))
    b_hn_b = jnp.broadcast_to(b_hn_ref[:, Hp:], (B, Hp))
    lens = lens_ref[...]                                        # (B, 1) int32

    def gru_update(gi_t, gh, bias_bc, b_hn_bc, h):
        pre = gi_t + bias_bc                                    # f32 gate math (v5e-safe)
        r = jax.nn.sigmoid(pre[:, :Hp] + gh[:, :Hp])
        z = jax.nn.sigmoid(pre[:, Hp:2 * Hp] + gh[:, Hp:2 * Hp])
        n = jnp.tanh(pre[:, 2 * Hp:] + r * (gh[:, 2 * Hp:] + b_hn_bc))
        return (1.0 - z) * n + z * h

    def body(i, carry):
        h_f, h_b = carry
        t_b = T - 1 - i
        row_f = pl.multiple_of(i * B, B)
        row_b = pl.multiple_of(t_b * B, B)
        gi_f = gi_ref[pl.ds(row_f, B), :H3].astype(jnp.float32)
        gi_b = gi_ref[pl.ds(row_b, B), H3:].astype(jnp.float32)
        # Two independent recurrent matmuls (fwd @ t=i, bwd @ t=T-1-i): interleaved
        # so their MXU push->pop latencies overlap.
        gh_f = jnp.dot(h_f.astype(jnp.bfloat16), w_hh_f,
                       preferred_element_type=jnp.float32)
        gh_b = jnp.dot(h_b.astype(jnp.bfloat16), w_hh_b,
                       preferred_element_type=jnp.float32)
        hf_new = gru_update(gi_f, gh_f, bias_f, b_hn_f, h_f)
        hb_new = gru_update(gi_b, gh_b, bias_b, b_hn_b, h_b)
        # pack_padded_sequence semantics: padded steps emit 0 and freeze h.
        m_f = (lens > i).astype(jnp.float32)                    # (B, 1)
        m_b = (lens > t_b).astype(jnp.float32)
        out_ref[i] = m_f * hf_new
        bwd_ref[t_b] = m_b * hb_new
        h_f = h_f + m_f * (hf_new - h_f)
        h_b = h_b + m_b * (hb_new - h_b)
        return (h_f, h_b)

    h0 = jnp.zeros((B, Hp), jnp.float32)
    # Full unroll only for tiny T; partial unroll bounds vreg live ranges / spills.
    unroll = True if T <= 16 else 4
    h_f, h_b = lax.fori_loop(0, T, body, (h0, h0), unroll=unroll)

    hid_ref[0] = h_f
    hid_ref[1] = h_b
    # Direction sum in one lane-dense pass (no per-step read-modify-write).
    out_ref[...] = out_ref[...] + bwd_ref[...]


def encoder_rnn_forward(input_seq, input_lengths, params):
    """EncoderRNN.forward: embedding gather (XLA glue) + fused Pallas GRU kernel."""
    embedding = params["embedding"]
    H = embedding.shape[1]
    T, B = input_seq.shape

    Hp = _round_up(H, 128)
    B_TILE = _choose_b_tile(B)
    Bp = _round_up(B, B_TILE)

    # Embedding gather (no clean Pallas equivalent for the HBM gather) -> bf16
    # stream, zero-padded batch/hidden.
    emb = embedding[input_seq].astype(jnp.bfloat16)                 # (T, B, H)
    emb = jnp.pad(emb, ((0, 0), (0, Bp - B), (0, Hp - H)))

    def pad_gates(a, rows_to):
        # (rows, 3H) gate-major [r, z, n] -> per-gate pad H->Hp, rows->rows_to.
        rows = a.shape[0]
        a = a.reshape(rows, 3, H)
        a = jnp.pad(a, ((0, rows_to - rows), (0, 0), (0, Hp - H)))
        return a.reshape(rows_to, 3 * Hp)

    def pack_dirs(f, b, rows_to):
        return jnp.concatenate([pad_gates(f, rows_to), pad_gates(b, rows_to)], axis=1)

    w_ih = pack_dirs(params["w_ih_f_t"], params["w_ih_b_t"], Hp).astype(jnp.bfloat16)
    w_hh = pack_dirs(params["w_hh_f_t"], params["w_hh_b_t"], Hp).astype(jnp.bfloat16)

    def fused_bias(b_ih, b_hh):
        # b_ih + [b_hr, b_hz, 0]; b_hn must stay inside r*(...) in the kernel.
        return b_ih + jnp.concatenate(
            [b_hh[:, :2 * H], jnp.zeros((1, H), jnp.float32)], axis=1)

    bias = pack_dirs(fused_bias(params["b_ih_f"], params["b_hh_f"]),
                     fused_bias(params["b_ih_b"], params["b_hh_b"]), 1)   # (1, 6Hp)
    b_hn = jnp.concatenate(
        [jnp.pad(params["b_hh_f"][:, 2 * H:], ((0, 0), (0, Hp - H))),
         jnp.pad(params["b_hh_b"][:, 2 * H:], ((0, 0), (0, Hp - H)))], axis=1)  # (1, 2Hp)

    # pack_padded_sequence requires lengths in [0, T]; clamp defensively.
    lens = jnp.pad(jnp.clip(input_lengths.astype(jnp.int32), 0, T), (0, Bp - B))
    lens = lens[:, None]                                             # (Bp, 1)

    batch_map = lambda b: (0, b, 0)
    const_map = lambda b: (0, 0)

    out_pad, hid_pad = pl.pallas_call(
        encoder_gru_kernel,
        out_shape=(jax.ShapeDtypeStruct((T, Bp, Hp), jnp.float32),
                   jax.ShapeDtypeStruct((2, Bp, Hp), jnp.float32)),
        grid=(Bp // B_TILE,),
        in_specs=[
            pl.BlockSpec((T, B_TILE, Hp), batch_map),       # embedded tokens (bf16)
            pl.BlockSpec((B_TILE, 1), lambda b: (b, 0)),    # lengths (int32)
            pl.BlockSpec((Hp, 6 * Hp), const_map),          # W_ih both dirs (bf16)
            pl.BlockSpec((Hp, 6 * Hp), const_map),          # W_hh both dirs (bf16)
            pl.BlockSpec((1, 6 * Hp), const_map),           # fused r/z/n input biases
            pl.BlockSpec((1, 2 * Hp), const_map),           # n-gate hidden biases
        ],
        out_specs=(pl.BlockSpec((T, B_TILE, Hp), batch_map),
                   pl.BlockSpec((2, B_TILE, Hp), batch_map)),
        scratch_shapes=[pltpu.VMEM((T * B_TILE, 6 * Hp), jnp.bfloat16),  # gi
                        pltpu.VMEM((T, B_TILE, Hp), jnp.float32)],       # raw bwd
        compiler_params=pltpu.CompilerParams(
            dimension_semantics=("parallel",),              # batch tiles independent
            vmem_limit_bytes=_vmem_limit_bytes()),
        # TODO(synk): for production-size T add an inner "arbitrary" T-chunk grid
        # axis (h carried in VMEM scratch, bwd inputs via reversed index_map, sum
        # of directions as XLA glue) so per-tile VMEM stays bounded on v7x (64 MiB).
        # TODO(synk): for tiny batches on v7x, split fwd/bwd over a 2-wide parallel
        # grid axis so both TensorCores are used.
    )(emb, lens, w_ih, w_hh, bias, b_hn)

    outputs = out_pad[:, :B, :H]
    hidden = hid_pad[:, :B, :H]
    return outputs, hidden


def encoder_rnn_reference(input_seq, input_lengths, params):
    """Pure-JAX f32 reference mirroring nn.GRU bidirectional packed semantics."""
    emb = params["embedding"][input_seq]                    # (T, B, H) f32
    T, B, H = emb.shape
    t_idx = jnp.arange(T)
    mask = (t_idx[:, None] < input_lengths[None, :]).astype(jnp.float32)[:, :, None]

    def run_dir(w_ih_t, w_hh_t, b_ih, b_hh, reverse):
        def cell(h, inp):
            x_t, m = inp
            gi = x_t @ w_ih_t + b_ih
            gh = h @ w_hh_t
            r = jax.nn.sigmoid(gi[:, :H] + gh[:, :H] + b_hh[:, :H])
            z = jax.nn.sigmoid(gi[:, H:2 * H] + gh[:, H:2 * H] + b_hh[:, H:2 * H])
            n = jnp.tanh(gi[:, 2 * H:] + r * (gh[:, 2 * H:] + b_hh[:, 2 * H:]))
            h_new = (1.0 - z) * n + z * h
            h = h + m * (h_new - h)
            return h, m * h_new
        xs = (emb[::-1], mask[::-1]) if reverse else (emb, mask)
        h_fin, outs = lax.scan(cell, jnp.zeros((B, H), jnp.float32), xs)
        return (outs[::-1] if reverse else outs), h_fin

    out_f, h_f = run_dir(params["w_ih_f_t"], params["w_hh_f_t"],
                         params["b_ih_f"], params["b_hh_f"], False)
    out_b, h_b = run_dir(params["w_ih_b_t"], params["w_hh_b_t"],
                         params["b_ih_b"], params["b_hh_b"], True)
    return out_f + out_b, jnp.stack([h_f, h_b])


def init_params(key, vocab_size, hidden_size):
    """Deterministic synthetic parameters (shapes match nn.Embedding + nn.GRU)."""
    H = hidden_size
    k = 1.0 / jnp.sqrt(jnp.float32(H))
    keys = jax.random.split(key, 9)

    def u(kk, shape):
        return jax.random.uniform(kk, shape, jnp.float32, -k, k)

    return {
        "embedding": jax.random.normal(keys[0], (vocab_size, H), jnp.float32) * 0.1,
        # GRU weights stored pre-transposed: (H, 3H), gate order [r, z, n].
        "w_ih_f_t": u(keys[1], (3 * H, H)).T,
        "w_hh_f_t": u(keys[2], (3 * H, H)).T,
        "b_ih_f":   u(keys[3], (1, 3 * H)),
        "b_hh_f":   u(keys[4], (1, 3 * H)),
        "w_ih_b_t": u(keys[5], (3 * H, H)).T,
        "w_hh_b_t": u(keys[6], (3 * H, H)).T,
        "b_ih_b":   u(keys[7], (1, 3 * H)),
        "b_hh_b":   u(keys[8], (1, 3 * H)),
    }


if __name__ == "__main__":
    # Small shapes: seq T=8, batch B=2, hidden H=32, vocab V=20.
    T, B, H, V = 8, 2, 32, 20

    key = jax.random.PRNGKey(0)
    k_params, k_tokens = jax.random.split(key)
    params = init_params(k_params, V, H)

    # Token ids (T, B); lengths sorted descending like pack_padded_sequence expects.
    input_seq = jax.random.randint(k_tokens, (T, B), 0, V, dtype=jnp.int32)
    input_lengths = jnp.array([8, 5], dtype=jnp.int32)
    t_idx = jnp.arange(T)[:, None]
    input_seq = jnp.where(t_idx < input_lengths[None, :], input_seq, 0)

    outputs, hidden = encoder_rnn_forward(input_seq, input_lengths, params)
    jax.block_until_ready((outputs, hidden))

    assert outputs.shape == (T, B, H)
    assert hidden.shape == (2, B, H)
    assert bool(jnp.all(jnp.isfinite(outputs))) and bool(jnp.all(jnp.isfinite(hidden)))
    # Padded timesteps of the shorter sequence must be zero (pad_packed_sequence).
    assert bool(jnp.all(outputs[5:, 1, :] == 0.0))

    # Validate bf16 matmul path against an f32 reference (explicit tolerance).
    ref_out, ref_hid = encoder_rnn_reference(input_seq, input_lengths, params)
    assert float(jnp.max(jnp.abs(outputs - ref_out))) < 3e-2
    assert float(jnp.max(jnp.abs(hidden - ref_hid))) < 3e-2

    print("KERNEL_OK")
</pallas_src>

<mosaic_0001>
module attributes {stable_mosaic.version = 11 : i64} {
  func.func @encoder_gru_kernel(%arg0: i32, %arg1: memref<8x16x128xbf16, #tpu.memory_space<vmem>>, %arg2: memref<16x1xi32, #tpu.memory_space<vmem>>, %arg3: memref<128x768xbf16, #tpu.memory_space<vmem>>, %arg4: memref<128x768xbf16, #tpu.memory_space<vmem>>, %arg5: memref<1x768xf32, #tpu.memory_space<vmem>>, %arg6: memref<1x256xf32, #tpu.memory_space<vmem>>, %arg7: memref<8x16x128xf32, #tpu.memory_space<vmem>>, %arg8: memref<2x16x128xf32, #tpu.memory_space<vmem>>, %arg9: memref<128x768xbf16, #tpu.memory_space<vmem>>, %arg10: memref<8x16x128xf32, #tpu.memory_space<vmem>>) attributes {dimension_semantics = [#tpu.dimension_semantics<parallel>], iteration_bounds = array<i64: 1>, scalar_prefetch = 0 : i64, scratch_operands = 2 : i64, tpu.core_type = #tpu.core_type<tc>, window_params = [{transform_indices = @transform_0, window_bounds = array<i64: 8, 16, 128>}, {transform_indices = @transform_1, window_bounds = array<i64: 16, 1>}, {pipeline_mode = #tpu.pipeline_mode<synchronous>, transform_indices = @transform_2, window_bounds = array<i64: 128, 768>}, {pipeline_mode = #tpu.pipeline_mode<synchronous>, transform_indices = @transform_3, window_bounds = array<i64: 128, 768>}, {pipeline_mode = #tpu.pipeline_mode<synchronous>, transform_indices = @transform_4, window_bounds = array<i64: 1, 768>}, {pipeline_mode = #tpu.pipeline_mode<synchronous>, transform_indices = @transform_5, window_bounds = array<i64: 1, 256>}, {transform_indices = @transform_6, window_bounds = array<i64: 8, 16, 128>}, {transform_indices = @transform_7, window_bounds = array<i64: 2, 16, 128>}]} {
    %c0 = arith.constant 0 : index
    %c0_0 = arith.constant 0 : index
    %c0_1 = arith.constant 0 : index
    %0 = vector.load %arg1[%c0, %c0_0, %c0_1] : memref<8x16x128xbf16, #tpu.memory_space<vmem>>, vector<8x16x128xbf16>
    %1 = vector.shape_cast %0 : vector<8x16x128xbf16> to vector<128x128xbf16>
    %c0_2 = arith.constant 0 : index
    %c0_3 = arith.constant 0 : index
    %2 = vector.load %arg3[%c0_2, %c0_3] : memref<128x768xbf16, #tpu.memory_space<vmem>>, vector<128x768xbf16>
    %cst = arith.constant dense<0.000000e+00> : vector<128x768xf32>
    %3 = tpu.matmul %1, %2, %cst {dimension_numbers = #tpu.dot_dimension_numbers<[1], [0], [0], [1], [0, 0, 1, 1], [], []>} : vector<128x128xbf16>, vector<128x768xbf16>, vector<128x768xf32> -> vector<128x768xf32>
    %4 = arith.truncf %3 : vector<128x768xf32> to vector<128x768xbf16>
    %c0_4 = arith.constant 0 : index
    %c0_5 = arith.constant 0 : index
    %5 = vector.load %arg9[%c0_4, %c0_5] : memref<128x768xbf16, #tpu.memory_space<vmem>>, vector<128x768xbf16>
    tpu.vector_store %arg9[%c0_4, %c0_5], %4 {strides = array<i32>} : memref<128x768xbf16, #tpu.memory_space<vmem>>, vector<128x768xbf16>,
    %c0_6 = arith.constant 0 : index
    %c0_7 = arith.constant 0 : index
    %6 = vector.load %arg4[%c0_6, %c0_7] : memref<128x768xbf16, #tpu.memory_space<vmem>>, vector<128x384xbf16>
    %c0_8 = arith.constant 0 : index
    %c384 = arith.constant 384 : index
    %7 = vector.load %arg4[%c0_8, %c384] : memref<128x768xbf16, #tpu.memory_space<vmem>>, vector<128x384xbf16>
    %c0_9 = arith.constant 0 : index
    %c0_10 = arith.constant 0 : index
    %8 = vector.load %arg5[%c0_9, %c0_10] : memref<1x768xf32, #tpu.memory_space<vmem>>, vector<1x384xf32>
    %9 = vector.shape_cast %8 : vector<1x384xf32> to vector<1x384xf32>
    %10 = vector.broadcast %9 : vector<1x384xf32> to vector<16x384xf32>
    %c0_11 = arith.constant 0 : index
    %c384_12 = arith.constant 384 : index
    %11 = vector.load %arg5[%c0_11, %c384_12] : memref<1x768xf32, #tpu.memory_space<vmem>>, vector<1x384xf32>
    %12 = vector.shape_cast %11 : vector<1x384xf32> to vector<1x384xf32>
    %13 = vector.broadcast %12 : vector<1x384xf32> to vector<16x384xf32>
    %c0_13 = arith.constant 0 : index
    %c0_14 = arith.constant 0 : index
    %14 = vector.load %arg6[%c0_13, %c0_14] : memref<1x256xf32, #tpu.memory_space<vmem>>, vector<1x128xf32>
    %15 = vector.shape_cast %14 : vector<1x128xf32> to vector<1x128xf32>
    %16 = vector.broadcast %15 : vector<1x128xf32> to vector<16x128xf32>
    %c0_15 = arith.constant 0 : index
    %c128 = arith.constant 128 : index
    %17 = vector.load %arg6[%c0_15, %c128] : memref<1x256xf32, #tpu.memory_space<vmem>>, vector<1x128xf32>
    %18 = vector.shape_cast %17 : vector<1x128xf32> to vector<1x128xf32>
    %19 = vector.broadcast %18 : vector<1x128xf32> to vector<16x128xf32>
    %c0_16 = arith.constant 0 : index
    %c0_17 = arith.constant 0 : index
    %20 = vector.load %arg2[%c0_16, %c0_17] : memref<16x1xi32, #tpu.memory_space<vmem>>, vector<16x1xi32>
    %cst_18 = arith.constant 0.000000e+00 : f32
    %21 = vector.broadcast %cst_18 : f32 to vector<16x128xf32>
    %c0_i32 = arith.constant 0 : i32
    %c7_i32 = arith.constant 7 : i32
    %22 = arith.subi %c7_i32, %c0_i32 : i32
    %c16_i32 = arith.constant 16 : i32
    %23 = arith.muli %c0_i32, %c16_i32 : i32
    %24 = tpu.assume_multiple %23, 16 : i32
    %c16_i32_19 = arith.constant 16 : i32
    %25 = arith.muli %22, %c16_i32_19 : i32
    %26 = tpu.assume_multiple %25, 16 : i32
    %27 = arith.index_cast %24 : i32 to index
    %c0_20 = arith.constant 0 : index
    %28 = vector.load %arg9[%27, %c0_20] : memref<128x768xbf16, #tpu.memory_space<vmem>>, vector<16x384xbf16>
    %29 = arith.extf %28 : vector<16x384xbf16> to vector<16x384xf32>
    %30 = arith.index_cast %26 : i32 to index
    %c384_21 = arith.constant 384 : index
    %31 = vector.load %arg9[%30, %c384_21] : memref<128x768xbf16, #tpu.memory_space<vmem>>, vector<16x384xbf16>
    %32 = arith.extf %31 : vector<16x384xbf16> to vector<16x384xf32>
    %33 = arith.truncf %21 : vector<16x128xf32> to vector<16x128xbf16>
    %cst_22 = arith.constant dense<0.000000e+00> : vector<16x384xf32>
    %34 = tpu.matmul %33, %6, %cst_22 {dimension_numbers = #tpu.dot_dimension_numbers<[1], [0], [0], [1], [0, 0, 1, 1], [], []>} : vector<16x128xbf16>, vector<128x384xbf16>, vector<16x384xf32> -> vector<16x384xf32>
    %35 = arith.truncf %21 : vector<16x128xf32> to vector<16x128xbf16>
    %cst_23 = arith.constant dense<0.000000e+00> : vector<16x384xf32>
    %36 = tpu.matmul %35, %7, %cst_23 {dimension_numbers = #tpu.dot_dimension_numbers<[1], [0], [0], [1], [0, 0, 1, 1], [], []>} : vector<16x128xbf16>, vector<128x384xbf16>, vector<16x384xf32> -> vector<16x384xf32>
    %37 = arith.addf %29, %10 : vector<16x384xf32>
    %38 = vector.extract_strided_slice %37 {offsets = [0, 0], sizes = [16, 128], strides = [1, 1]} : vector<16x384xf32> to vector<16x128xf32>
    %39 = vector.extract_strided_slice %34 {offsets = [0, 0], sizes = [16, 128], strides = [1, 1]} : vector<16x384xf32> to vector<16x128xf32>
    %40 = arith.addf %38, %39 : vector<16x128xf32>
    %41 = arith.negf %40 : vector<16x128xf32>
    %42 = math.exp %41 : vector<16x128xf32>
    %cst_24 = arith.constant 1.000000e+00 : f32
    %43 = vector.broadcast %cst_24 : f32 to vector<16x128xf32>
    %44 = arith.addf %43, %42 : vector<16x128xf32>
    %45 = arith.divf %43, %44 : vector<16x128xf32>
    %46 = vector.extract_strided_slice %37 {offsets = [0, 128], sizes = [16, 128], strides = [1, 1]} : vector<16x384xf32> to vector<16x128xf32>
    %47 = vector.extract_strided_slice %34 {offsets = [0, 128], sizes = [16, 128], strides = [1, 1]} : vector<16x384xf32> to vector<16x128xf32>
    %48 = arith.addf %46, %47 : vector<16x128xf32>
    %49 = arith.negf %48 : vector<16x128xf32>
    %50 = math.exp %49 : vector<16x128xf32>
    %cst_25 = arith.constant 1.000000e+00 : f32
    %51 = vector.broadcast %cst_25 : f32 to vector<16x128xf32>
    %52 = arith.addf %51, %50 : vector<16x128xf32>
    %53 = arith.divf %51, %52 : vector<16x128xf32>
    %54 = vector.extract_strided_slice %37 {offsets = [0, 256], sizes = [16, 128], strides = [1, 1]} : vector<16x384xf32> to vector<16x128xf32>
    %55 = vector.extract_strided_slice %34 {offsets = [0, 256], sizes = [16, 128], strides = [1, 1]} : vector<16x384xf32> to vector<16x128xf32>
    %56 = arith.addf %55, %16 : vector<16x128xf32>
    %57 = arith.mulf %45, %56 : vector<16x128xf32>
    %58 = arith.addf %54, %57 : vector<16x128xf32>
    %59 = math.tanh %58 : vector<16x128xf32>
    %cst_26 = arith.constant 1.000000e+00 : f32
    %60 = vector.broadcast %cst_26 : f32 to vector<16x128xf32>
    %61 = arith.subf %60, %53 : vector<16x128xf32>
    %62 = arith.mulf %61, %59 : vector<16x128xf32>
    %63 = arith.mulf %53, %21 : vector<16x128xf32>
    %64 = arith.addf %62, %63 : vector<16x128xf32>
    %65 = arith.addf %32, %13 : vector<16x384xf32>
    %66 = vector.extract_strided_slice %65 {offsets = [0, 0], sizes = [16, 128], strides = [1, 1]} : vector<16x384xf32> to vector<16x128xf32>
    %67 = vector.extract_strided_slice %36 {offsets = [0, 0], sizes = [16, 128], strides = [1, 1]} : vector<16x384xf32> to vector<16x128xf32>
    %68 = arith.addf %66, %67 : vector<16x128xf32>
    %69 = arith.negf %68 : vector<16x128xf32>
    %70 = math.exp %69 : vector<16x128xf32>
    %cst_27 = arith.constant 1.000000e+00 : f32
    %71 = vector.broadcast %cst_27 : f32 to vector<16x128xf32>
    %72 = arith.addf %71, %70 : vector<16x128xf32>
    %73 = arith.divf %71, %72 : vector<16x128xf32>
    %74 = vector.extract_strided_slice %65 {offsets = [0, 128], sizes = [16, 128], strides = [1, 1]} : vector<16x384xf32> to vector<16x128xf32>
    %75 = vector.extract_strided_slice %36 {offsets = [0, 128], sizes = [16, 128], strides = [1, 1]} : vector<16x384xf32> to vector<16x128xf32>
    %76 = arith.addf %74, %75 : vector<16x128xf32>
    %77 = arith.negf %76 : vector<16x128xf32>
    %78 = math.exp %77 : vector<16x128xf32>
    %cst_28 = arith.constant 1.000000e+00 : f32
    %79 = vector.broadcast %cst_28 : f32 to vector<16x128xf32>
    %80 = arith.addf %79, %78 : vector<16x128xf32>
    %81 = arith.divf %79, %80 : vector<16x128xf32>
    %82 = vector.extract_strided_slice %65 {offsets = [0, 256], sizes = [16, 128], strides = [1, 1]} : vector<16x384xf32> to vector<16x128xf32>
    %83 = vector.extract_strided_slice %36 {offsets = [0, 256], sizes = [16, 128], strides = [1, 1]} : vector<16x384xf32> to vector<16x128xf32>
    %84 = arith.addf %83, %19 : vector<16x128xf32>
    %85 = arith.mulf %73, %84 : vector<16x128xf32>
    %86 = arith.addf %82, %85 : vector<16x128xf32>
    %87 = math.tanh %86 : vector<16x128xf32>
    %cst_29 = arith.constant 1.000000e+00 : f32
    %88 = vector.broadcast %cst_29 : f32 to vector<16x128xf32>
    %89 = arith.subf %88, %81 : vector<16x128xf32>
    %90 = arith.mulf %89, %87 : vector<16x128xf32>
    %91 = arith.mulf %81, %21 : vector<16x128xf32>
    %92 = arith.addf %90, %91 : vector<16x128xf32>
    %93 = vector.broadcast %c0_i32 : i32 to vector<16x1xi32>
    %94 = arith.cmpi sgt, %20, %93 : vector<16x1xi32>
    %95 = arith.extui %94 : vector<16x1xi1> to vector<16x1xi32>
    %96 = arith.sitofp %95 : vector<16x1xi32> to vector<16x1xf32>
    %97 = vector.broadcast %22 : i32 to vector<16x1xi32>
    %98 = arith.cmpi sgt, %20, %97 : vector<16x1xi32>
    %99 = arith.extui %98 : vector<16x1xi1> to vector<16x1xi32>
    %100 = arith.sitofp %99 : vector<16x1xi32> to vector<16x1xf32>
    %101 = vector.broadcast %96 : vector<16x1xf32> to vector<16x128xf32>
    %102 = arith.mulf %101, %64 : vector<16x128xf32>
    %103 = arith.index_cast %c0_i32 : i32 to index
    %c0_30 = arith.constant 0 : index
    %c0_31 = arith.constant 0 : index
    %104 = vector.load %arg7[%103, %c0_30, %c0_31] : memref<8x16x128xf32, #tpu.memory_space<vmem>>, vector<1x16x128xf32>
    %105 = vector.shape_cast %104 : vector<1x16x128xf32> to vector<16x128xf32>
    %106 = vector.shape_cast %102 : vector<16x128xf32> to vector<1x16x128xf32>
    tpu.vector_store %arg7[%103, %c0_30, %c0_31], %106 {strides = array<i32>} : memref<8x16x128xf32, #tpu.memory_space<vmem>>, vector<1x16x128xf32>,
    %107 = vector.broadcast %100 : vector<16x1xf32> to vector<16x128xf32>
    %108 = arith.mulf %107, %92 : vector<16x128xf32>
    %109 = arith.index_cast %22 : i32 to index
    %c0_32 = arith.constant 0 : index
    %c0_33 = arith.constant 0 : index
    %110 = vector.load %arg10[%109, %c0_32, %c0_33] : memref<8x16x128xf32, #tpu.memory_space<vmem>>, vector<1x16x128xf32>
    %111 = vector.shape_cast %110 : vector<1x16x128xf32> to vector<16x128xf32>
    %112 = vector.shape_cast %108 : vector<16x128xf32> to vector<1x16x128xf32>
    tpu.vector_store %arg10[%109, %c0_32, %c0_33], %112 {strides = array<i32>} : memref<8x16x128xf32, #tpu.memory_space<vmem>>, vector<1x16x128xf32>,
    %113 = arith.subf %64, %21 : vector<16x128xf32>
    %114 = vector.broadcast %96 : vector<16x1xf32> to vector<16x128xf32>
    %115 = arith.mulf %114, %113 : vector<16x128xf32>
    %116 = arith.addf %21, %115 : vector<16x128xf32>
    %117 = arith.subf %92, %21 : vector<16x128xf32>
    %118 = vector.broadcast %100 : vector<16x1xf32> to vector<16x128xf32>
    %119 = arith.mulf %118, %117 : vector<16x128xf32>
    %120 = arith.addf %21, %119 : vector<16x128xf32>
    %c1_i32 = arith.constant 1 : i32
    %c7_i32_34 = arith.constant 7 : i32
    %121 = arith.subi %c7_i32_34, %c1_i32 : i32
    %c16_i32_35 = arith.constant 16 : i32
    %122 = arith.muli %c1_i32, %c16_i32_35 : i32
    %123 = tpu.assume_multiple %122, 16 : i32
    %c16_i32_36 = arith.constant 16 : i32
    %124 = arith.muli %121, %c16_i32_36 : i32
    %125 = tpu.assume_multiple %124, 16 : i32
    %126 = arith.index_cast %123 : i32 to index
    %c0_37 = arith.constant 0 : index
    %127 = vector.load %arg9[%126, %c0_37] : memref<128x768xbf16, #tpu.memory_space<vmem>>, vector<16x384xbf16>
    %128 = arith.extf %127 : vector<16x384xbf16> to vector<16x384xf32>
    %129 = arith.index_cast %125 : i32 to index
    %c384_38 = arith.constant 384 : index
    %130 = vector.load %arg9[%129, %c384_38] : memref<128x768xbf16, #tpu.memory_space<vmem>>, vector<16x384xbf16>
    %131 = arith.extf %130 : vector<16x384xbf16> to vector<16x384xf32>
    %132 = arith.truncf %116 : vector<16x128xf32> to vector<16x128xbf16>
    %cst_39 = arith.constant dense<0.000000e+00> : vector<16x384xf32>
    %133 = tpu.matmul %132, %6, %cst_39 {dimension_numbers = #tpu.dot_dimension_numbers<[1], [0], [0], [1], [0, 0, 1, 1], [], []>} : vector<16x128xbf16>, vector<128x384xbf16>, vector<16x384xf32> -> vector<16x384xf32>
    %134 = arith.truncf %120 : vector<16x128xf32> to vector<16x128xbf16>
    %cst_40 = arith.constant dense<0.000000e+00> : vector<16x384xf32>
    %135 = tpu.matmul %134, %7, %cst_40 {dimension_numbers = #tpu.dot_dimension_numbers<[1], [0], [0], [1], [0, 0, 1, 1], [], []>} : vector<16x128xbf16>, vector<128x384xbf16>, vector<16x384xf32> -> vector<16x384xf32>
    %136 = arith.addf %128, %10 : vector<16x384xf32>
    %137 = vector.extract_strided_slice %136 {offsets = [0, 0], sizes = [16, 128], strides = [1, 1]} : vector<16x384xf32> to vector<16x128xf32>
    %138 = vector.extract_strided_slice %133 {offsets = [0, 0], sizes = [16, 128], strides = [1, 1]} : vector<16x384xf32> to vector<16x128xf32>
    %139 = arith.addf %137, %138 : vector<16x128xf32>
    %140 = arith.negf %139 : vector<16x128xf32>
    %141 = math.exp %140 : vector<16x128xf32>
    %cst_41 = arith.constant 1.000000e+00 : f32
    %142 = vector.broadcast %cst_41 : f32 to vector<16x128xf32>
    %143 = arith.addf %142, %141 : vector<16x128xf32>
    %144 = arith.divf %142, %143 : vector<16x128xf32>
    %145 = vector.extract_strided_slice %136 {offsets = [0, 128], sizes = [16, 128], strides = [1, 1]} : vector<16x384xf32> to vector<16x128xf32>
    %146 = vector.extract_strided_slice %133 {offsets = [0, 128], sizes = [16, 128], strides = [1, 1]} : vector<16x384xf32> to vector<16x128xf32>
    %147 = arith.addf %145, %146 : vector<16x128xf32>
    %148 = arith.negf %147 : vector<16x128xf32>
    %149 = math.exp %148 : vector<16x128xf32>
    %cst_42 = arith.constant 1.000000e+00 : f32
    %150 = vector.broadcast %cst_42 : f32 to vector<16x128xf32>
    %151 = arith.addf %150, %149 : vector<16x128xf32>
    %152 = arith.divf %150, %151 : vector<16x128xf32>
    %153 = vector.extract_strided_slice %136 {offsets = [0, 256], sizes = [16, 128], strides = [1, 1]} : vector<16x384xf32> to vector<16x128xf32>
    %154 = vector.extract_strided_slice %133 {offsets = [0, 256], sizes = [16, 128], strides = [1, 1]} : vector<16x384xf32> to vector<16x128xf32>
    %155 = arith.addf %154, %16 : vector<16x128xf32>
    %156 = arith.mulf %144, %155 : vector<16x128xf32>
    %157 = arith.addf %153, %156 : vector<16x128xf32>
    %158 = math.tanh %157 : vector<16x128xf32>
    %cst_43 = arith.constant 1.000000e+00 : f32
    %159 = vector.broadcast %cst_43 : f32 to vector<16x128xf32>
    %160 = arith.subf %159, %152 : vector<16x128xf32>
    %161 = arith.mulf %160, %158 : vector<16x128xf32>
    %162 = arith.mulf %152, %116 : vector<16x128xf32>
    %163 = arith.addf %161, %162 : vector<16x128xf32>
    %164 = arith.addf %131, %13 : vector<16x384xf32>
    %165 = vector.extract_strided_slice %164 {offsets = [0, 0], sizes = [16, 128], strides = [1, 1]} : vector<16x384xf32> to vector<16x128xf32>
    %166 = vector.extract_strided_slice %135 {offsets = [0, 0], sizes = [16, 128], strides = [1, 1]} : vector<16x384xf32> to vector<16x128xf32>
    %167 = arith.addf %165, %166 : vector<16x128xf32>
    %168 = arith.negf %167 : vector<16x128xf32>
    %169 = math.exp %168 : vector<16x128xf32>
    %cst_44 = arith.constant 1.000000e+00 : f32
    %170 = vector.broadcast %cst_44 : f32 to vector<16x128xf32>
    %171 = arith.addf %170, %169 : vector<16x128xf32>
    %172 = arith.divf %170, %171 : vector<16x128xf32>
    %173 = vector.extract_strided_slice %164 {offsets = [0, 128], sizes = [16, 128], strides = [1, 1]} : vector<16x384xf32> to vector<16x128xf32>
    %174 = vector.extract_strided_slice %135 {offsets = [0, 128], sizes = [16, 128], strides = [1, 1]} : vector<16x384xf32> to vector<16x128xf32>
    %175 = arith.addf %173, %174 : vector<16x128xf32>
    %176 = arith.negf %175 : vector<16x128xf32>
    %177 = math.exp %176 : vector<16x128xf32>
    %cst_45 = arith.constant 1.000000e+00 : f32
    %178 = vector.broadcast %cst_45 : f32 to vector<16x128xf32>
    %179 = arith.addf %178, %177 : vector<16x128xf32>
    %180 = arith.divf %178, %179 : vector<16x128xf32>
    %181 = vector.extract_strided_slice %164 {offsets = [0, 256], sizes = [16, 128], strides = [1, 1]} : vector<16x384xf32> to vector<16x128xf32>
    %182 = vector.extract_strided_slice %135 {offsets = [0, 256], sizes = [16, 128], strides = [1, 1]} : vector<16x384xf32> to vector<16x128xf32>
    %183 = arith.addf %182, %19 : vector<16x128xf32>
    %184 = arith.mulf %172, %183 : vector<16x128xf32>
    %185 = arith.addf %181, %184 : vector<16x128xf32>
    %186 = math.tanh %185 : vector<16x128xf32>
    %cst_46 = arith.constant 1.000000e+00 : f32
    %187 = vector.broadcast %cst_46 : f32 to vector<16x128xf32>
    %188 = arith.subf %187, %180 : vector<16x128xf32>
    %189 = arith.mulf %188, %186 : vector<16x128xf32>
    %190 = arith.mulf %180, %120 : vector<16x128xf32>
    %191 = arith.addf %189, %190 : vector<16x128xf32>
    %192 = vector.broadcast %c1_i32 : i32 to vector<16x1xi32>
    %193 = arith.cmpi sgt, %20, %192 : vector<16x1xi32>
    %194 = arith.extui %193 : vector<16x1xi1> to vector<16x1xi32>
    %195 = arith.sitofp %194 : vector<16x1xi32> to vector<16x1xf32>
    %196 = vector.broadcast %121 : i32 to vector<16x1xi32>
    %197 = arith.cmpi sgt, %20, %196 : vector<16x1xi32>
    %198 = arith.extui %197 : vector<16x1xi1> to vector<16x1xi32>
    %199 = arith.sitofp %198 : vector<16x1xi32> to vector<16x1xf32>
    %200 = vector.broadcast %195 : vector<16x1xf32> to vector<16x128xf32>
    %201 = arith.mulf %200, %163 : vector<16x128xf32>
    %202 = arith.index_cast %c1_i32 : i32 to index
    %c0_47 = arith.constant 0 : index
    %c0_48 = arith.constant 0 : index
    %203 = vector.load %arg7[%202, %c0_47, %c0_48] : memref<8x16x128xf32, #tpu.memory_space<vmem>>, vector<1x16x128xf32>
    %204 = vector.shape_cast %203 : vector<1x16x128xf32> to vector<16x128xf32>
    %205 = vector.shape_cast %201 : vector<16x128xf32> to vector<1x16x128xf32>
    tpu.vector_store %arg7[%202, %c0_47, %c0_48], %205 {strides = array<i32>} : memref<8x16x128xf32, #tpu.memory_space<vmem>>, vector<1x16x128xf32>,
    %206 = vector.broadcast %199 : vector<16x1xf32> to vector<16x128xf32>
    %207 = arith.mulf %206, %191 : vector<16x128xf32>
    %208 = arith.index_cast %121 : i32 to index
    %c0_49 = arith.constant 0 : index
    %c0_50 = arith.constant 0 : index
    %209 = vector.load %arg10[%208, %c0_49, %c0_50] : memref<8x16x128xf32, #tpu.memory_space<vmem>>, vector<1x16x128xf32>
    %210 = vector.shape_cast %209 : vector<1x16x128xf32> to vector<16x128xf32>
    %211 = vector.shape_cast %207 : vector<16x128xf32> to vector<1x16x128xf32>
    tpu.vector_store %arg10[%208, %c0_49, %c0_50], %211 {strides = array<i32>} : memref<8x16x128xf32, #tpu.memory_space<vmem>>, vector<1x16x128xf32>,
    %212 = arith.subf %163, %116 : vector<16x128xf32>
    %213 = vector.broadcast %195 : vector<16x1xf32> to vector<16x128xf32>
    %214 = arith.mulf %213, %212 : vector<16x128xf32>
    %215 = arith.addf %116, %214 : vector<16x128xf32>
    %216 = arith.subf %191, %120 : vector<16x128xf32>
    %217 = vector.broadcast %199 : vector<16x1xf32> to vector<16x128xf32>
    %218 = arith.mulf %217, %216 : vector<16x128xf32>
    %219 = arith.addf %120, %218 : vector<16x128xf32>
    %c2_i32 = arith.constant 2 : i32
    %c7_i32_51 = arith.constant 7 : i32
    %220 = arith.subi %c7_i32_51, %c2_i32 : i32
    %c16_i32_52 = arith.constant 16 : i32
    %221 = arith.muli %c2_i32, %c16_i32_52 : i32
    %222 = tpu.assume_multiple %221, 16 : i32
    %c16_i32_53 = arith.constant 16 : i32
    %223 = arith.muli %220, %c16_i32_53 : i32
    %224 = tpu.assume_multiple %223, 16 : i32
    %225 = arith.index_cast %222 : i32 to index
    %c0_54 = arith.constant 0 : index
    %226 = vector.load %arg9[%225, %c0_54] : memref<128x768xbf16, #tpu.memory_space<vmem>>, vector<16x384xbf16>
    %227 = arith.extf %226 : vector<16x384xbf16> to vector<16x384xf32>
    %228 = arith.index_cast %224 : i32 to index
    %c384_55 = arith.constant 384 : index
    %229 = vector.load %arg9[%228, %c384_55] : memref<128x768xbf16, #tpu.memory_space<vmem>>, vector<16x384xbf16>
    %230 = arith.extf %229 : vector<16x384xbf16> to vector<16x384xf32>
    %231 = arith.truncf %215 : vector<16x128xf32> to vector<16x128xbf16>
    %cst_56 = arith.constant dense<0.000000e+00> : vector<16x384xf32>
    %232 = tpu.matmul %231, %6, %cst_56 {dimension_numbers = #tpu.dot_dimension_numbers<[1], [0], [0], [1], [0, 0, 1, 1], [], []>} : vector<16x128xbf16>, vector<128x384xbf16>, vector<16x384xf32> -> vector<16x384xf32>
    %233 = arith.truncf %219 : vector<16x128xf32> to vector<16x128xbf16>
    %cst_57 = arith.constant dense<0.000000e+00> : vector<16x384xf32>
    %234 = tpu.matmul %233, %7, %cst_57 {dimension_numbers = #tpu.dot_dimension_numbers<[1], [0], [0], [1], [0, 0, 1, 1], [], []>} : vector<16x128xbf16>, vector<128x384xbf16>, vector<16x384xf32> -> vector<16x384xf32>
    %235 = arith.addf %227, %10 : vector<16x384xf32>
    %236 = vector.extract_strided_slice %235 {offsets = [0, 0], sizes = [16, 128], strides = [1, 1]} : vector<16x384xf32> to vector<16x128xf32>
    %237 = vector.extract_strided_slice %232 {offsets = [0, 0], sizes = [16, 128], strides = [1, 1]} : vector<16x384xf32> to vector<16x128xf32>
    %238 = arith.addf %236, %237 : vector<16x128xf32>
    %239 = arith.negf %238 : vector<16x128xf32>
    %240 = math.exp %239 : vector<16x128xf32>
    %cst_58 = arith.constant 1.000000e+00 : f32
    %241 = vector.broadcast %cst_58 : f32 to vector<16x128xf32>
    %242 = arith.addf %241, %240 : vector<16x128xf32>
    %243 = arith.divf %241, %242 : vector<16x128xf32>
    %244 = vector.extract_strided_slice %235 {offsets = [0, 128], sizes = [16, 128], strides = [1, 1]} : vector<16x384xf32> to vector<16x128xf32>
    %245 = vector.extract_strided_slice %232 {offsets = [0, 128], sizes = [16, 128], strides = [1, 1]} : vector<16x384xf32> to vector<16x128xf32>
    %246 = arith.addf %244, %245 : vector<16x128xf32>
    %247 = arith.negf %246 : vector<16x128xf32>
    %248 = math.exp %247 : vector<16x128xf32>
    %cst_59 = arith.constant 1.000000e+00 : f32
    %249 = vector.broadcast %cst_59 : f32 to vector<16x128xf32>
    %250 = arith.addf %249, %248 : vector<16x128xf32>
    %251 = arith.divf %249, %250 : vector<16x128xf32>
    %252 = vector.extract_strided_slice %235 {offsets = [0, 256], sizes = [16, 128], strides = [1, 1]} : vector<16x384xf32> to vector<16x128xf32>
    %253 = vector.extract_strided_slice %232 {offsets = [0, 256], sizes = [16, 128], strides = [1, 1]} : vector<16x384xf32> to vector<16x128xf32>
    %254 = arith.addf %253, %16 : vector<16x128xf32>
    %255 = arith.mulf %243, %254 : vector<16x128xf32>
    %256 = arith.addf %252, %255 : vector<16x128xf32>
    %257 = math.tanh %256 : vector<16x128xf32>
    %cst_60 = arith.constant 1.000000e+00 : f32
    %258 = vector.broadcast %cst_60 : f32 to vector<16x128xf32>
    %259 = arith.subf %258, %251 : vector<16x128xf32>
    %260 = arith.mulf %259, %257 : vector<16x128xf32>
    %261 = arith.mulf %251, %215 : vector<16x128xf32>
    %262 = arith.addf %260, %261 : vector<16x128xf32>
    %263 = arith.addf %230, %13 : vector<16x384xf32>
    %264 = vector.extract_strided_slice %263 {offsets = [0, 0], sizes = [16, 128], strides = [1, 1]} : vector<16x384xf32> to vector<16x128xf32>
    %265 = vector.extract_strided_slice %234 {offsets = [0, 0], sizes = [16, 128], strides = [1, 1]} : vector<16x384xf32> to vector<16x128xf32>
    %266 = arith.addf %264, %265 : vector<16x128xf32>
    %267 = arith.negf %266 : vector<16x128xf32>
    %268 = math.exp %267 : vector<16x128xf32>
    %cst_61 = arith.constant 1.000000e+00 : f32
    %269 = vector.broadcast %cst_61 : f32 to vector<16x128xf32>
    %270 = arith.addf %269, %268 : vector<16x128xf32>
    %271 = arith.divf %269, %270 : vector<16x128xf32>
    %272 = vector.extract_strided_slice %263 {offsets = [0, 128], sizes = [16, 128], strides = [1, 1]} : vector<16x384xf32> to vector<16x128xf32>
    %273 = vector.extract_strided_slice %234 {offsets = [0, 128], sizes = [16, 128], strides = [1, 1]} : vector<16x384xf32> to vector<16x128xf32>
    %274 = arith.addf %272, %273 : vector<16x128xf32>
    %275 = arith.negf %274 : vector<16x128xf32>
    %276 = math.exp %275 : vector<16x128xf32>
    %cst_62 = arith.constant 1.000000e+00 : f32
    %277 = vector.broadcast %cst_62 : f32 to vector<16x128xf32>
    %278 = arith.addf %277, %276 : vector<16x128xf32>
    %279 = arith.divf %277, %278 : vector<16x128xf32>
    %280 = vector.extract_strided_slice %263 {offsets = [0, 256], sizes = [16, 128], strides = [1, 1]} : vector<16x384xf32> to vector<16x128xf32>
    %281 = vector.extract_strided_slice %234 {offsets = [0, 256], sizes = [16, 128], strides = [1, 1]} : vector<16x384xf32> to vector<16x128xf32>
    %282 = arith.addf %281, %19 : vector<16x128xf32>
    %283 = arith.mulf %271, %282 : vector<16x128xf32>
    %284 = arith.addf %280, %283 : vector<16x128xf32>
    %285 = math.tanh %284 : vector<16x128xf32>
    %cst_63 = arith.constant 1.000000e+00 : f32
    %286 = vector.broadcast %cst_63 : f32 to vector<16x128xf32>
    %287 = arith.subf %286, %279 : vector<16x128xf32>
    %288 = arith.mulf %287, %285 : vector<16x128xf32>
    %289 = arith.mulf %279, %219 : vector<16x128xf32>
    %290 = arith.addf %288, %289 : vector<16x128xf32>
    %291 = vector.broadcast %c2_i32 : i32 to vector<16x1xi32>
    %292 = arith.cmpi sgt, %20, %291 : vector<16x1xi32>
    %293 = arith.extui %292 : vector<16x1xi1> to vector<16x1xi32>
    %294 = arith.sitofp %293 : vector<16x1xi32> to vector<16x1xf32>
    %295 = vector.broadcast %220 : i32 to vector<16x1xi32>
    %296 = arith.cmpi sgt, %20, %295 : vector<16x1xi32>
    %297 = arith.extui %296 : vector<16x1xi1> to vector<16x1xi32>
    %298 = arith.sitofp %297 : vector<16x1xi32> to vector<16x1xf32>
    %299 = vector.broadcast %294 : vector<16x1xf32> to vector<16x128xf32>
    %300 = arith.mulf %299, %262 : vector<16x128xf32>
    %301 = arith.index_cast %c2_i32 : i32 to index
    %c0_64 = arith.constant 0 : index
    %c0_65 = arith.constant 0 : index
    %302 = vector.load %arg7[%301, %c0_64, %c0_65] : memref<8x16x128xf32, #tpu.memory_space<vmem>>, vector<1x16x128xf32>
    %303 = vector.shape_cast %302 : vector<1x16x128xf32> to vector<16x128xf32>
    %304 = vector.shape_cast %300 : vector<16x128xf32> to vector<1x16x128xf32>
    tpu.vector_store %arg7[%301, %c0_64, %c0_65], %304 {strides = array<i32>} : memref<8x16x128xf32, #tpu.memory_space<vmem>>, vector<1x16x128xf32>,
    %305 = vector.broadcast %298 : vector<16x1xf32> to vector<16x128xf32>
    %306 = arith.mulf %305, %290 : vector<16x128xf32>
    %307 = arith.index_cast %220 : i32 to index
    %c0_66 = arith.constant 0 : index
    %c0_67 = arith.constant 0 : index
    %308 = vector.load %arg10[%307, %c0_66, %c0_67] : memref<8x16x128xf32, #tpu.memory_space<vmem>>, vector<1x16x128xf32>
    %309 = vector.shape_cast %308 : vector<1x16x128xf32> to vector<16x128xf32>
    %310 = vector.shape_cast %306 : vector<16x128xf32> to vector<1x16x128xf32>
    tpu.vector_store %arg10[%307, %c0_66, %c0_67], %310 {strides = array<i32>} : memref<8x16x128xf32, #tpu.memory_space<vmem>>, vector<1x16x128xf32>,
    %311 = arith.subf %262, %215 : vector<16x128xf32>
    %312 = vector.broadcast %294 : vector<16x1xf32> to vector<16x128xf32>
    %313 = arith.mulf %312, %311 : vector<16x128xf32>
    %314 = arith.addf %215, %313 : vector<16x128xf32>
    %315 = arith.subf %290, %219 : vector<16x128xf32>
    %316 = vector.broadcast %298 : vector<16x1xf32> to vector<16x128xf32>
    %317 = arith.mulf %316, %315 : vector<16x128xf32>
    %318 = arith.addf %219, %317 : vector<16x128xf32>
    %c3_i32 = arith.constant 3 : i32
    %c7_i32_68 = arith.constant 7 : i32
    %319 = arith.subi %c7_i32_68, %c3_i32 : i32
    %c16_i32_69 = arith.constant 16 : i32
    %320 = arith.muli %c3_i32, %c16_i32_69 : i32
    %321 = tpu.assume_multiple %320, 16 : i32
    %c16_i32_70 = arith.constant 16 : i32
    %322 = arith.muli %319, %c16_i32_70 : i32
    %323 = tpu.assume_multiple %322, 16 : i32
    %324 = arith.index_cast %321 : i32 to index
    %c0_71 = arith.constant 0 : index
    %325 = vector.load %arg9[%324, %c0_71] : memref<128x768xbf16, #tpu.memory_space<vmem>>, vector<16x384xbf16>
    %326 = arith.extf %325 : vector<16x384xbf16> to vector<16x384xf32>
    %327 = arith.index_cast %323 : i32 to index
    %c384_72 = arith.constant 384 : index
    %328 = vector.load %arg9[%327, %c384_72] : memref<128x768xbf16, #tpu.memory_space<vmem>>, vector<16x384xbf16>
    %329 = arith.extf %328 : vector<16x384xbf16> to vector<16x384xf32>
    %330 = arith.truncf %314 : vector<16x128xf32> to vector<16x128xbf16>
    %cst_73 = arith.constant dense<0.000000e+00> : vector<16x384xf32>
    %331 = tpu.matmul %330, %6, %cst_73 {dimension_numbers = #tpu.dot_dimension_numbers<[1], [0], [0], [1], [0, 0, 1, 1], [], []>} : vector<16x128xbf16>, vector<128x384xbf16>, vector<16x384xf32> -> vector<16x384xf32>
    %332 = arith.truncf %318 : vector<16x128xf32> to vector<16x128xbf16>
    %cst_74 = arith.constant dense<0.000000e+00> : vector<16x384xf32>
    %333 = tpu.matmul %332, %7, %cst_74 {dimension_numbers = #tpu.dot_dimension_numbers<[1], [0], [0], [1], [0, 0, 1, 1], [], []>} : vector<16x128xbf16>, vector<128x384xbf16>, vector<16x384xf32> -> vector<16x384xf32>
    %334 = arith.addf %326, %10 : vector<16x384xf32>
    %335 = vector.extract_strided_slice %334 {offsets = [0, 0], sizes = [16, 128], strides = [1, 1]} : vector<16x384xf32> to vector<16x128xf32>
    %336 = vector.extract_strided_slice %331 {offsets = [0, 0], sizes = [16, 128], strides = [1, 1]} : vector<16x384xf32> to vector<16x128xf32>
    %337 = arith.addf %335, %336 : vector<16x128xf32>
    %338 = arith.negf %337 : vector<16x128xf32>
    %339 = math.exp %338 : vector<16x128xf32>
    %cst_75 = arith.constant 1.000000e+00 : f32
    %340 = vector.broadcast %cst_75 : f32 to vector<16x128xf32>
    %341 = arith.addf %340, %339 : vector<16x128xf32>
    %342 = arith.divf %340, %341 : vector<16x128xf32>
    %343 = vector.extract_strided_slice %334 {offsets = [0, 128], sizes = [16, 128], strides = [1, 1]} : vector<16x384xf32> to vector<16x128xf32>
    %344 = vector.extract_strided_slice %331 {offsets = [0, 128], sizes = [16, 128], strides = [1, 1]} : vector<16x384xf32> to vector<16x128xf32>
    %345 = arith.addf %343, %344 : vector<16x128xf32>
    %346 = arith.negf %345 : vector<16x128xf32>
    %347 = math.exp %346 : vector<16x128xf32>
    %cst_76 = arith.constant 1.000000e+00 : f32
    %348 = vector.broadcast %cst_76 : f32 to vector<16x128xf32>
    %349 = arith.addf %348, %347 : vector<16x128xf32>
    %350 = arith.divf %348, %349 : vector<16x128xf32>
    %351 = vector.extract_strided_slice %334 {offsets = [0, 256], sizes = [16, 128], strides = [1, 1]} : vector<16x384xf32> to vector<16x128xf32>
    %352 = vector.extract_strided_slice %331 {offsets = [0, 256], sizes = [16, 128], strides = [1, 1]} : vector<16x384xf32> to vector<16x128xf32>
    %353 = arith.addf %352, %16 : vector<16x128xf32>
    %354 = arith.mulf %342, %353 : vector<16x128xf32>
    %355 = arith.addf %351, %354 : vector<16x128xf32>
    %356 = math.tanh %355 : vector<16x128xf32>
    %cst_77 = arith.constant 1.000000e+00 : f32
    %357 = vector.broadcast %cst_77 : f32 to vector<16x128xf32>
    %358 = arith.subf %357, %350 : vector<16x128xf32>
    %359 = arith.mulf %358, %356 : vector<16x128xf32>
    %360 = arith.mulf %350, %314 : vector<16x128xf32>
    %361 = arith.addf %359, %360 : vector<16x128xf32>
    %362 = arith.addf %329, %13 : vector<16x384xf32>
    %363 = vector.extract_strided_slice %362 {offsets = [0, 0], sizes = [16, 128], strides = [1, 1]} : vector<16x384xf32> to vector<16x128xf32>
    %364 = vector.extract_strided_slice %333 {offsets = [0, 0], sizes = [16, 128], strides = [1, 1]} : vector<16x384xf32> to vector<16x128xf32>
    %365 = arith.addf %363, %364 : vector<16x128xf32>
    %366 = arith.negf %365 : vector<16x128xf32>
    %367 = math.exp %366 : vector<16x128xf32>
    %cst_78 = arith.constant 1.000000e+00 : f32
    %368 = vector.broadcast %cst_78 : f32 to vector<16x128xf32>
    %369 = arith.addf %368, %367 : vector<16x128xf32>
    %370 = arith.divf %368, %369 : vector<16x128xf32>
    %371 = vector.extract_strided_slice %362 {offsets = [0, 128], sizes = [16, 128], strides = [1, 1]} : vector<16x384xf32> to vector<16x128xf32>
    %372 = vector.extract_strided_slice %333 {offsets = [0, 128], sizes = [16, 128], strides = [1, 1]} : vector<16x384xf32> to vector<16x128xf32>
    %373 = arith.addf %371, %372 : vector<16x128xf32>
    %374 = arith.negf %373 : vector<16x128xf32>
    %375 = math.exp %374 : vector<16x128xf32>
    %cst_79 = arith.constant 1.000000e+00 : f32
    %376 = vector.broadcast %cst_79 : f32 to vector<16x128xf32>
    %377 = arith.addf %376, %375 : vector<16x128xf32>
    %378 = arith.divf %376, %377 : vector<16x128xf32>
    %379 = vector.extract_strided_slice %362 {offsets = [0, 256], sizes = [16, 128], strides = [1, 1]} : vector<16x384xf32> to vector<16x128xf32>
    %380 = vector.extract_strided_slice %333 {offsets = [0, 256], sizes = [16, 128], strides = [1, 1]} : vector<16x384xf32> to vector<16x128xf32>
    %381 = arith.addf %380, %19 : vector<16x128xf32>
    %382 = arith.mulf %370, %381 : vector<16x128xf32>
    %383 = arith.addf %379, %382 : vector<16x128xf32>
    %384 = math.tanh %383 : vector<16x128xf32>
    %cst_80 = arith.constant 1.000000e+00 : f32
    %385 = vector.broadcast %cst_80 : f32 to vector<16x128xf32>
    %386 = arith.subf %385, %378 : vector<16x128xf32>
    %387 = arith.mulf %386, %384 : vector<16x128xf32>
    %388 = arith.mulf %378, %318 : vector<16x128xf32>
    %389 = arith.addf %387, %388 : vector<16x128xf32>
    %390 = vector.broadcast %c3_i32 : i32 to vector<16x1xi32>
    %391 = arith.cmpi sgt, %20, %390 : vector<16x1xi32>
    %392 = arith.extui %391 : vector<16x1xi1> to vector<16x1xi32>
    %393 = arith.sitofp %392 : vector<16x1xi32> to vector<16x1xf32>
    %394 = vector.broadcast %319 : i32 to vector<16x1xi32>
    %395 = arith.cmpi sgt, %20, %394 : vector<16x1xi32>
    %396 = arith.extui %395 : vector<16x1xi1> to vector<16x1xi32>
    %397 = arith.sitofp %396 : vector<16x1xi32> to vector<16x1xf32>
    %398 = vector.broadcast %393 : vector<16x1xf32> to vector<16x128xf32>
    %399 = arith.mulf %398, %361 : vector<16x128xf32>
    %400 = arith.index_cast %c3_i32 : i32 to index
    %c0_81 = arith.constant 0 : index
    %c0_82 = arith.constant 0 : index
    %401 = vector.load %arg7[%400, %c0_81, %c0_82] : memref<8x16x128xf32, #tpu.memory_space<vmem>>, vector<1x16x128xf32>
    %402 = vector.shape_cast %401 : vector<1x16x128xf32> to vector<16x128xf32>
    %403 = vector.shape_cast %399 : vector<16x128xf32> to vector<1x16x128xf32>
    tpu.vector_store %arg7[%400, %c0_81, %c0_82], %403 {strides = array<i32>} : memref<8x16x128xf32, #tpu.memory_space<vmem>>, vector<1x16x128xf32>,
    %404 = vector.broadcast %397 : vector<16x1xf32> to vector<16x128xf32>
    %405 = arith.mulf %404, %389 : vector<16x128xf32>
    %406 = arith.index_cast %319 : i32 to index
    %c0_83 = arith.constant 0 : index
    %c0_84 = arith.constant 0 : index
    %407 = vector.load %arg10[%406, %c0_83, %c0_84] : memref<8x16x128xf32, #tpu.memory_space<vmem>>, vector<1x16x128xf32>
    %408 = vector.shape_cast %407 : vector<1x16x128xf32> to vector<16x128xf32>
    %409 = vector.shape_cast %405 : vector<16x128xf32> to vector<1x16x128xf32>
    tpu.vector_store %arg10[%406, %c0_83, %c0_84], %409 {strides = array<i32>} : memref<8x16x128xf32, #tpu.memory_space<vmem>>, vector<1x16x128xf32>,
    %410 = arith.subf %361, %314 : vector<16x128xf32>
    %411 = vector.broadcast %393 : vector<16x1xf32> to vector<16x128xf32>
    %412 = arith.mulf %411, %410 : vector<16x128xf32>
    %413 = arith.addf %314, %412 : vector<16x128xf32>
    %414 = arith.subf %389, %318 : vector<16x128xf32>
    %415 = vector.broadcast %397 : vector<16x1xf32> to vector<16x128xf32>
    %416 = arith.mulf %415, %414 : vector<16x128xf32>
    %417 = arith.addf %318, %416 : vector<16x128xf32>
    %c4_i32 = arith.constant 4 : i32
    %c7_i32_85 = arith.constant 7 : i32
    %418 = arith.subi %c7_i32_85, %c4_i32 : i32
    %c16_i32_86 = arith.constant 16 : i32
    %419 = arith.muli %c4_i32, %c16_i32_86 : i32
    %420 = tpu.assume_multiple %419, 16 : i32
    %c16_i32_87 = arith.constant 16 : i32
    %421 = arith.muli %418, %c16_i32_87 : i32
    %422 = tpu.assume_multiple %421, 16 : i32
    %423 = arith.index_cast %420 : i32 to index
    %c0_88 = arith.constant 0 : index
    %424 = vector.load %arg9[%423, %c0_88] : memref<128x768xbf16, #tpu.memory_space<vmem>>, vector<16x384xbf16>
    %425 = arith.extf %424 : vector<16x384xbf16> to vector<16x384xf32>
    %426 = arith.index_cast %422 : i32 to index
    %c384_89 = arith.constant 384 : index
    %427 = vector.load %arg9[%426, %c384_89] : memref<128x768xbf16, #tpu.memory_space<vmem>>, vector<16x384xbf16>
    %428 = arith.extf %427 : vector<16x384xbf16> to vector<16x384xf32>
    %429 = arith.truncf %413 : vector<16x128xf32> to vector<16x128xbf16>
    %cst_90 = arith.constant dense<0.000000e+00> : vector<16x384xf32>
    %430 = tpu.matmul %429, %6, %cst_90 {dimension_numbers = #tpu.dot_dimension_numbers<[1], [0], [0], [1], [0, 0, 1, 1], [], []>} : vector<16x128xbf16>, vector<128x384xbf16>, vector<16x384xf32> -> vector<16x384xf32>
    %431 = arith.truncf %417 : vector<16x128xf32> to vector<16x128xbf16>
    %cst_91 = arith.constant dense<0.000000e+00> : vector<16x384xf32>
    %432 = tpu.matmul %431, %7, %cst_91 {dimension_numbers = #tpu.dot_dimension_numbers<[1], [0], [0], [1], [0, 0, 1, 1], [], []>} : vector<16x128xbf16>, vector<128x384xbf16>, vector<16x384xf32> -> vector<16x384xf32>
    %433 = arith.addf %425, %10 : vector<16x384xf32>
    %434 = vector.extract_strided_slice %433 {offsets = [0, 0], sizes = [16, 128], strides = [1, 1]} : vector<16x384xf32> to vector<16x128xf32>
    %435 = vector.extract_strided_slice %430 {offsets = [0, 0], sizes = [16, 128], strides = [1, 1]} : vector<16x384xf32> to vector<16x128xf32>
    %436 = arith.addf %434, %435 : vector<16x128xf32>
    %437 = arith.negf %436 : vector<16x128xf32>
    %438 = math.exp %437 : vector<16x128xf32>
    %cst_92 = arith.constant 1.000000e+00 : f32
    %439 = vector.broadcast %cst_92 : f32 to vector<16x128xf32>
    %440 = arith.addf %439, %438 : vector<16x128xf32>
    %441 = arith.divf %439, %440 : vector<16x128xf32>
    %442 = vector.extract_strided_slice %433 {offsets = [0, 128], sizes = [16, 128], strides = [1, 1]} : vector<16x384xf32> to vector<16x128xf32>
    %443 = vector.extract_strided_slice %430 {offsets = [0, 128], sizes = [16, 128], strides = [1, 1]} : vector<16x384xf32> to vector<16x128xf32>
    %444 = arith.addf %442, %443 : vector<16x128xf32>
    %445 = arith.negf %444 : vector<16x128xf32>
    %446 = math.exp %445 : vector<16x128xf32>
    %cst_93 = arith.constant 1.000000e+00 : f32
    %447 = vector.broadcast %cst_93 : f32 to vector<16x128xf32>
    %448 = arith.addf %447, %446 : vector<16x128xf32>
    %449 = arith.divf %447, %448 : vector<16x128xf32>
    %450 = vector.extract_strided_slice %433 {offsets = [0, 256], sizes = [16, 128], strides = [1, 1]} : vector<16x384xf32> to vector<16x128xf32>
    %451 = vector.extract_strided_slice %430 {offsets = [0, 256], sizes = [16, 128], strides = [1, 1]} : vector<16x384xf32> to vector<16x128xf32>
    %452 = arith.addf %451, %16 : vector<16x128xf32>
    %453 = arith.mulf %441, %452 : vector<16x128xf32>
    %454 = arith.addf %450, %453 : vector<16x128xf32>
    %455 = math.tanh %454 : vector<16x128xf32>
    %cst_94 = arith.constant 1.000000e+00 : f32
    %456 = vector.broadcast %cst_94 : f32 to vector<16x128xf32>
    %457 = arith.subf %456, %449 : vector<16x128xf32>
    %458 = arith.mulf %457, %455 : vector<16x128xf32>
    %459 = arith.mulf %449, %413 : vector<16x128xf32>
    %460 = arith.addf %458, %459 : vector<16x128xf32>
    %461 = arith.addf %428, %13 : vector<16x384xf32>
    %462 = vector.extract_strided_slice %461 {offsets = [0, 0], sizes = [16, 128], strides = [1, 1]} : vector<16x384xf32> to vector<16x128xf32>
    %463 = vector.extract_strided_slice %432 {offsets = [0, 0], sizes = [16, 128], strides = [1, 1]} : vector<16x384xf32> to vector<16x128xf32>
    %464 = arith.addf %462, %463 : vector<16x128xf32>
    %465 = arith.negf %464 : vector<16x128xf32>
    %466 = math.exp %465 : vector<16x128xf32>
    %cst_95 = arith.constant 1.000000e+00 : f32
    %467 = vector.broadcast %cst_95 : f32 to vector<16x128xf32>
    %468 = arith.addf %467, %466 : vector<16x128xf32>
    %469 = arith.divf %467, %468 : vector<16x128xf32>
    %470 = vector.extract_strided_slice %461 {offsets = [0, 128], sizes = [16, 128], strides = [1, 1]} : vector<16x384xf32> to vector<16x128xf32>
    %471 = vector.extract_strided_slice %432 {offsets = [0, 128], sizes = [16, 128], strides = [1, 1]} : vector<16x384xf32> to vector<16x128xf32>
    %472 = arith.addf %470, %471 : vector<16x128xf32>
    %473 = arith.negf %472 : vector<16x128xf32>
    %474 = math.exp %473 : vector<16x128xf32>
    %cst_96 = arith.constant 1.000000e+00 : f32
    %475 = vector.broadcast %cst_96 : f32 to vector<16x128xf32>
    %476 = arith.addf %475, %474 : vector<16x128xf32>
    %477 = arith.divf %475, %476 : vector<16x128xf32>
    %478 = vector.extract_strided_slice %461 {offsets = [0, 256], sizes = [16, 128], strides = [1, 1]} : vector<16x384xf32> to vector<16x128xf32>
    %479 = vector.extract_strided_slice %432 {offsets = [0, 256], sizes = [16, 128], strides = [1, 1]} : vector<16x384xf32> to vector<16x128xf32>
    %480 = arith.addf %479, %19 : vector<16x128xf32>
    %481 = arith.mulf %469, %480 : vector<16x128xf32>
    %482 = arith.addf %478, %481 : vector<16x128xf32>
    %483 = math.tanh %482 : vector<16x128xf32>
    %cst_97 = arith.constant 1.000000e+00 : f32
    %484 = vector.broadcast %cst_97 : f32 to vector<16x128xf32>
    %485 = arith.subf %484, %477 : vector<16x128xf32>
    %486 = arith.mulf %485, %483 : vector<16x128xf32>
    %487 = arith.mulf %477, %417 : vector<16x128xf32>
    %488 = arith.addf %486, %487 : vector<16x128xf32>
    %489 = vector.broadcast %c4_i32 : i32 to vector<16x1xi32>
    %490 = arith.cmpi sgt, %20, %489 : vector<16x1xi32>
    %491 = arith.extui %490 : vector<16x1xi1> to vector<16x1xi32>
    %492 = arith.sitofp %491 : vector<16x1xi32> to vector<16x1xf32>
    %493 = vector.broadcast %418 : i32 to vector<16x1xi32>
    %494 = arith.cmpi sgt, %20, %493 : vector<16x1xi32>
    %495 = arith.extui %494 : vector<16x1xi1> to vector<16x1xi32>
    %496 = arith.sitofp %495 : vector<16x1xi32> to vector<16x1xf32>
    %497 = vector.broadcast %492 : vector<16x1xf32> to vector<16x128xf32>
    %498 = arith.mulf %497, %460 : vector<16x128xf32>
    %499 = arith.index_cast %c4_i32 : i32 to index
    %c0_98 = arith.constant 0 : index
    %c0_99 = arith.constant 0 : index
    %500 = vector.load %arg7[%499, %c0_98, %c0_99] : memref<8x16x128xf32, #tpu.memory_space<vmem>>, vector<1x16x128xf32>
    %501 = vector.shape_cast %500 : vector<1x16x128xf32> to vector<16x128xf32>
    %502 = vector.shape_cast %498 : vector<16x128xf32> to vector<1x16x128xf32>
    tpu.vector_store %arg7[%499, %c0_98, %c0_99], %502 {strides = array<i32>} : memref<8x16x128xf32, #tpu.memory_space<vmem>>, vector<1x16x128xf32>,
    %503 = vector.broadcast %496 : vector<16x1xf32> to vector<16x128xf32>
    %504 = arith.mulf %503, %488 : vector<16x128xf32>
    %505 = arith.index_cast %418 : i32 to index
    %c0_100 = arith.constant 0 : index
    %c0_101 = arith.constant 0 : index
    %506 = vector.load %arg10[%505, %c0_100, %c0_101] : memref<8x16x128xf32, #tpu.memory_space<vmem>>, vector<1x16x128xf32>
    %507 = vector.shape_cast %506 : vector<1x16x128xf32> to vector<16x128xf32>
    %508 = vector.shape_cast %504 : vector<16x128xf32> to vector<1x16x128xf32>
    tpu.vector_store %arg10[%505, %c0_100, %c0_101], %508 {strides = array<i32>} : memref<8x16x128xf32, #tpu.memory_space<vmem>>, vector<1x16x128xf32>,
    %509 = arith.subf %460, %413 : vector<16x128xf32>
    %510 = vector.broadcast %492 : vector<16x1xf32> to vector<16x128xf32>
    %511 = arith.mulf %510, %509 : vector<16x128xf32>
    %512 = arith.addf %413, %511 : vector<16x128xf32>
    %513 = arith.subf %488, %417 : vector<16x128xf32>
    %514 = vector.broadcast %496 : vector<16x1xf32> to vector<16x128xf32>
    %515 = arith.mulf %514, %513 : vector<16x128xf32>
    %516 = arith.addf %417, %515 : vector<16x128xf32>
    %c5_i32 = arith.constant 5 : i32
    %c7_i32_102 = arith.constant 7 : i32
    %517 = arith.subi %c7_i32_102, %c5_i32 : i32
    %c16_i32_103 = arith.constant 16 : i32
    %518 = arith.muli %c5_i32, %c16_i32_103 : i32
    %519 = tpu.assume_multiple %518, 16 : i32
    %c16_i32_104 = arith.constant 16 : i32
    %520 = arith.muli %517, %c16_i32_104 : i32
    %521 = tpu.assume_multiple %520, 16 : i32
    %522 = arith.index_cast %519 : i32 to index
    %c0_105 = arith.constant 0 : index
    %523 = vector.load %arg9[%522, %c0_105] : memref<128x768xbf16, #tpu.memory_space<vmem>>, vector<16x384xbf16>
    %524 = arith.extf %523 : vector<16x384xbf16> to vector<16x384xf32>
    %525 = arith.index_cast %521 : i32 to index
    %c384_106 = arith.constant 384 : index
    %526 = vector.load %arg9[%525, %c384_106] : memref<128x768xbf16, #tpu.memory_space<vmem>>, vector<16x384xbf16>
    %527 = arith.extf %526 : vector<16x384xbf16> to vector<16x384xf32>
    %528 = arith.truncf %512 : vector<16x128xf32> to vector<16x128xbf16>
    %cst_107 = arith.constant dense<0.000000e+00> : vector<16x384xf32>
    %529 = tpu.matmul %528, %6, %cst_107 {dimension_numbers = #tpu.dot_dimension_numbers<[1], [0], [0], [1], [0, 0, 1, 1], [], []>} : vector<16x128xbf16>, vector<128x384xbf16>, vector<16x384xf32> -> vector<16x384xf32>
    %530 = arith.truncf %516 : vector<16x128xf32> to vector<16x128xbf16>
    %cst_108 = arith.constant dense<0.000000e+00> : vector<16x384xf32>
    %531 = tpu.matmul %530, %7, %cst_108 {dimension_numbers = #tpu.dot_dimension_numbers<[1], [0], [0], [1], [0, 0, 1, 1], [], []>} : vector<16x128xbf16>, vector<128x384xbf16>, vector<16x384xf32> -> vector<16x384xf32>
    %532 = arith.addf %524, %10 : vector<16x384xf32>
    %533 = vector.extract_strided_slice %532 {offsets = [0, 0], sizes = [16, 128], strides = [1, 1]} : vector<16x384xf32> to vector<16x128xf32>
    %534 = vector.extract_strided_slice %529 {offsets = [0, 0], sizes = [16, 128], strides = [1, 1]} : vector<16x384xf32> to vector<16x128xf32>
    %535 = arith.addf %533, %534 : vector<16x128xf32>
    %536 = arith.negf %535 : vector<16x128xf32>
    %537 = math.exp %536 : vector<16x128xf32>
    %cst_109 = arith.constant 1.000000e+00 : f32
    %538 = vector.broadcast %cst_109 : f32 to vector<16x128xf32>
    %539 = arith.addf %538, %537 : vector<16x128xf32>
    %540 = arith.divf %538, %539 : vector<16x128xf32>
    %541 = vector.extract_strided_slice %532 {offsets = [0, 128], sizes = [16, 128], strides = [1, 1]} : vector<16x384xf32> to vector<16x128xf32>
    %542 = vector.extract_strided_slice %529 {offsets = [0, 128], sizes = [16, 128], strides = [1, 1]} : vector<16x384xf32> to vector<16x128xf32>
    %543 = arith.addf %541, %542 : vector<16x128xf32>
    %544 = arith.negf %543 : vector<16x128xf32>
    %545 = math.exp %544 : vector<16x128xf32>
    %cst_110 = arith.constant 1.000000e+00 : f32
    %546 = vector.broadcast %cst_110 : f32 to vector<16x128xf32>
    %547 = arith.addf %546, %545 : vector<16x128xf32>
    %548 = arith.divf %546, %547 : vector<16x128xf32>
    %549 = vector.extract_strided_slice %532 {offsets = [0, 256], sizes = [16, 128], strides = [1, 1]} : vector<16x384xf32> to vector<16x128xf32>
    %550 = vector.extract_strided_slice %529 {offsets = [0, 256], sizes = [16, 128], strides = [1, 1]} : vector<16x384xf32> to vector<16x128xf32>
    %551 = arith.addf %550, %16 : vector<16x128xf32>
    %552 = arith.mulf %540, %551 : vector<16x128xf32>
    %553 = arith.addf %549, %552 : vector<16x128xf32>
    %554 = math.tanh %553 : vector<16x128xf32>
    %cst_111 = arith.constant 1.000000e+00 : f32
    %555 = vector.broadcast %cst_111 : f32 to vector<16x128xf32>
    %556 = arith.subf %555, %548 : vector<16x128xf32>
    %557 = arith.mulf %556, %554 : vector<16x128xf32>
    %558 = arith.mulf %548, %512 : vector<16x128xf32>
    %559 = arith.addf %557, %558 : vector<16x128xf32>
    %560 = arith.addf %527, %13 : vector<16x384xf32>
    %561 = vector.extract_strided_slice %560 {offsets = [0, 0], sizes = [16, 128], strides = [1, 1]} : vector<16x384xf32> to vector<16x128xf32>
    %562 = vector.extract_strided_slice %531 {offsets = [0, 0], sizes = [16, 128], strides = [1, 1]} : vector<16x384xf32> to vector<16x128xf32>
    %563 = arith.addf %561, %562 : vector<16x128xf32>
    %564 = arith.negf %563 : vector<16x128xf32>
    %565 = math.exp %564 : vector<16x128xf32>
    %cst_112 = arith.constant 1.000000e+00 : f32
    %566 = vector.broadcast %cst_112 : f32 to vector<16x128xf32>
    %567 = arith.addf %566, %565 : vector<16x128xf32>
    %568 = arith.divf %566, %567 : vector<16x128xf32>
    %569 = vector.extract_strided_slice %560 {offsets = [0, 128], sizes = [16, 128], strides = [1, 1]} : vector<16x384xf32> to vector<16x128xf32>
    %570 = vector.extract_strided_slice %531 {offsets = [0, 128], sizes = [16, 128], strides = [1, 1]} : vector<16x384xf32> to vector<16x128xf32>
    %571 = arith.addf %569, %570 : vector<16x128xf32>
    %572 = arith.negf %571 : vector<16x128xf32>
    %573 = math.exp %572 : vector<16x128xf32>
    %cst_113 = arith.constant 1.000000e+00 : f32
    %574 = vector.broadcast %cst_113 : f32 to vector<16x128xf32>
    %575 = arith.addf %574, %573 : vector<16x128xf32>
    %576 = arith.divf %574, %575 : vector<16x128xf32>
    %577 = vector.extract_strided_slice %560 {offsets = [0, 256], sizes = [16, 128], strides = [1, 1]} : vector<16x384xf32> to vector<16x128xf32>
    %578 = vector.extract_strided_slice %531 {offsets = [0, 256], sizes = [16, 128], strides = [1, 1]} : vector<16x384xf32> to vector<16x128xf32>
    %579 = arith.addf %578, %19 : vector<16x128xf32>
    %580 = arith.mulf %568, %579 : vector<16x128xf32>
    %581 = arith.addf %577, %580 : vector<16x128xf32>
    %582 = math.tanh %581 : vector<16x128xf32>
    %cst_114 = arith.constant 1.000000e+00 : f32
    %583 = vector.broadcast %cst_114 : f32 to vector<16x128xf32>
    %584 = arith.subf %583, %576 : vector<16x128xf32>
    %585 = arith.mulf %584, %582 : vector<16x128xf32>
    %586 = arith.mulf %576, %516 : vector<16x128xf32>
    %587 = arith.addf %585, %586 : vector<16x128xf32>
    %588 = vector.broadcast %c5_i32 : i32 to vector<16x1xi32>
    %589 = arith.cmpi sgt, %20, %588 : vector<16x1xi32>
    %590 = arith.extui %589 : vector<16x1xi1> to vector<16x1xi32>
    %591 = arith.sitofp %590 : vector<16x1xi32> to vector<16x1xf32>
    %592 = vector.broadcast %517 : i32 to vector<16x1xi32>
    %593 = arith.cmpi sgt, %20, %592 : vector<16x1xi32>
    %594 = arith.extui %593 : vector<16x1xi1> to vector<16x1xi32>
    %595 = arith.sitofp %594 : vector<16x1xi32> to vector<16x1xf32>
    %596 = vector.broadcast %591 : vector<16x1xf32> to vector<16x128xf32>
    %597 = arith.mulf %596, %559 : vector<16x128xf32>
    %598 = arith.index_cast %c5_i32 : i32 to index
    %c0_115 = arith.constant 0 : index
    %c0_116 = arith.constant 0 : index
    %599 = vector.load %arg7[%598, %c0_115, %c0_116] : memref<8x16x128xf32, #tpu.memory_space<vmem>>, vector<1x16x128xf32>
    %600 = vector.shape_cast %599 : vector<1x16x128xf32> to vector<16x128xf32>
    %601 = vector.shape_cast %597 : vector<16x128xf32> to vector<1x16x128xf32>
    tpu.vector_store %arg7[%598, %c0_115, %c0_116], %601 {strides = array<i32>} : memref<8x16x128xf32, #tpu.memory_space<vmem>>, vector<1x16x128xf32>,
    %602 = vector.broadcast %595 : vector<16x1xf32> to vector<16x128xf32>
    %603 = arith.mulf %602, %587 : vector<16x128xf32>
    %604 = arith.index_cast %517 : i32 to index
    %c0_117 = arith.constant 0 : index
    %c0_118 = arith.constant 0 : index
    %605 = vector.load %arg10[%604, %c0_117, %c0_118] : memref<8x16x128xf32, #tpu.memory_space<vmem>>, vector<1x16x128xf32>
    %606 = vector.shape_cast %605 : vector<1x16x128xf32> to vector<16x128xf32>
    %607 = vector.shape_cast %603 : vector<16x128xf32> to vector<1x16x128xf32>
    tpu.vector_store %arg10[%604, %c0_117, %c0_118], %607 {strides = array<i32>} : memref<8x16x128xf32, #tpu.memory_space<vmem>>, vector<1x16x128xf32>,
    %608 = arith.subf %559, %512 : vector<16x128xf32>
    %609 = vector.broadcast %591 : vector<16x1xf32> to vector<16x128xf32>
    %610 = arith.mulf %609, %608 : vector<16x128xf32>
    %611 = arith.addf %512, %610 : vector<16x128xf32>
    %612 = arith.subf %587, %516 : vector<16x128xf32>
    %613 = vector.broadcast %595 : vector<16x1xf32> to vector<16x128xf32>
    %614 = arith.mulf %613, %612 : vector<16x128xf32>
    %615 = arith.addf %516, %614 : vector<16x128xf32>
    %c6_i32 = arith.constant 6 : i32
    %c7_i32_119 = arith.constant 7 : i32
    %616 = arith.subi %c7_i32_119, %c6_i32 : i32
    %c16_i32_120 = arith.constant 16 : i32
    %617 = arith.muli %c6_i32, %c16_i32_120 : i32
    %618 = tpu.assume_multiple %617, 16 : i32
    %c16_i32_121 = arith.constant 16 : i32
    %619 = arith.muli %616, %c16_i32_121 : i32
    %620 = tpu.assume_multiple %619, 16 : i32
    %621 = arith.index_cast %618 : i32 to index
    %c0_122 = arith.constant 0 : index
    %622 = vector.load %arg9[%621, %c0_122] : memref<128x768xbf16, #tpu.memory_space<vmem>>, vector<16x384xbf16>
    %623 = arith.extf %622 : vector<16x384xbf16> to vector<16x384xf32>
    %624 = arith.index_cast %620 : i32 to index
    %c384_123 = arith.constant 384 : index
    %625 = vector.load %arg9[%624, %c384_123] : memref<128x768xbf16, #tpu.memory_space<vmem>>, vector<16x384xbf16>
    %626 = arith.extf %625 : vector<16x384xbf16> to vector<16x384xf32>
    %627 = arith.truncf %611 : vector<16x128xf32> to vector<16x128xbf16>
    %cst_124 = arith.constant dense<0.000000e+00> : vector<16x384xf32>
    %628 = tpu.matmul %627, %6, %cst_124 {dimension_numbers = #tpu.dot_dimension_numbers<[1], [0], [0], [1], [0, 0, 1, 1], [], []>} : vector<16x128xbf16>, vector<128x384xbf16>, vector<16x384xf32> -> vector<16x384xf32>
    %629 = arith.truncf %615 : vector<16x128xf32> to vector<16x128xbf16>
    %cst_125 = arith.constant dense<0.000000e+00> : vector<16x384xf32>
    %630 = tpu.matmul %629, %7, %cst_125 {dimension_numbers = #tpu.dot_dimension_numbers<[1], [0], [0], [1], [0, 0, 1, 1], [], []>} : vector<16x128xbf16>, vector<128x384xbf16>, vector<16x384xf32> -> vector<16x384xf32>
    %631 = arith.addf %623, %10 : vector<16x384xf32>
    %632 = vector.extract_strided_slice %631 {offsets = [0, 0], sizes = [16, 128], strides = [1, 1]} : vector<16x384xf32> to vector<16x128xf32>
    %633 = vector.extract_strided_slice %628 {offsets = [0, 0], sizes = [16, 128], strides = [1, 1]} : vector<16x384xf32> to vector<16x128xf32>
    %634 = arith.addf %632, %633 : vector<16x128xf32>
    %635 = arith.negf %634 : vector<16x128xf32>
    %636 = math.exp %635 : vector<16x128xf32>
    %cst_126 = arith.constant 1.000000e+00 : f32
    %637 = vector.broadcast %cst_126 : f32 to vector<16x128xf32>
    %638 = arith.addf %637, %636 : vector<16x128xf32>
    %639 = arith.divf %637, %638 : vector<16x128xf32>
    %640 = vector.extract_strided_slice %631 {offsets = [0, 128], sizes = [16, 128], strides = [1, 1]} : vector<16x384xf32> to vector<16x128xf32>
    %641 = vector.extract_strided_slice %628 {offsets = [0, 128], sizes = [16, 128], strides = [1, 1]} : vector<16x384xf32> to vector<16x128xf32>
    %642 = arith.addf %640, %641 : vector<16x128xf32>
    %643 = arith.negf %642 : vector<16x128xf32>
    %644 = math.exp %643 : vector<16x128xf32>
    %cst_127 = arith.constant 1.000000e+00 : f32
    %645 = vector.broadcast %cst_127 : f32 to vector<16x128xf32>
    %646 = arith.addf %645, %644 : vector<16x128xf32>
    %647 = arith.divf %645, %646 : vector<16x128xf32>
    %648 = vector.extract_strided_slice %631 {offsets = [0, 256], sizes = [16, 128], strides = [1, 1]} : vector<16x384xf32> to vector<16x128xf32>
    %649 = vector.extract_strided_slice %628 {offsets = [0, 256], sizes = [16, 128], strides = [1, 1]} : vector<16x384xf32> to vector<16x128xf32>
    %650 = arith.addf %649, %16 : vector<16x128xf32>
    %651 = arith.mulf %639, %650 : vector<16x128xf32>
    %652 = arith.addf %648, %651 : vector<16x128xf32>
    %653 = math.tanh %652 : vector<16x128xf32>
    %cst_128 = arith.constant 1.000000e+00 : f32
    %654 = vector.broadcast %cst_128 : f32 to vector<16x128xf32>
    %655 = arith.subf %654, %647 : vector<16x128xf32>
    %656 = arith.mulf %655, %653 : vector<16x128xf32>
    %657 = arith.mulf %647, %611 : vector<16x128xf32>
    %658 = arith.addf %656, %657 : vector<16x128xf32>
    %659 = arith.addf %626, %13 : vector<16x384xf32>
    %660 = vector.extract_strided_slice %659 {offsets = [0, 0], sizes = [16, 128], strides = [1, 1]} : vector<16x384xf32> to vector<16x128xf32>
    %661 = vector.extract_strided_slice %630 {offsets = [0, 0], sizes = [16, 128], strides = [1, 1]} : vector<16x384xf32> to vector<16x128xf32>
    %662 = arith.addf %660, %661 : vector<16x128xf32>
    %663 = arith.negf %662 : vector<16x128xf32>
    %664 = math.exp %663 : vector<16x128xf32>
    %cst_129 = arith.constant 1.000000e+00 : f32
    %665 = vector.broadcast %cst_129 : f32 to vector<16x128xf32>
    %666 = arith.addf %665, %664 : vector<16x128xf32>
    %667 = arith.divf %665, %666 : vector<16x128xf32>
    %668 = vector.extract_strided_slice %659 {offsets = [0, 128], sizes = [16, 128], strides = [1, 1]} : vector<16x384xf32> to vector<16x128xf32>
    %669 = vector.extract_strided_slice %630 {offsets = [0, 128], sizes = [16, 128], strides = [1, 1]} : vector<16x384xf32> to vector<16x128xf32>
    %670 = arith.addf %668, %669 : vector<16x128xf32>
    %671 = arith.negf %670 : vector<16x128xf32>
    %672 = math.exp %671 : vector<16x128xf32>
    %cst_130 = arith.constant 1.000000e+00 : f32
    %673 = vector.broadcast %cst_130 : f32 to vector<16x128xf32>
    %674 = arith.addf %673, %672 : vector<16x128xf32>
    %675 = arith.divf %673, %674 : vector<16x128xf32>
    %676 = vector.extract_strided_slice %659 {offsets = [0, 256], sizes = [16, 128], strides = [1, 1]} : vector<16x384xf32> to vector<16x128xf32>
    %677 = vector.extract_strided_slice %630 {offsets = [0, 256], sizes = [16, 128], strides = [1, 1]} : vector<16x384xf32> to vector<16x128xf32>
    %678 = arith.addf %677, %19 : vector<16x128xf32>
    %679 = arith.mulf %667, %678 : vector<16x128xf32>
    %680 = arith.addf %676, %679 : vector<16x128xf32>
    %681 = math.tanh %680 : vector<16x128xf32>
    %cst_131 = arith.constant 1.000000e+00 : f32
    %682 = vector.broadcast %cst_131 : f32 to vector<16x128xf32>
    %683 = arith.subf %682, %675 : vector<16x128xf32>
    %684 = arith.mulf %683, %681 : vector<16x128xf32>
    %685 = arith.mulf %675, %615 : vector<16x128xf32>
    %686 = arith.addf %684, %685 : vector<16x128xf32>
    %687 = vector.broadcast %c6_i32 : i32 to vector<16x1xi32>
    %688 = arith.cmpi sgt, %20, %687 : vector<16x1xi32>
    %689 = arith.extui %688 : vector<16x1xi1> to vector<16x1xi32>
    %690 = arith.sitofp %689 : vector<16x1xi32> to vector<16x1xf32>
    %691 = vector.broadcast %616 : i32 to vector<16x1xi32>
    %692 = arith.cmpi sgt, %20, %691 : vector<16x1xi32>
    %693 = arith.extui %692 : vector<16x1xi1> to vector<16x1xi32>
    %694 = arith.sitofp %693 : vector<16x1xi32> to vector<16x1xf32>
    %695 = vector.broadcast %690 : vector<16x1xf32> to vector<16x128xf32>
    %696 = arith.mulf %695, %658 : vector<16x128xf32>
    %697 = arith.index_cast %c6_i32 : i32 to index
    %c0_132 = arith.constant 0 : index
    %c0_133 = arith.constant 0 : index
    %698 = vector.load %arg7[%697, %c0_132, %c0_133] : memref<8x16x128xf32, #tpu.memory_space<vmem>>, vector<1x16x128xf32>
    %699 = vector.shape_cast %698 : vector<1x16x128xf32> to vector<16x128xf32>
    %700 = vector.shape_cast %696 : vector<16x128xf32> to vector<1x16x128xf32>
    tpu.vector_store %arg7[%697, %c0_132, %c0_133], %700 {strides = array<i32>} : memref<8x16x128xf32, #tpu.memory_space<vmem>>, vector<1x16x128xf32>,
    %701 = vector.broadcast %694 : vector<16x1xf32> to vector<16x128xf32>
    %702 = arith.mulf %701, %686 : vector<16x128xf32>
    %703 = arith.index_cast %616 : i32 to index
    %c0_134 = arith.constant 0 : index
    %c0_135 = arith.constant 0 : index
    %704 = vector.load %arg10[%703, %c0_134, %c0_135] : memref<8x16x128xf32, #tpu.memory_space<vmem>>, vector<1x16x128xf32>
    %705 = vector.shape_cast %704 : vector<1x16x128xf32> to vector<16x128xf32>
    %706 = vector.shape_cast %702 : vector<16x128xf32> to vector<1x16x128xf32>
    tpu.vector_store %arg10[%703, %c0_134, %c0_135], %706 {strides = array<i32>} : memref<8x16x128xf32, #tpu.memory_space<vmem>>, vector<1x16x128xf32>,
    %707 = arith.subf %658, %611 : vector<16x128xf32>
    %708 = vector.broadcast %690 : vector<16x1xf32> to vector<16x128xf32>
    %709 = arith.mulf %708, %707 : vector<16x128xf32>
    %710 = arith.addf %611, %709 : vector<16x128xf32>
    %711 = arith.subf %686, %615 : vector<16x128xf32>
    %712 = vector.broadcast %694 : vector<16x1xf32> to vector<16x128xf32>
    %713 = arith.mulf %712, %711 : vector<16x128xf32>
    %714 = arith.addf %615, %713 : vector<16x128xf32>
    %c7_i32_136 = arith.constant 7 : i32
    %c7_i32_137 = arith.constant 7 : i32
    %715 = arith.subi %c7_i32_137, %c7_i32_136 : i32
    %c16_i32_138 = arith.constant 16 : i32
    %716 = arith.muli %c7_i32_136, %c16_i32_138 : i32
    %717 = tpu.assume_multiple %716, 16 : i32
    %c16_i32_139 = arith.constant 16 : i32
    %718 = arith.muli %715, %c16_i32_139 : i32
    %719 = tpu.assume_multiple %718, 16 : i32
    %720 = arith.index_cast %717 : i32 to index
    %c0_140 = arith.constant 0 : index
    %721 = vector.load %arg9[%720, %c0_140] : memref<128x768xbf16, #tpu.memory_space<vmem>>, vector<16x384xbf16>
    %722 = arith.extf %721 : vector<16x384xbf16> to vector<16x384xf32>
    %723 = arith.index_cast %719 : i32 to index
    %c384_141 = arith.constant 384 : index
    %724 = vector.load %arg9[%723, %c384_141] : memref<128x768xbf16, #tpu.memory_space<vmem>>, vector<16x384xbf16>
    %725 = arith.extf %724 : vector<16x384xbf16> to vector<16x384xf32>
    %726 = arith.truncf %710 : vector<16x128xf32> to vector<16x128xbf16>
    %cst_142 = arith.constant dense<0.000000e+00> : vector<16x384xf32>
    %727 = tpu.matmul %726, %6, %cst_142 {dimension_numbers = #tpu.dot_dimension_numbers<[1], [0], [0], [1], [0, 0, 1, 1], [], []>} : vector<16x128xbf16>, vector<128x384xbf16>, vector<16x384xf32> -> vector<16x384xf32>
    %728 = arith.truncf %714 : vector<16x128xf32> to vector<16x128xbf16>
    %cst_143 = arith.constant dense<0.000000e+00> : vector<16x384xf32>
    %729 = tpu.matmul %728, %7, %cst_143 {dimension_numbers = #tpu.dot_dimension_numbers<[1], [0], [0], [1], [0, 0, 1, 1], [], []>} : vector<16x128xbf16>, vector<128x384xbf16>, vector<16x384xf32> -> vector<16x384xf32>
    %730 = arith.addf %722, %10 : vector<16x384xf32>
    %731 = vector.extract_strided_slice %730 {offsets = [0, 0], sizes = [16, 128], strides = [1, 1]} : vector<16x384xf32> to vector<16x128xf32>
    %732 = vector.extract_strided_slice %727 {offsets = [0, 0], sizes = [16, 128], strides = [1, 1]} : vector<16x384xf32> to vector<16x128xf32>
    %733 = arith.addf %731, %732 : vector<16x128xf32>
    %734 = arith.negf %733 : vector<16x128xf32>
    %735 = math.exp %734 : vector<16x128xf32>
    %cst_144 = arith.constant 1.000000e+00 : f32
    %736 = vector.broadcast %cst_144 : f32 to vector<16x128xf32>
    %737 = arith.addf %736, %735 : vector<16x128xf32>
    %738 = arith.divf %736, %737 : vector<16x128xf32>
    %739 = vector.extract_strided_slice %730 {offsets = [0, 128], sizes = [16, 128], strides = [1, 1]} : vector<16x384xf32> to vector<16x128xf32>
    %740 = vector.extract_strided_slice %727 {offsets = [0, 128], sizes = [16, 128], strides = [1, 1]} : vector<16x384xf32> to vector<16x128xf32>
    %741 = arith.addf %739, %740 : vector<16x128xf32>
    %742 = arith.negf %741 : vector<16x128xf32>
    %743 = math.exp %742 : vector<16x128xf32>
    %cst_145 = arith.constant 1.000000e+00 : f32
    %744 = vector.broadcast %cst_145 : f32 to vector<16x128xf32>
    %745 = arith.addf %744, %743 : vector<16x128xf32>
    %746 = arith.divf %744, %745 : vector<16x128xf32>
    %747 = vector.extract_strided_slice %730 {offsets = [0, 256], sizes = [16, 128], strides = [1, 1]} : vector<16x384xf32> to vector<16x128xf32>
    %748 = vector.extract_strided_slice %727 {offsets = [0, 256], sizes = [16, 128], strides = [1, 1]} : vector<16x384xf32> to vector<16x128xf32>
    %749 = arith.addf %748, %16 : vector<16x128xf32>
    %750 = arith.mulf %738, %749 : vector<16x128xf32>
    %751 = arith.addf %747, %750 : vector<16x128xf32>
    %752 = math.tanh %751 : vector<16x128xf32>
    %cst_146 = arith.constant 1.000000e+00 : f32
    %753 = vector.broadcast %cst_146 : f32 to vector<16x128xf32>
    %754 = arith.subf %753, %746 : vector<16x128xf32>
    %755 = arith.mulf %754, %752 : vector<16x128xf32>
    %756 = arith.mulf %746, %710 : vector<16x128xf32>
    %757 = arith.addf %755, %756 : vector<16x128xf32>
    %758 = arith.addf %725, %13 : vector<16x384xf32>
    %759 = vector.extract_strided_slice %758 {offsets = [0, 0], sizes = [16, 128], strides = [1, 1]} : vector<16x384xf32> to vector<16x128xf32>
    %760 = vector.extract_strided_slice %729 {offsets = [0, 0], sizes = [16, 128], strides = [1, 1]} : vector<16x384xf32> to vector<16x128xf32>
    %761 = arith.addf %759, %760 : vector<16x128xf32>
    %762 = arith.negf %761 : vector<16x128xf32>
    %763 = math.exp %762 : vector<16x128xf32>
    %cst_147 = arith.constant 1.000000e+00 : f32
    %764 = vector.broadcast %cst_147 : f32 to vector<16x128xf32>
    %765 = arith.addf %764, %763 : vector<16x128xf32>
    %766 = arith.divf %764, %765 : vector<16x128xf32>
    %767 = vector.extract_strided_slice %758 {offsets = [0, 128], sizes = [16, 128], strides = [1, 1]} : vector<16x384xf32> to vector<16x128xf32>
    %768 = vector.extract_strided_slice %729 {offsets = [0, 128], sizes = [16, 128], strides = [1, 1]} : vector<16x384xf32> to vector<16x128xf32>
    %769 = arith.addf %767, %768 : vector<16x128xf32>
    %770 = arith.negf %769 : vector<16x128xf32>
    %771 = math.exp %770 : vector<16x128xf32>
    %cst_148 = arith.constant 1.000000e+00 : f32
    %772 = vector.broadcast %cst_148 : f32 to vector<16x128xf32>
    %773 = arith.addf %772, %771 : vector<16x128xf32>
    %774 = arith.divf %772, %773 : vector<16x128xf32>
    %775 = vector.extract_strided_slice %758 {offsets = [0, 256], sizes = [16, 128], strides = [1, 1]} : vector<16x384xf32> to vector<16x128xf32>
    %776 = vector.extract_strided_slice %729 {offsets = [0, 256], sizes = [16, 128], strides = [1, 1]} : vector<16x384xf32> to vector<16x128xf32>
    %777 = arith.addf %776, %19 : vector<16x128xf32>
    %778 = arith.mulf %766, %777 : vector<16x128xf32>
    %779 = arith.addf %775, %778 : vector<16x128xf32>
    %780 = math.tanh %779 : vector<16x128xf32>
    %cst_149 = arith.constant 1.000000e+00 : f32
    %781 = vector.broadcast %cst_149 : f32 to vector<16x128xf32>
    %782 = arith.subf %781, %774 : vector<16x128xf32>
    %783 = arith.mulf %782, %780 : vector<16x128xf32>
    %784 = arith.mulf %774, %714 : vector<16x128xf32>
    %785 = arith.addf %783, %784 : vector<16x128xf32>
    %786 = vector.broadcast %c7_i32_136 : i32 to vector<16x1xi32>
    %787 = arith.cmpi sgt, %20, %786 : vector<16x1xi32>
    %788 = arith.extui %787 : vector<16x1xi1> to vector<16x1xi32>
    %789 = arith.sitofp %788 : vector<16x1xi32> to vector<16x1xf32>
    %790 = vector.broadcast %715 : i32 to vector<16x1xi32>
    %791 = arith.cmpi sgt, %20, %790 : vector<16x1xi32>
    %792 = arith.extui %791 : vector<16x1xi1> to vector<16x1xi32>
    %793 = arith.sitofp %792 : vector<16x1xi32> to vector<16x1xf32>
    %794 = vector.broadcast %789 : vector<16x1xf32> to vector<16x128xf32>
    %795 = arith.mulf %794, %757 : vector<16x128xf32>
    %796 = arith.index_cast %c7_i32_136 : i32 to index
    %c0_150 = arith.constant 0 : index
    %c0_151 = arith.constant 0 : index
    %797 = vector.load %arg7[%796, %c0_150, %c0_151] : memref<8x16x128xf32, #tpu.memory_space<vmem>>, vector<1x16x128xf32>
    %798 = vector.shape_cast %797 : vector<1x16x128xf32> to vector<16x128xf32>
    %799 = vector.shape_cast %795 : vector<16x128xf32> to vector<1x16x128xf32>
    tpu.vector_store %arg7[%796, %c0_150, %c0_151], %799 {strides = array<i32>} : memref<8x16x128xf32, #tpu.memory_space<vmem>>, vector<1x16x128xf32>,
    %800 = vector.broadcast %793 : vector<16x1xf32> to vector<16x128xf32>
    %801 = arith.mulf %800, %785 : vector<16x128xf32>
    %802 = arith.index_cast %715 : i32 to index
    %c0_152 = arith.constant 0 : index
    %c0_153 = arith.constant 0 : index
    %803 = vector.load %arg10[%802, %c0_152, %c0_153] : memref<8x16x128xf32, #tpu.memory_space<vmem>>, vector<1x16x128xf32>
    %804 = vector.shape_cast %803 : vector<1x16x128xf32> to vector<16x128xf32>
    %805 = vector.shape_cast %801 : vector<16x128xf32> to vector<1x16x128xf32>
    tpu.vector_store %arg10[%802, %c0_152, %c0_153], %805 {strides = array<i32>} : memref<8x16x128xf32, #tpu.memory_space<vmem>>, vector<1x16x128xf32>,
    %806 = arith.subf %757, %710 : vector<16x128xf32>
    %807 = vector.broadcast %789 : vector<16x1xf32> to vector<16x128xf32>
    %808 = arith.mulf %807, %806 : vector<16x128xf32>
    %809 = arith.addf %710, %808 : vector<16x128xf32>
    %810 = arith.subf %785, %714 : vector<16x128xf32>
    %811 = vector.broadcast %793 : vector<16x1xf32> to vector<16x128xf32>
    %812 = arith.mulf %811, %810 : vector<16x128xf32>
    %813 = arith.addf %714, %812 : vector<16x128xf32>
    %c8_i32 = arith.constant 8 : i32
    %c0_154 = arith.constant 0 : index
    %c0_155 = arith.constant 0 : index
    %c0_156 = arith.constant 0 : index
    %814 = vector.load %arg8[%c0_154, %c0_155, %c0_156] : memref<2x16x128xf32, #tpu.memory_space<vmem>>, vector<1x16x128xf32>
    %815 = vector.shape_cast %814 : vector<1x16x128xf32> to vector<16x128xf32>
    %816 = vector.shape_cast %809 : vector<16x128xf32> to vector<1x16x128xf32>
    tpu.vector_store %arg8[%c0_154, %c0_155, %c0_156], %816 {strides = array<i32>} : memref<2x16x128xf32, #tpu.memory_space<vmem>>, vector<1x16x128xf32>,
    %c1 = arith.constant 1 : index
    %c0_157 = arith.constant 0 : index
    %c0_158 = arith.constant 0 : index
    %817 = vector.load %arg8[%c1, %c0_157, %c0_158] : memref<2x16x128xf32, #tpu.memory_space<vmem>>, vector<1x16x128xf32>
    %818 = vector.shape_cast %817 : vector<1x16x128xf32> to vector<16x128xf32>
    %819 = vector.shape_cast %813 : vector<16x128xf32> to vector<1x16x128xf32>
    tpu.vector_store %arg8[%c1, %c0_157, %c0_158], %819 {strides = array<i32>} : memref<2x16x128xf32, #tpu.memory_space<vmem>>, vector<1x16x128xf32>,
    %c0_159 = arith.constant 0 : index
    %c0_160 = arith.constant 0 : index
    %c0_161 = arith.constant 0 : index
    %820 = vector.load %arg7[%c0_159, %c0_160, %c0_161] : memref<8x16x128xf32, #tpu.memory_space<vmem>>, vector<8x16x128xf32>
    %c0_162 = arith.constant 0 : index
    %c0_163 = arith.constant 0 : index
    %c0_164 = arith.constant 0 : index
    %821 = vector.load %arg10[%c0_162, %c0_163, %c0_164] : memref<8x16x128xf32, #tpu.memory_space<vmem>>, vector<8x16x128xf32>
    %822 = arith.addf %820, %821 : vector<8x16x128xf32>
    %c0_165 = arith.constant 0 : index
    %c0_166 = arith.constant 0 : index
    %c0_167 = arith.constant 0 : index
    %823 = vector.load %arg7[%c0_165, %c0_166, %c0_167] : memref<8x16x128xf32, #tpu.memory_space<vmem>>, vector<8x16x128xf32>
    tpu.vector_store %arg7[%c0_165, %c0_166, %c0_167], %822 {strides = array<i32>} : memref<8x16x128xf32, #tpu.memory_space<vmem>>, vector<8x16x128xf32>,
    return
  }
  func.func @transform_0(%arg0: i32) -> (i32, i32, i32) {
    %c0_i32 = arith.constant 0 : i32
    %c0_i32_0 = arith.constant 0 : i32
    %c0_i32_1 = arith.constant 0 : i32
    return %c0_i32, %arg0, %c0_i32_0 : i32, i32, i32
  }
  func.func @transform_1(%arg0: i32) -> (i32, i32) {
    %c0_i32 = arith.constant 0 : i32
    %c0_i32_0 = arith.constant 0 : i32
    return %arg0, %c0_i32 : i32, i32
  }
  func.func @transform_2(%arg0: i32) -> (i32, i32) {
    %c0_i32 = arith.constant 0 : i32
    %c0_i32_0 = arith.constant 0 : i32
    %c0_i32_1 = arith.constant 0 : i32
    return %c0_i32, %c0_i32_0 : i32, i32
  }
  func.func @transform_3(%arg0: i32) -> (i32, i32) {
    %c0_i32 = arith.constant 0 : i32
    %c0_i32_0 = arith.constant 0 : i32
    %c0_i32_1 = arith.constant 0 : i32
    return %c0_i32, %c0_i32_0 : i32, i32
  }
  func.func @transform_4(%arg0: i32) -> (i32, i32) {
    %c0_i32 = arith.constant 0 : i32
    %c0_i32_0 = arith.constant 0 : i32
    %c0_i32_1 = arith.constant 0 : i32
    return %c0_i32, %c0_i32_0 : i32, i32
  }
  func.func @transform_5(%arg0: i32) -> (i32, i32) {
    %c0_i32 = arith.constant 0 : i32
    %c0_i32_0 = arith.constant 0 : i32
    %c0_i32_1 = arith.constant 0 : i32
    return %c0_i32, %c0_i32_0 : i32, i32
  }
  func.func @transform_6(%arg0: i32) -> (i32, i32, i32) {
    %c0_i32 = arith.constant 0 : i32
    %c0_i32_0 = arith.constant 0 : i32
    %c0_i32_1 = arith.constant 0 : i32
    return %c0_i32, %arg0, %c0_i32_0 : i32, i32, i32
  }
  func.func @transform_7(%arg0: i32) -> (i32, i32, i32) {
    %c0_i32 = arith.constant 0 : i32
    %c0_i32_0 = arith.constant 0 : i32
    %c0_i32_1 = arith.constant 0 : i32
    return %c0_i32, %arg0, %c0_i32_0 : i32, i32, i32
  }
}

</mosaic_0001>

<bundles_post_ra>
// kernel: tpu_custom_call.1
= control target key start
LH: loop header
LB: loop body
LE: loop exit
PB: predicated region body
PF: predicated region fallthrough
CT: control target
= control target key end

     0   :  { %13 = vsyncpa [#allocation5], 0  ;;  %s7283_s0 = inlined_call_operand.hbm [shape: bf16[8,16,128], index: 0, kind: input, shape index: {}]   ;;  %s7284_s1 = inlined_call_operand.hbm [shape: s32[16,1], index: 1, kind: input, shape index: {}]   ;;  %s7285_s2 = inlined_call_operand.hbm [shape: bf16[128,768], index: 2, kind: input, shape index: {}]   ;;  %s7286_s3 = inlined_call_operand.hbm [shape: bf16[128,768], index: 3, kind: input, shape index: {}]   ;;  %s7287_s4 = inlined_call_operand.hbm [shape: f32[1,768], index: 4, kind: input, shape index: {}]   ;;  %s7288_s5 = inlined_call_operand.hbm [shape: f32[1,256], index: 5, kind: input, shape index: {}]   ;;  %s7289_s6 = inlined_call_operand.hbm [shape: f32[8,16,128], index: 6, kind: output, shape index: {0}]   ;;  %s7290_s7 = inlined_call_operand.hbm [shape: f32[2,16,128], index: 7, kind: output, shape index: {1}]  }
   0x1   :  { %14 = vsyncpa [#allocation8], 0 }
   0x2   :  { %15 = vsyncpa [#allocation11], 0 }
   0x3   :  { %16 = vsyncpa [#allocation14], 0 }
   0x4   :  { %17 = vsyncpa [#allocation6], 0 }
   0x5   :  { %18 = vsyncpa [#allocation17], 0  ;;  %s5479_s24 = smov [#allocation7]   ;;  %s5291_s28 = scalar_lea.hbm %s7284_s1, 256 }
   0x6   :  { %s36_s25 = sshll.u32 %s5479_s24, 4  ;;  %p5292_p0 = scmp.ne.s32.totalorder %s7284_s1, %s5291_s28  ;;  %s37_s25 = int_to_ptr.vmem [resolvable:$true] %s36_s25 }
   0x7   :  { %p5295_p1 = scmp.lt.u32.totalorder %s5291_s28, %s7284_s1 }
   0x9   :  { %p5297_p2 = pnand %p5295_p1, %p5292_p0 }
   0xb   :  { %5300 = shalt.err (!%p5297_p2)
}
   0xc   :  { %s5301_s10 = scalar_lea.vmem %s37_s25, 256  ;;  %p5306_p4 = scmp.lt.s32.totalorder %s37_s25, %s37_s25 }
   0xd   :  { %p5302_p3 = scmp.ne.s32.totalorder %s37_s25, %s5301_s10  ;;  %p5307_p5 = scmp.lt.s32.totalorder %s5301_s10, %s5301_s10 }
   0xf   :  { %p5308_p6 = por %p5307_p5, %p5306_p4 }
  0x11   :  { %p5309_p7 = pnand %p5308_p6, %p5302_p3 }
  0x13   :  { %5312 = shalt.err (!%p5309_p7)
}
  0x14   :  { %s5480_s11 = smov 128   ;;  %s5481_s12 = smov 8  }
  0x15   :  { %42 = dma.hbm_to_vmem [thread:$0]  %s7284_s1, 256, %s37_s25, [#allocation8], %s5480_s11, %s5480_s11, %s5481_s12  }
  0x16   :  { %s5482_s15 = smov [#allocation10]   ;;  %s5483_s17 = smov [#allocation4]  }
  0x17   :  { %s60_s16 = sshll.u32 %s5482_s15, 4  ;;  %s24_s18 = sshll.u32 %s5483_s17, 4  ;;  %s61_s16 = int_to_ptr.vmem [resolvable:$true] %s60_s16  ;;  %s25_s18 = int_to_ptr.vmem [resolvable:$true] %s24_s18 }
  0x18   :  { %s5313_s21 = scalar_lea.hbm %s7286_s3, 6144 }
  0x19   :  { %p5314_p8 = scmp.ne.s32.totalorder %s7286_s3, %s5313_s21  ;;  %p5317_p9 = scmp.lt.u32.totalorder %s5313_s21, %s7286_s3 }
  0x1b   :  { %p5319_p10 = pnand %p5317_p9, %p5314_p8 }
  0x1d   :  { %5322 = shalt.err (!%p5319_p10)
}
  0x1e   :  { %s5323_s1 = scalar_lea.vmem %s61_s16, 6144  ;;  %p5328_p12 = scmp.lt.s32.totalorder %s61_s16, %s61_s16 }
  0x1f   :  { %p5324_p11 = scmp.ne.s32.totalorder %s61_s16, %s5323_s1  ;;  %p5329_p13 = scmp.lt.s32.totalorder %s5323_s1, %s5323_s1 }
  0x21   :  { %p5330_p0 = por %p5329_p13, %p5328_p12 }
  0x23   :  { %p5331_p1 = pnand %p5330_p0, %p5324_p11 }
  0x25   :  { %5334 = shalt.err (!%p5331_p1)
}
  0x26   :  { %s5484_s25 = smov 384   ;;  %s5485_s27 = smov 24  }
  0x27   :  { %66 = dma.hbm_to_vmem [thread:$0]  %s7286_s3, 6144, %s61_s16, [#allocation11], %s5484_s25, %s5484_s25, %s5485_s27  }
  0x28   :  { %s5335_s9 = scalar_lea.hbm %s7283_s0, 1024 }
  0x29   :  { %p5336_p2 = scmp.ne.s32.totalorder %s7283_s0, %s5335_s9  ;;  %p5339_p3 = scmp.lt.u32.totalorder %s5335_s9, %s7283_s0 }
  0x2b   :  { %p5341_p4 = pnand %p5339_p3, %p5336_p2 }
  0x2d   :  { %5344 = shalt.err (!%p5341_p4)
}
  0x2e   :  { %s5345_s17 = scalar_lea.vmem %s25_s18, 1024  ;;  %p5350_p6 = scmp.lt.s32.totalorder %s25_s18, %s25_s18 }
  0x2f   :  { %p5346_p5 = scmp.ne.s32.totalorder %s25_s18, %s5345_s17  ;;  %p5351_p7 = scmp.lt.s32.totalorder %s5345_s17, %s5345_s17 }
  0x31   :  { %p5352_p8 = por %p5351_p7, %p5350_p6 }
  0x33   :  { %p5353_p9 = pnand %p5352_p8, %p5346_p5 }
  0x35   :  { %5356 = shalt.err (!%p5353_p9)
}
  0x36   :  { %s5486_s3 = smov 64   ;;  %s5487_s16 = smov 4  }
  0x37   :  { %30 = dma.hbm_to_vmem [thread:$0]  %s7283_s0, 1024, %s25_s18, [#allocation5], %s5486_s3, %s5486_s3, %s5487_s16  }
  0x38   :  { %s5488_s21 = smov [#allocation9]   ;;  %s5489_s23 = smov [#allocation12]  }
  0x39   :  { %s48_s22 = sshll.u32 %s5488_s21, 4  ;;  %s73_s24 = sshll.u32 %s5489_s23, 4  ;;  %s49_s22 = int_to_ptr.vmem [resolvable:$true] %s48_s22  ;;  %s74_s24 = int_to_ptr.vmem [resolvable:$true] %s73_s24 }
  0x3a   :  { %s5357_s28 = scalar_lea.hbm %s7285_s2, 6144 }
  0x3b   :  { %p5358_p10 = scmp.ne.s32.totalorder %s7285_s2, %s5357_s28  ;;  %p5361_p11 = scmp.lt.u32.totalorder %s5357_s28, %s7285_s2 }
  0x3d   :  { %p5363_p12 = pnand %p5361_p11, %p5358_p10 }
  0x3f   :  { %5366 = shalt.err (!%p5363_p12)
}
  0x40   :  { %s5367_s0 = scalar_lea.vmem %s49_s22, 6144  ;;  %p5372_p0 = scmp.lt.s32.totalorder %s49_s22, %s49_s22 }
  0x41   :  { %p5368_p13 = scmp.ne.s32.totalorder %s49_s22, %s5367_s0  ;;  %p5373_p1 = scmp.lt.s32.totalorder %s5367_s0, %s5367_s0 }
  0x43   :  { %p5374_p2 = por %p5373_p1, %p5372_p0 }
  0x45   :  { %p5375_p3 = pnand %p5374_p2, %p5368_p13 }
  0x47   :  { %5378 = shalt.err (!%p5375_p3)
}
  0x48   :  { %54 = dma.hbm_to_vmem [thread:$0]  %s7285_s2, 6144, %s49_s22, [#allocation8], %s5484_s25, %s5484_s25, %s5485_s27  }
  0x49   :  { %s5379_s15 = scalar_lea.hbm %s7287_s4, 96 }
  0x4a   :  { %p5380_p4 = scmp.ne.s32.totalorder %s7287_s4, %s5379_s15  ;;  %p5383_p5 = scmp.lt.u32.totalorder %s5379_s15, %s7287_s4 }
  0x4c   :  { %p5385_p6 = pnand %p5383_p5, %p5380_p4 }
  0x4e   :  { %5388 = shalt.err (!%p5385_p6)
}
  0x4f   :  { %s5389_s20 = scalar_lea.vmem %s74_s24, 96  ;;  %p5394_p8 = scmp.lt.s32.totalorder %s74_s24, %s74_s24 }
  0x50   :  { %p5390_p7 = scmp.ne.s32.totalorder %s74_s24, %s5389_s20  ;;  %p5395_p9 = scmp.lt.s32.totalorder %s5389_s20, %s5389_s20 }
  0x52   :  { %p5396_p10 = por %p5395_p9, %p5394_p8 }
  0x54   :  { %p5397_p11 = pnand %p5396_p10, %p5390_p7 }
  0x56   :  { %5400 = shalt.err (!%p5397_p11)
}
  0x57   :  { %76 = dma.hbm_to_vmem [thread:$0]  %s7287_s4, 96, %s74_s24, [#allocation11]  }
  0x58   :  { %s5490_s27 = smov [#allocation13]   ;;  %s5401_s26 = scalar_lea.hbm %s7288_s5, 32 }
  0x59   :  { %s83_s21 = sshll.u32 %s5490_s27, 4  ;;  %p5402_p12 = scmp.ne.s32.totalorder %s7288_s5, %s5401_s26  ;;  %s84_s21 = int_to_ptr.vmem [resolvable:$true] %s83_s21 }
  0x5a   :  { %p5405_p13 = scmp.lt.u32.totalorder %s5401_s26, %s7288_s5 }
  0x5c   :  { %p5407_p0 = pnand %p5405_p13, %p5402_p12 }
  0x5e   :  { %5410 = shalt.err (!%p5407_p0)
}
  0x5f   :  { %s5411_s8 = scalar_lea.vmem %s84_s21, 32  ;;  %p5416_p2 = scmp.lt.s32.totalorder %s84_s21, %s84_s21 }
  0x60   :  { %p5412_p1 = scmp.ne.s32.totalorder %s84_s21, %s5411_s8  ;;  %p5417_p3 = scmp.lt.s32.totalorder %s5411_s8, %s5411_s8 }
  0x62   :  { %p5418_p4 = por %p5417_p3, %p5416_p2 }
  0x64   :  { %p5419_p5 = pnand %p5418_p4, %p5412_p1 }
  0x66   :  { %5422 = shalt.err (!%p5419_p5)
}
  0x67   :  { %86 = dma.hbm_to_vmem [thread:$0]  %s7288_s5, 32, %s84_s21, [#allocation14]  }
  0x68   :  { %5467 = dma.done.wait [#allocation5], 1024  }
  0x69   :  { %5468 = vsyncadd [#allocation5], 4294966272 }
  0x6a   :  { %5469 = dma.done.wait [#allocation8], 6400  }
  0x6b   :  { %5470 = vsyncadd [#allocation8], 4294960896 }
  0x6c   :  { %5471 = dma.done.wait [#allocation11], 6240  }
  0x6d   :  { %5472 = vsyncadd [#allocation11], 4294961056 }
  0x6e   :  { %5473 = dma.done.wait [#allocation14], 32  }
  0x6f   :  { %5474 = vsyncadd [#allocation14], 4294967264  ;;  %v7291_v0 = vmov 0   ;;  %v4704_v1 = vld [vmem:[#allocation9 + $0x4] ss:$24 sps:$4 sm:$0xff]   ;;  %v5621_v34 = vld [vmem:[#allocation4] sm:$0xff]  }
  0x70   :  { %490 = vmatprep.mubr.bf16.mxu0 %v7291_v0  ;;  %603 = vmatprep.mubr.bf16.mxu1 %v7291_v0  ;;  %v4706_v2 = vld [vmem:[#allocation9 + $0xc] ss:$24 sps:$4 sm:$0xff]   ;;  %v4708_v3 = vld [vmem:[#allocation9] ss:$24 sps:$4 sm:$0xff]   ;;  %v4712_v6 = vld [vmem:[#allocation9 + $0x3c] ss:$24 sps:$4 sm:$0xff]  }
  0x71   :  { %4662 = vset.pattern.permute.xlu0 %v7291_v0  ;;  %4673 = vset.pattern.permute.xlu1 %v7291_v0  ;;  %v4709_v4 = vld [vmem:[#allocation9 + $0x8] ss:$24 sps:$4 sm:$0xff]   ;;  %v4710_v5 = vld [vmem:[#allocation9 + $0x34] ss:$24 sps:$4 sm:$0xff]   ;;  %v4715_v8 = vld [vmem:[#allocation9 + $0x38] ss:$24 sps:$4 sm:$0xff]  }
  0x72   :  { %458 = vmatprep.subr.bf16.mxu0 %v4704_v1  ;;  %571 = vmatprep.subr.bf16.mxu1 %v4706_v2  ;;  %v4714_v7 = vld [vmem:[#allocation9 + $0x30] ss:$24 sps:$4 sm:$0xff]   ;;  %v4716_v9 = vld [vmem:[#allocation9 + $0x64] ss:$24 sps:$4 sm:$0xff]   ;;  %v4720_v11 = vld [vmem:[#allocation9 + $0x60] ss:$24 sps:$4 sm:$0xff]  }
  0x73   :  { %459 = vmatpush1.bf16.msra.mxu0 %v4708_v3  ;;  %572 = vmatpush1.bf16.msra.mxu1 %v4709_v4  ;;  %v4718_v10 = vld [vmem:[#allocation9 + $0x6c] ss:$24 sps:$4 sm:$0xff]   ;;  %v4721_v12 = vld [vmem:[#allocation9 + $0x68] ss:$24 sps:$4 sm:$0xff]   ;;  %v4724_v14 = vld [vmem:[#allocation9 + $0x9c] ss:$24 sps:$4 sm:$0xff]  }
  0x74   :  { %460 = vmatprep.subr.bf16.mxu0 %v4710_v5  ;;  %573 = vmatprep.subr.bf16.mxu1 %v4712_v6  ;;  %v4722_v13 = vld [vmem:[#allocation9 + $0x94] ss:$24 sps:$4 sm:$0xff]   ;;  %v4726_v15 = vld [vmem:[#allocation9 + $0x90] ss:$24 sps:$4 sm:$0xff]   ;;  %v4728_v17 = vld [vmem:[#allocation9 + $0xc4] ss:$24 sps:$4 sm:$0xff]  }
  0x75   :  { %v4727_v16 = vld [vmem:[#allocation9 + $0x98] ss:$24 sps:$4 sm:$0xff]   ;;  %v4730_v18 = vld [vmem:[#allocation9 + $0xcc] ss:$24 sps:$4 sm:$0xff]   ;;  %v4733_v20 = vld [vmem:[#allocation9 + $0xc8] ss:$24 sps:$4 sm:$0xff]  }
  0x76   :  { %v4732_v19 = vld [vmem:[#allocation9 + $0xc0] ss:$24 sps:$4 sm:$0xff]   ;;  %v4734_v21 = vld [vmem:[#allocation9 + $0xf4] ss:$24 sps:$4 sm:$0xff]   ;;  %v4738_v23 = vld [vmem:[#allocation9 + $0xf0] ss:$24 sps:$4 sm:$0xff]  }
  0x77   :  { %461 = vmatpush1.bf16.msra.mxu0 %v4714_v7  ;;  %574 = vmatpush1.bf16.msra.mxu1 %v4715_v8  ;;  %v4736_v22 = vld [vmem:[#allocation9 + $0xfc] ss:$24 sps:$4 sm:$0xff]   ;;  %v4739_v24 = vld [vmem:[#allocation9 + $0xf8] ss:$24 sps:$4 sm:$0xff]   ;;  %v4742_v26 = vld [vmem:[#allocation9 + $0x12c] ss:$24 sps:$4 sm:$0xff]  }
  0x78   :  { %462 = vmatprep.subr.bf16.mxu0 %v4716_v9  ;;  %575 = vmatprep.subr.bf16.mxu1 %v4718_v10  ;;  %v4740_v25 = vld [vmem:[#allocation9 + $0x124] ss:$24 sps:$4 sm:$0xff]   ;;  %v4744_v27 = vld [vmem:[#allocation9 + $0x120] ss:$24 sps:$4 sm:$0xff]   ;;  %v4746_v29 = vld [vmem:[#allocation9 + $0x154] ss:$24 sps:$4 sm:$0xff]  }
  0x79   :  { %v4745_v28 = vld [vmem:[#allocation9 + $0x128] ss:$24 sps:$4 sm:$0xff]   ;;  %v4748_v30 = vld [vmem:[#allocation9 + $0x15c] ss:$24 sps:$4 sm:$0xff]   ;;  %v4751_v32 = vld [vmem:[#allocation9 + $0x158] ss:$24 sps:$4 sm:$0xff]  }
  0x7a   :  { %v4750_v31 = vld [vmem:[#allocation9 + $0x150] ss:$24 sps:$4 sm:$0xff]   ;;  %v4755_v33 = vld [vmem:[#allocation9 + $0x14] ss:$24 sps:$4 sm:$0xff]   ;;  %v5623_v35 = vld [vmem:[#allocation10 + $0x4] ss:$24 sps:$4 sm:$0xff]  }
  0x7b   :  { %463 = vmatpush1.bf16.msra.mxu0 %v4720_v11  ;;  %576 = vmatpush1.bf16.msra.mxu1 %v4721_v12  ;;  %v4753_v36 = vld [vmem:[#allocation9 + $0x10] ss:$24 sps:$4 sm:$0xff]   ;;  %v4759_v37 = vld [vmem:[#allocation9 + $0x44] ss:$24 sps:$4 sm:$0xff]   ;;  %v5626_v38 = vld [vmem:[#allocation10] ss:$24 sps:$4 sm:$0xff]  }
  0x7c   :  { %464 = vmatprep.subr.bf16.mxu0 %v4722_v13  ;;  %577 = vmatprep.subr.bf16.mxu1 %v4724_v14  ;;  %v5630_v39 = vld [vmem:[#allocation10 + $0x34] ss:$24 sps:$4 sm:$0xff]   ;;  %v4757_v40 = vld [vmem:[#allocation9 + $0x40] ss:$24 sps:$4 sm:$0xff]   ;;  %v5635_v42 = vld [vmem:[#allocation10 + $0x30] ss:$24 sps:$4 sm:$0xff]  }
  0x7d   :  { %v4763_v41 = vld [vmem:[#allocation9 + $0x74] ss:$24 sps:$4 sm:$0xff]   ;;  %v5637_v43 = vld [vmem:[#allocation4 + $0x8] sm:$0xff]   ;;  %v4761_v44 = vld [vmem:[#allocation9 + $0x70] ss:$24 sps:$4 sm:$0xff]   ;;  %v7294_v8 = vmov 0.0  }
  0x7e   :  { %v4767_v45 = vld [vmem:[#allocation9 + $0xa4] ss:$24 sps:$4 sm:$0xff]   ;;  %v5643_v47 = vld [vmem:[#allocation10 + $0x60] ss:$24 sps:$4 sm:$0xff]   ;;  %v5647_v48 = vld [vmem:[#allocation10 + $0x94] ss:$24 sps:$4 sm:$0xff]  }
  0x7f   :  { %465 = vmatpush1.bf16.msra.mxu0 %v4726_v15  ;;  %578 = vmatpush1.bf16.msra.mxu1 %v4727_v16  ;;  %v5640_v46 = vld [vmem:[#allocation10 + $0x64] ss:$24 sps:$4 sm:$0xff]   ;;  %v4765_v49 = vld [vmem:[#allocation9 + $0xa0] ss:$24 sps:$4 sm:$0xff]   ;;  %v4774_v50 = vld [vmem:[#allocation9 + $0xd4] ss:$24 sps:$4 sm:$0xff]  }
  0x80   :  { %466 = vmatprep.subr.bf16.mxu0 %v4728_v17  ;;  %579 = vmatprep.subr.bf16.mxu1 %v4730_v18  ;;  %v5653_v51 = vld [vmem:[#allocation10 + $0x90] ss:$24 sps:$4 sm:$0xff]   ;;  %v5655_v52 = vld [vmem:[#allocation4 + $0x10] sm:$0xff]   ;;  %v5665_v57 = vld [vmem:[#allocation10 + $0xf4] ss:$24 sps:$4 sm:$0xff]   ;;  %vm5493_vm2 = vmmov 0  }
  0x81   :  { %v4772_v53 = vld [vmem:[#allocation9 + $0xd0] ss:$24 sps:$4 sm:$0xff]   ;;  %v5658_v54 = vld [vmem:[#allocation10 + $0xc4] ss:$24 sps:$4 sm:$0xff]   ;;  %v5661_v56 = vld [vmem:[#allocation10 + $0xc0] ss:$24 sps:$4 sm:$0xff]  }
  0x82   :  { %v4783_v55 = vld [vmem:[#allocation9 + $0x104] ss:$24 sps:$4 sm:$0xff]   ;;  %v4781_v58 = vld [vmem:[#allocation9 + $0x100] ss:$24 sps:$4 sm:$0xff]   ;;  %v5669_v59 = vld [vmem:[#allocation4 + $0x18] sm:$0xff]   ;;  %s5494_s5 = smov [#allocation15]  }
  0x83   :  { %467 = vmatpush1.bf16.msra.mxu0 %v4732_v19  ;;  %580 = vmatpush1.bf16.msra.mxu1 %v4733_v20  ;;  %v4793_v60 = vld [vmem:[#allocation9 + $0x134] ss:$24 sps:$4 sm:$0xff]   ;;  %v5673_v61 = vld [vmem:[#allocation10 + $0xf0] ss:$24 sps:$4 sm:$0xff]   ;;  %v5676_v63 = vld [vmem:[#allocation10 + $0x124] ss:$24 sps:$4 sm:$0xff]  }
  0x84   :  { %468 = vmatprep.subr.bf16.mxu0 %v4734_v21  ;;  %581 = vmatprep.subr.bf16.mxu1 %v4736_v22  ;;  %v4791_v62 = vld [vmem:[#allocation9 + $0x130] ss:$24 sps:$4 sm:$0xff]   ;;  %v4803_v1 = vld [vmem:[#allocation9 + $0x164] ss:$24 sps:$4 sm:$0xff]   ;;  %v5679_v2 = vld [vmem:[#allocation10 + $0x120] ss:$24 sps:$4 sm:$0xff]  }
  0x85   :  { %v5683_v3 = vld [vmem:[#allocation10 + $0x154] ss:$24 sps:$4 sm:$0xff]   ;;  %v4801_v4 = vld [vmem:[#allocation9 + $0x160] ss:$24 sps:$4 sm:$0xff]   ;;  %v5689_v5 = vld [vmem:[#allocation10 + $0x150] ss:$24 sps:$4 sm:$0xff]  }
  0x86   :  { %v5691_v6 = vld [vmem:[#allocation10 + $0x10] ss:$24 sps:$4 sm:$0xff]   ;;  %v5703_v9 = vld [vmem:[#allocation4 + $0x28] sm:$0xff]   ;;  %v5715_v12 = vld [vmem:[#allocation4 + $0x30] sm:$0xff]   ;;  %s3957_s9 = sshll.u32 %s5494_s5, 4  ;;  %s5495_s0 = smov [#allocation16]   ;;  %s3958_s9 = int_to_ptr.vmem [resolvable:$true] %s3957_s9 }
  0x87   :  { %469 = vmatpush1.bf16.msra.mxu0 %v4738_v23  ;;  %582 = vmatpush1.bf16.msra.mxu1 %v4739_v24  ;;  %v5693_v7 = vld [vmem:[#allocation4 + $0x20] sm:$0xff]   ;;  %v5711_v11 = vld [vmem:[#allocation7 + $0x8] sm:$0xff]  ;;  %v5723_v16 = vld [vmem:[#allocation4 + $0x38] sm:$0xff]   ;;  %s3969_s18 = sshll.u32 %s5495_s0, 4  ;;  %s5423_s10 = scalar_lea.vmem %s3958_s9, 2048  ;;  %s7246_s18 = int_to_ptr.vmem [resolvable:$true] %s3969_s18 }
  0x88   :  { %470 = vmatprep.subr.bf16.mxu0 %v4740_v25  ;;  %583 = vmatprep.subr.bf16.mxu1 %v4742_v26  ;;  %v5709_v10 = vld [vmem:[#allocation7] sm:$0xff]  ;;  %vm1556_vm1 = vcmp.gt.s32.totalorder %v5711_v11, 0  ;;  %v5729_v17 = vld [vmem:[#allocation10 + $0x8] ss:$24 sps:$4 sm:$0xff]   ;;  %v4811_v18 = vld [vmem:[#allocation10 + $0xc] ss:$24 sps:$4 sm:$0xff]   ;;  %p5424_p6 = scmp.ne.s32.totalorder %s3958_s9, %s5423_s10  ;;  %p5428_p7 = scmp.lt.s32.totalorder %s3958_s9, %s3958_s9 }
  0x89   :  { %vm1555_vm0 = vcmp.gt.s32.totalorder %v5709_v10, 0  ;;  %v4110_v14 = vsel %vm1556_vm1, 1.0, %v7294_v8  ;;  %v4814_v19 = vld [vmem:[#allocation10 + $0x40] ss:$24 sps:$4 sm:$0xff]   ;;  %v4816_v21 = vld [vmem:[#allocation10 + $0x3c] ss:$24 sps:$4 sm:$0xff]   ;;  %p5429_p8 = scmp.lt.s32.totalorder %s5423_s10, %s5423_s10 }
  0x8a   :  { %v4109_v13 = vsel %vm1555_vm0, 1.0, %v7294_v8  ;;  %v5734_v20 = vld [vmem:[#allocation10 + $0x38] ss:$24 sps:$4 sm:$0xff]   ;;  %v5741_v23 = vld [vmem:[#allocation10 + $0x68] ss:$24 sps:$4 sm:$0xff]   ;;  %vm1561_vm3 = vcmp.gt.s32.totalorder %v5709_v10, 7 }
  0x8b   :  { %471 = vmatpush1.bf16.msra.mxu0 %v4744_v27  ;;  %584 = vmatpush1.bf16.msra.mxu1 %v4745_v28  ;;  %v4663_v15 = vpack.i.bf16 %v4110_v14, %v4109_v13  ;;  %v4819_v22 = vld [vmem:[#allocation10 + $0x70] ss:$24 sps:$4 sm:$0xff]   ;;  %v4821_v24 = vld [vmem:[#allocation10 + $0x6c] ss:$24 sps:$4 sm:$0xff]   ;;  %v4824_v25 = vld [vmem:[#allocation10 + $0xa0] ss:$24 sps:$4 sm:$0xff]   ;;  %p5430_p9 = por %p5429_p8, %p5428_p7 }
  0x8c   :  { %472 = vmatprep.subr.bf16.mxu0 %v4746_v29  ;;  %585 = vmatprep.subr.bf16.mxu1 %v4748_v30  ;;  %v5746_v26 = vld [vmem:[#allocation10 + $0x98] ss:$24 sps:$4 sm:$0xff]   ;;  %v4826_v27 = vld [vmem:[#allocation10 + $0x9c] ss:$24 sps:$4 sm:$0xff]   ;;  %v5751_v29 = vld [vmem:[#allocation10 + $0xc8] ss:$24 sps:$4 sm:$0xff]  }
  0x8d   :  { %4664 = vperm.xlu0 %4662, %v4663_v15   ;;  %v4828_v28 = vld [vmem:[#allocation10 + $0xd0] ss:$24 sps:$4 sm:$0xff]   ;;  %v4830_v30 = vld [vmem:[#allocation10 + $0xcc] ss:$24 sps:$4 sm:$0xff]   ;;  %vm1562_vm4 = vcmp.gt.s32.totalorder %v5711_v11, 7  ;;  %vm2242_vm5 = vcmp.gt.s32.totalorder %v5709_v10, 2  ;;  %p5431_p10 = pnand %p5430_p9, %p5424_p6 }
  0x8e   :  { %vm2243_vm6 = vcmp.gt.s32.totalorder %v5711_v11, 2  ;;  %vm2590_vm7 = vcmp.gt.s32.totalorder %v5709_v10, 3  ;;  %vm2591_vm8 = vcmp.gt.s32.totalorder %v5711_v11, 3  ;;  %v4847_v13 = vld [vmem:[#allocation10 + $0x164] ss:$24 sps:$4 sm:$0xff]   ;;  %vm1894_vm9 = vcmp.gt.s32.totalorder %v5709_v10, 1 }
  0x8f   :  { %473 = vmatpush1.bf16.msra.mxu0 %v4750_v31  ;;  %586 = vmatpush1.bf16.msra.mxu1 %v4751_v32  ;;  %v4831_v31 = vld [vmem:[#allocation10 + $0x100] ss:$24 sps:$4 sm:$0xff]   ;;  %vm1895_vm10 = vcmp.gt.s32.totalorder %v5711_v11, 1  ;;  %vm1900_vm11 = vcmp.gt.s32.totalorder %v5709_v10, 6  ;;  %vm1901_vm12 = vcmp.gt.s32.totalorder %v5711_v11, 6  ;;  %vm2248_vm13 = vcmp.gt.s32.totalorder %v5709_v10, 5 }
  0x90   :  { %684 = vmatprep.subr.bf16.mxu0 %v4755_v33  ;;  %1159 = vmatprep.subr.bf16.mxu1 %v5623_v35  ;;  %v5756_v32 = vld [vmem:[#allocation10 + $0xf8] ss:$24 sps:$4 sm:$0xff]   ;;  %v4833_v33 = vld [vmem:[#allocation10 + $0xfc] ss:$24 sps:$4 sm:$0xff]   ;;  %vm2249_vm14 = vcmp.gt.s32.totalorder %v5711_v11, 5  ;;  %vm2596_vm15 = vcmp.gt.s32.totalorder %v5709_v10, 4 }
  0x91   :  { %vm2597_vm0 = vcmp.gt.s32.totalorder %v5711_v11, 4 }
  0x92   :  { %491 = vmatmul.mubr.bf16.vlgmr.msra.gmra.mrb[0].mxu0 %v5621_v34  ;;  %604 = vmatmul.mubr.bf16.vlgmr.msra.gmra.mrb[0].mxu1 %v5621_v34 }
  0x93   :  { %685 = vmatpush1.bf16.msra.mxu0 %v4753_v36  ;;  %500 = vmatprep.mubr.bf16.mxu0 %v7291_v0  ;;  %v5761_v36 = vld [vmem:[#allocation10 + $0x128] ss:$24 sps:$4 sm:$0xff]  }
  0x94   :  { %613 = vmatprep.mubr.bf16.mxu1 %v7291_v0  ;;  %686 = vmatprep.subr.bf16.mxu0 %v4759_v37  ;;  %v4836_v37 = vld [vmem:[#allocation10 + $0x12c] ss:$24 sps:$4 sm:$0xff]  }
  0x95   :  { %1160 = vmatpush1.bf16.msra.mxu1 %v5626_v38 }
  0x96   :  { %1161 = vmatprep.subr.bf16.mxu1 %v5630_v39 }
  0x97   :  { %687 = vmatpush1.bf16.msra.mxu0 %v4757_v40  ;;  %v4837_v40 = vld [vmem:[#allocation10 + $0x160] ss:$24 sps:$4 sm:$0xff]  }
  0x98   :  { %688 = vmatprep.subr.bf16.mxu0 %v4763_v41  ;;  %v5766_v41 = vld [vmem:[#allocation10 + $0x158] ss:$24 sps:$4 sm:$0xff]  }
  0x99   :  { %1162 = vmatpush1.bf16.msra.mxu1 %v5635_v42 }
  0x9a   :  { %501 = vmatmul.mubr.bf16.gmra.mrb[4].mxu0 %v5637_v43  ;;  %614 = vmatmul.mubr.bf16.gmra.mrb[4].mxu1 %v5637_v43 }
  0x9b   :  { %510 = vmatprep.mubr.bf16.mxu0 %v7291_v0  ;;  %623 = vmatprep.mubr.bf16.mxu1 %v7291_v0 }
  0x9c   :  { %689 = vmatpush1.bf16.msra.mxu0 %v4761_v44  ;;  %1163 = vmatprep.subr.bf16.mxu1 %v5640_v46  ;;  %v4111_v44 = vsel %vm1561_vm3, 1.0, %v7294_v8 }
  0x9d   :  { %690 = vmatprep.subr.bf16.mxu0 %v4767_v45  ;;  %1164 = vmatpush1.bf16.msra.mxu1 %v5643_v47  ;;  %v4112_v45 = vsel %vm1562_vm4, 1.0, %v7294_v8 }
  0x9e   :  { %1165 = vmatprep.subr.bf16.mxu1 %v5647_v48 }
  0xa0   :  { %691 = vmatpush1.bf16.msra.mxu0 %v4765_v49  ;;  %v4668_v49 = vpack.i.bf16 %v4112_v45, %v4111_v44 }
  0xa1   :  { %692 = vmatprep.subr.bf16.mxu0 %v4774_v50  ;;  %1166 = vmatpush1.bf16.msra.mxu1 %v5653_v51  ;;  %v4840_v50 = vld [vmem:[#allocation10 + $0x14] ss:$24 sps:$4 sm:$0xff]  }
  0xa2   :  { %511 = vmatmul.mubr.bf16.gmra.mrb[8].mxu0 %v5655_v52  ;;  %624 = vmatmul.mubr.bf16.gmra.mrb[8].mxu1 %v5655_v52 }
  0xa3   :  { %520 = vmatprep.mubr.bf16.mxu0 %v7291_v0  ;;  %633 = vmatprep.mubr.bf16.mxu1 %v7291_v0 }
  0xa4   :  { %693 = vmatpush1.bf16.msra.mxu0 %v4772_v53  ;;  %1167 = vmatprep.subr.bf16.mxu1 %v5658_v54  ;;  %v4134_v53 = vsel %vm2243_vm6, 1.0, %v7294_v8 }
  0xa5   :  { %694 = vmatprep.subr.bf16.mxu0 %v4783_v55  ;;  %1168 = vmatpush1.bf16.msra.mxu1 %v5661_v56 }
  0xa6   :  { %1169 = vmatprep.subr.bf16.mxu1 %v5665_v57  ;;  %4669 = vperm.xlu0 %4662, %v4668_v49  }
  0xa8   :  { %695 = vmatpush1.bf16.msra.mxu0 %v4781_v58  ;;  %v4841_v58 = vld [vmem:[#allocation10 + $0x44] ss:$24 sps:$4 sm:$0xff]  }
  0xa9   :  { %696 = vmatprep.subr.bf16.mxu0 %v4793_v60  ;;  %1170 = vmatpush1.bf16.msra.mxu1 %v5673_v61 }
  0xaa   :  { %521 = vmatmul.mubr.bf16.gmra.mrb[12].mxu0 %v5669_v59  ;;  %634 = vmatmul.mubr.bf16.gmra.mrb[12].mxu1 %v5669_v59 }
  0xab   :  { %530 = vmatprep.mubr.bf16.mxu0 %v7291_v0  ;;  %643 = vmatprep.mubr.bf16.mxu1 %v7291_v0 }
  0xac   :  { %697 = vmatpush1.bf16.msra.mxu0 %v4791_v62  ;;  %1171 = vmatprep.subr.bf16.mxu1 %v5676_v63  ;;  %v4842_v62 = vld [vmem:[#allocation10 + $0x74] ss:$24 sps:$4 sm:$0xff]  }
  0xad   :  { %698 = vmatprep.subr.bf16.mxu0 %v4803_v1  ;;  %1172 = vmatpush1.bf16.msra.mxu1 %v5679_v2  ;;  %v4843_v1 = vld [vmem:[#allocation10 + $0xa4] ss:$24 sps:$4 sm:$0xff]  }
  0xae   :  { %1173 = vmatprep.subr.bf16.mxu1 %v5683_v3 }
  0xb0   :  { %699 = vmatpush1.bf16.msra.mxu0 %v4801_v4  ;;  %v4844_v4 = vld [vmem:[#allocation10 + $0xd4] ss:$24 sps:$4 sm:$0xff]  }
  0xb1   :  { %1174 = vmatpush1.bf16.msra.mxu1 %v5689_v5  ;;  %1371 = vmatprep.subr.bf16.mxu0 %v5691_v6 }
  0xb2   :  { %531 = vmatmul.mubr.bf16.gmra.mrb[16].mxu0 %v5693_v7  ;;  %644 = vmatmul.mubr.bf16.gmra.mrb[16].mxu1 %v5693_v7 }
  0xb3   :  { %540 = vmatprep.mubr.bf16.mxu0 %v7291_v0  ;;  %653 = vmatprep.mubr.bf16.mxu1 %v7291_v0 }
  0xb4   :  { %4325 = vmatprep.subr.bf16.mxu1 %v7294_v8 }
  0xba   :  { %541 = vmatmul.mubr.bf16.gmra.mrb[20].mxu0 %v5703_v9  ;;  %654 = vmatmul.mubr.bf16.gmra.mrb[20].mxu1 %v5703_v9 }
  0xbb   :  { %550 = vmatprep.mubr.bf16.mxu0 %v7291_v0  ;;  %663 = vmatprep.mubr.bf16.mxu1 %v7291_v0 }
  0xc2   :  { %551 = vmatmul.mubr.bf16.gmra.mrb[24].mxu0 %v5715_v12  ;;  %664 = vmatmul.mubr.bf16.gmra.mrb[24].mxu1 %v5715_v12 }
  0xc3   :  { %560 = vmatprep.mubr.bf16.mxu0 %v7291_v0  ;;  %673 = vmatprep.mubr.bf16.mxu1 %v7291_v0 }
  0xca   :  { %561 = vmatmul.mubr.bf16.gmra.mrb[28].mxu0 %v5723_v16  ;;  %674 = vmatmul.mubr.bf16.gmra.mrb[28].mxu1 %v5723_v16 }
  0xcb   :  { %716 = vmatprep.mubr.bf16.mxu0 %v7291_v0  ;;  %1191 = vmatprep.mubr.bf16.mxu1 %v7291_v0 }
  0xd2   :  { %717 = vmatmul.mubr.bf16.vlgmr.msra.gmra.mrb[32].mxu0 %v5621_v34  ;;  %1192 = vmatmul.mubr.bf16.vlgmr.msra.gmra.mrb[32].mxu1 %v7291_v0  ;;  %v4834_v34 = vld [vmem:[#allocation10 + $0x130] ss:$24 sps:$4 sm:$0xff]  }
  0xd3   :  { %4326 = vmatpush3.bf16.msra.mxu1 %v5729_v17  ;;  %1372 = vmatpush1.bf16.msra.mxu0 %v4811_v18 }
  0xd4   :  { %4327 = vmatprep.subr.bf16.mxu1 %v7294_v8  ;;  %726 = vmatprep.mubr.bf16.mxu0 %v7291_v0 }
  0xd5   :  { %1373 = vmatprep.subr.bf16.mxu0 %v4814_v19  ;;  %4341 = vmatprep.mubr.msk.bf16.mxu1 %vm5493_vm2, %v7294_v8 }
  0xd7   :  { %4328 = vmatpush3.bf16.msra.mxu1 %v5734_v20  ;;  %1374 = vmatpush1.bf16.msra.mxu0 %v4816_v21 }
  0xd8   :  { %4329 = vmatprep.subr.bf16.mxu1 %v7294_v8  ;;  %1375 = vmatprep.subr.bf16.mxu0 %v4819_v22 }
  0xda   :  { %727 = vmatmul.mubr.bf16.gmra.mrb[36].mxu0 %v5637_v43  ;;  %v4839_v43 = vld [vmem:[#allocation10 + $0x15c] ss:$24 sps:$4 sm:$0xff]  }
  0xdb   :  { %4330 = vmatpush3.bf16.msra.mxu1 %v5741_v23  ;;  %736 = vmatprep.mubr.bf16.mxu0 %v7291_v0 }
  0xdc   :  { %4331 = vmatprep.subr.bf16.mxu1 %v7294_v8  ;;  %1376 = vmatpush1.bf16.msra.mxu0 %v4821_v24 }
  0xdd   :  { %1377 = vmatprep.subr.bf16.mxu0 %v4824_v25 }
  0xdf   :  { %4332 = vmatpush3.bf16.msra.mxu1 %v5746_v26 }
  0xe0   :  { %4333 = vmatprep.subr.bf16.mxu1 %v7294_v8  ;;  %1378 = vmatpush1.bf16.msra.mxu0 %v4826_v27 }
  0xe1   :  { %1379 = vmatprep.subr.bf16.mxu0 %v4828_v28 }
  0xe2   :  { %737 = vmatmul.mubr.bf16.gmra.mrb[40].mxu0 %v5655_v52  ;;  %v4133_v52 = vsel %vm2242_vm5, 1.0, %v7294_v8 }
  0xe3   :  { %4334 = vmatpush3.bf16.msra.mxu1 %v5751_v29  ;;  %746 = vmatprep.mubr.bf16.mxu0 %v7291_v0  ;;  %v4684_v55 = vpack.i.bf16 %v4134_v53, %v4133_v52 }
  0xe4   :  { %4335 = vmatprep.subr.bf16.mxu1 %v7294_v8  ;;  %1380 = vmatpush1.bf16.msra.mxu0 %v4830_v30 }
  0xe5   :  { %1381 = vmatprep.subr.bf16.mxu0 %v4831_v31  ;;  %4685 = vperm.xlu0 %4662, %v4684_v55  }
  0xe7   :  { %4336 = vmatpush3.bf16.msra.mxu1 %v5756_v32 }
  0xe8   :  { %4337 = vmatprep.subr.bf16.mxu1 %v7294_v8  ;;  %1382 = vmatpush1.bf16.msra.mxu0 %v4833_v33 }
  0xe9   :  { %1383 = vmatprep.subr.bf16.mxu0 %v4834_v34 }
  0xea   :  { %747 = vmatmul.mubr.bf16.gmra.mrb[44].mxu0 %v5669_v59  ;;  %v4145_v59 = vsel %vm2590_vm7, 1.0, %v7294_v8 }
  0xeb   :  { %4338 = vmatpush3.bf16.msra.mxu1 %v5761_v36  ;;  %756 = vmatprep.mubr.bf16.mxu0 %v7291_v0 }
  0xec   :  { %4339 = vmatprep.subr.bf16.mxu1 %v7294_v8  ;;  %1384 = vmatpush1.bf16.msra.mxu0 %v4836_v37 }
  0xed   :  { %1385 = vmatprep.subr.bf16.mxu0 %v4837_v40 }
  0xef   :  { %4340 = vmatpush3.bf16.msra.mxu1 %v5766_v41 }
  0xf0   :  { %4345 = vmatprep.subr.bf16.mxu1 %v7294_v8  ;;  %1386 = vmatpush1.bf16.msra.mxu0 %v4839_v43 }
  0xf1   :  { %1625 = vmatprep.subr.bf16.mxu0 %v5623_v35  ;;  %v4146_v35 = vsel %vm2591_vm8, 1.0, %v7294_v8 }
  0xf2   :  { %4342 = vmatmul.mubr.bf16.vlgmr.msra.gmra.mrb[36].mxu1 %v7291_v0  ;;  %757 = vmatmul.mubr.bf16.gmra.mrb[48].mxu0 %v5693_v7  ;;  %v4694_v60 = vpack.i.bf16 %v4146_v35, %v4145_v59  ;;  %v4845_v7 = vld [vmem:[#allocation10 + $0x104] ss:$24 sps:$4 sm:$0xff]  }
  0xf3   :  { %766 = vmatprep.mubr.bf16.mxu0 %v7291_v0  ;;  %4346 = vmatpush3.bf16.msra.mxu1 %v4840_v50 }
  0xf4   :  { %4347 = vmatprep.subr.bf16.mxu1 %v7294_v8  ;;  %4361 = vmatprep.mubr.msk.bf16.mxu1 %vm5493_vm2, %v7294_v8 }
  0xf5   :  { %4695 = vperm.xlu0 %4662, %v4694_v60  }
  0xf7   :  { %4348 = vmatpush3.bf16.msra.mxu1 %v4841_v58 }
  0xf8   :  { %4349 = vmatprep.subr.bf16.mxu1 %v7294_v8 }
  0xfa   :  { %767 = vmatmul.mubr.bf16.gmra.mrb[52].mxu0 %v5703_v9  ;;  %v4846_v9 = vld [vmem:[#allocation10 + $0x134] ss:$24 sps:$4 sm:$0xff]  }
  0xfb   :  { %776 = vmatprep.mubr.bf16.mxu0 %v7291_v0  ;;  %4350 = vmatpush3.bf16.msra.mxu1 %v4842_v62 }
  0xfc   :  { %4351 = vmatprep.subr.bf16.mxu1 %v7294_v8 }
  0xff   :  { %4352 = vmatpush3.bf16.msra.mxu1 %v4843_v1 }
 0x100   :  { %4353 = vmatprep.subr.bf16.mxu1 %v7294_v8 }
 0x102   :  { %777 = vmatmul.mubr.bf16.gmra.mrb[56].mxu0 %v5715_v12 }
 0x103   :  { %786 = vmatprep.mubr.bf16.mxu0 %v7291_v0  ;;  %4354 = vmatpush3.bf16.msra.mxu1 %v4844_v4 }
 0x104   :  { %4355 = vmatprep.subr.bf16.mxu1 %v7294_v8 }
 0x107   :  { %4356 = vmatpush3.bf16.msra.mxu1 %v4845_v7 }
 0x108   :  { %4357 = vmatprep.subr.bf16.mxu1 %v7294_v8 }
 0x10a   :  { %787 = vmatmul.mubr.bf16.gmra.mrb[60].mxu0 %v5723_v16 }
 0x10b   :  { %1403 = vmatprep.mubr.bf16.mxu0 %v7291_v0  ;;  %4358 = vmatpush3.bf16.msra.mxu1 %v4846_v9 }
 0x10c   :  { %4359 = vmatprep.subr.bf16.mxu1 %v7294_v8 }
 0x10f   :  { %4360 = vmatpush3.bf16.msra.mxu1 %v4847_v13 }
 0x110   :  { %4365 = vmatprep.subr.bf16.mxu1 %v7294_v8 }
 0x112   :  { %1404 = vmatmul.mubr.bf16.vlgmr.msra.gmra.mrb[64].mxu0 %v7291_v0  ;;  %4362 = vmatmul.mubr.bf16.vlgmr.msra.gmra.mrb[40].mxu1 %v7291_v0 }
 0x113   :  { %1626 = vmatpush1.bf16.msra.mxu0 %v5626_v38  ;;  %4366 = vmatpush3.bf16.msra.mxu1 %v5729_v17  ;;  %v959_v38 = vlaneseq  ;;  %v957_v17 = vld [vmem:[#allocation12] sm:$0x7] }
 0x114   :  { %1627 = vmatprep.subr.bf16.mxu0 %v5630_v39  ;;  %4367 = vmatprep.subr.bf16.mxu1 %v7294_v8 }
 0x115   :  { %1657 = vmatprep.mubr.bf16.mxu0 %v7291_v0  ;;  %4381 = vmatprep.mubr.msk.bf16.mxu1 %vm5493_vm2, %v7294_v8  ;;  %v5841_v39 = vshrl.u32 %v959_v38, 7 }
 0x117   :  { %1628 = vmatpush1.bf16.msra.mxu0 %v5635_v42  ;;  %4368 = vmatpush3.bf16.msra.mxu1 %v5734_v20  ;;  %v7293_v18 = vsub.s32 2, %v5841_v39  ;;  %v7296_v20 = vsub.s32 1, %v5841_v39 }
 0x118   :  { %1629 = vmatprep.subr.bf16.mxu0 %v5640_v46  ;;  %4369 = vmatprep.subr.bf16.mxu1 %v7294_v8 }
 0x119   :  { %v5867_v33 = vrot.slane %v957_v17, %v7293_v18 }
 0x11b   :  { %1630 = vmatpush1.bf16.msra.mxu0 %v5643_v47  ;;  %4370 = vmatpush3.bf16.msra.mxu1 %v5741_v23 }
 0x11c   :  { %1631 = vmatprep.subr.bf16.mxu0 %v5647_v48  ;;  %4371 = vmatprep.subr.bf16.mxu1 %v7294_v8 }
 0x11f   :  { %1632 = vmatpush1.bf16.msra.mxu0 %v5653_v51  ;;  %4372 = vmatpush3.bf16.msra.mxu1 %v5746_v26  ;;  %v5843_v51 = vld [vmem:[#allocation12 + $0x3] sm:$0x7] }
 0x120   :  { %1633 = vmatprep.subr.bf16.mxu0 %v5658_v54  ;;  %4373 = vmatprep.subr.bf16.mxu1 %v7294_v8 }
 0x123   :  { %1634 = vmatpush1.bf16.msra.mxu0 %v5661_v56  ;;  %4374 = vmatpush3.bf16.msra.mxu1 %v5751_v29 }
 0x124   :  { %1635 = vmatprep.subr.bf16.mxu0 %v5665_v57  ;;  %4375 = vmatprep.subr.bf16.mxu1 %v7294_v8  ;;  %v961_v57 = vsub.s32 0, %v5841_v39 }
 0x126   :  { %v5853_v12 = vrot.slane %v5843_v51, %v961_v57  ;;  %v5863_v31 = vrot.slane %v957_v17, %v961_v57 }
 0x127   :  { %1636 = vmatpush1.bf16.msra.mxu0 %v5673_v61  ;;  %4376 = vmatpush3.bf16.msra.mxu1 %v5756_v32 }
 0x128   :  { %1637 = vmatprep.subr.bf16.mxu0 %v5676_v63  ;;  %4377 = vmatprep.subr.bf16.mxu1 %v7294_v8 }
 0x12b   :  { %1638 = vmatpush1.bf16.msra.mxu0 %v5679_v2  ;;  %4378 = vmatpush3.bf16.msra.mxu1 %v5761_v36  ;;  %v5871_v36 = vrot.slane %v957_v17, %v7296_v20 }
 0x12c   :  { %1639 = vmatprep.subr.bf16.mxu0 %v5683_v3  ;;  %4379 = vmatprep.subr.bf16.mxu1 %v7294_v8 }
 0x12f   :  { %1640 = vmatpush1.bf16.msra.mxu0 %v5689_v5  ;;  %4380 = vmatpush3.bf16.msra.mxu1 %v5766_v41 }
 0x130   :  { %1710 = vmatprep.subr.bf16.mxu0 %v5691_v6  ;;  %4385 = vmatprep.subr.bf16.mxu1 %v7294_v8 }
 0x165   :  { %v492_v42 = vpop.f32.mrb[0].mxu0  ;;  %v605_v46 = vpop.f32.mrb[0].mxu1 }
 0x166   :  { %v494_v47 = vpop.f32.mrb[1].mxu0  ;;  %v607_v48 = vpop.f32.mrb[1].mxu1 }
 0x167   :  { %v496_v54 = vpop.f32.mrb[2].mxu0  ;;  %v609_v56 = vpop.f32.mrb[2].mxu1 }
 0x168   :  { %v5846_v61 = vpack.c.bf16 %v496_v54, %v492_v42  ;;  %v498_v63 = vpop.f32.mrb[3].mxu0  ;;  %v5848_v2 = vpack.c.bf16 %v609_v56, %v605_v46  ;;  %v611_v3 = vpop.f32.mrb[3].mxu1 }
 0x169   :  { %v5850_v5 = vpack.c.bf16 %v498_v63, %v494_v47  ;;  %v800_v6 = vpack.c.bf16 %v611_v3, %v607_v48 }
 0x16b   :  { %v3586_v14 = vunpack.c.l.bf16 %v800_v6  ;;  %v3589_v15 = vunpack.c.h.bf16 %v800_v6 }
 0x16d   :  { %v502_v16 = vpop.f32.mrb[4].mxu0  ;;  %v615_v19 = vpop.f32.mrb[4].mxu1  ;;  %v5858_v21 = vadd.f32 %v3586_v14, %v5853_v12  ;;  %v5861_v22 = vadd.f32 %v3589_v15, %v5853_v12 }
 0x16e   :  { %v504_v23 = vpop.f32.mrb[5].mxu0  ;;  %v617_v24 = vpop.f32.mrb[5].mxu1 }
 0x16f   :  { %7403 = vst [vmem:[#allocation24_spill] sm:$0xff] %v5858_v21  ;;  %7404 = vst [vmem:[#allocation25_spill] sm:$0xff] %v5861_v22  ;;  %v506_v25 = vpop.f32.mrb[6].mxu0  ;;  %v619_v26 = vpop.f32.mrb[6].mxu1 }
 0x170   :  { %v803_v27 = vpack.c.bf16 %v506_v25, %v502_v16  ;;  %v508_v28 = vpop.f32.mrb[7].mxu0  ;;  %v805_v29 = vpack.c.bf16 %v619_v26, %v615_v19  ;;  %v621_v30 = vpop.f32.mrb[7].mxu1 }
 0x171   :  { %v804_v32 = vpack.c.bf16 %v508_v28, %v504_v23  ;;  %v806_v34 = vpack.c.bf16 %v621_v30, %v617_v24 }
 0x172   :  { %v1606_v37 = vunpack.c.l.bf16 %v803_v27  ;;  %v1609_v40 = vunpack.c.h.bf16 %v803_v27  ;;  %v1608_v41 = vunpack.c.l.bf16 %v805_v29  ;;  %v1611_v43 = vunpack.c.h.bf16 %v805_v29 }
 0x173   :  { %v1607_v44 = vunpack.c.l.bf16 %v804_v32  ;;  %v1610_v45 = vunpack.c.h.bf16 %v804_v32  ;;  %v3276_v49 = vunpack.c.l.bf16 %v806_v34  ;;  %v3279_v50 = vunpack.c.h.bf16 %v806_v34 }
 0x174   :  { %v5874_v52 = vadd.f32 %v1608_v41, %v5867_v33  ;;  %v5877_v53 = vadd.f32 %v1611_v43, %v5867_v33  ;;  %v5880_v55 = vadd.f32 %v1606_v37, %v5863_v31  ;;  %v5883_v58 = vadd.f32 %v1609_v40, %v5863_v31 }
 0x175   :  { %v512_v59 = vpop.f32.mrb[8].mxu0  ;;  %v625_v35 = vpop.f32.mrb[8].mxu1  ;;  %v5886_v60 = vadd.f32 %v1607_v44, %v5871_v36  ;;  %v5889_v62 = vadd.f32 %v1610_v45, %v5871_v36  ;;  %v5892_v1 = vadd.f32 %v3276_v49, %v5853_v12  ;;  %v5895_v4 = vadd.f32 %v3279_v50, %v5853_v12 }
 0x176   :  { %v514_v7 = vpop.f32.mrb[9].mxu0  ;;  %v627_v9 = vpop.f32.mrb[9].mxu1 }
 0x177   :  { %7405 = vst [vmem:[#allocation26_spill] sm:$0xff] %v5892_v1  ;;  %7406 = vst [vmem:[#allocation27_spill] sm:$0xff] %v5895_v4  ;;  %v516_v13 = vpop.f32.mrb[10].mxu0  ;;  %v629_v38 = vpop.f32.mrb[10].mxu1 }
 0x178   :  { %v809_v42 = vpack.c.bf16 %v516_v13, %v512_v59  ;;  %v518_v46 = vpop.f32.mrb[11].mxu0  ;;  %v811_v47 = vpack.c.bf16 %v629_v38, %v625_v35  ;;  %v631_v48 = vpop.f32.mrb[11].mxu1 }
 0x179   :  { %v810_v54 = vpack.c.bf16 %v518_v46, %v514_v7  ;;  %v812_v56 = vpack.c.bf16 %v631_v48, %v627_v9 }
 0x17a   :  { %v1954_v57 = vunpack.c.l.bf16 %v809_v42  ;;  %v1957_v63 = vunpack.c.h.bf16 %v809_v42  ;;  %v1956_v3 = vunpack.c.l.bf16 %v811_v47  ;;  %v1959_v6 = vunpack.c.h.bf16 %v811_v47 }
 0x17b   :  { %v1955_v14 = vunpack.c.l.bf16 %v810_v54  ;;  %v1958_v15 = vunpack.c.h.bf16 %v810_v54  ;;  %v2966_v16 = vunpack.c.l.bf16 %v812_v56  ;;  %v2969_v17 = vunpack.c.h.bf16 %v812_v56 }
 0x17c   :  { %v5898_v19 = vadd.f32 %v1956_v3, %v5867_v33  ;;  %v5901_v23 = vadd.f32 %v1959_v6, %v5867_v33  ;;  %v5904_v26 = vadd.f32 %v1954_v57, %v5863_v31  ;;  %v5910_v28 = vadd.f32 %v1957_v63, %v5863_v31 }
 0x17d   :  { %v522_v24 = vpop.f32.mrb[12].mxu0  ;;  %v635_v25 = vpop.f32.mrb[12].mxu1  ;;  %v5907_v27 = vadd.f32 %v1955_v14, %v5871_v36  ;;  %v5913_v29 = vadd.f32 %v1958_v15, %v5871_v36  ;;  %v5916_v34 = vadd.f32 %v2966_v16, %v5853_v12  ;;  %v5919_v37 = vadd.f32 %v2969_v17, %v5853_v12 }
 0x17e   :  { %7407 = vst [vmem:[#allocation28_spill] sm:$0xff] %v5898_v19  ;;  %7408 = vst [vmem:[#allocation29_spill] sm:$0xff] %v5901_v23  ;;  %v524_v30 = vpop.f32.mrb[13].mxu0  ;;  %v637_v32 = vpop.f32.mrb[13].mxu1 }
 0x17f   :  { %7409 = vst [vmem:[#allocation30_spill] sm:$0xff] %v5904_v26  ;;  %7410 = vst [vmem:[#allocation31_spill] sm:$0xff] %v5907_v27  ;;  %v526_v40 = vpop.f32.mrb[14].mxu0  ;;  %v639_v41 = vpop.f32.mrb[14].mxu1 }
 0x180   :  { %7411 = vst [vmem:[#allocation32_spill] sm:$0xff] %v5910_v28  ;;  %7412 = vst [vmem:[#allocation33_spill] sm:$0xff] %v5913_v29  ;;  %v815_v43 = vpack.c.bf16 %v526_v40, %v522_v24  ;;  %v528_v44 = vpop.f32.mrb[15].mxu0  ;;  %v817_v45 = vpack.c.bf16 %v639_v41, %v635_v25  ;;  %v641_v49 = vpop.f32.mrb[15].mxu1 }
 0x181   :  { %7413 = vst [vmem:[#allocation34_spill] sm:$0xff] %v5916_v34  ;;  %7414 = vst [vmem:[#allocation35_spill] sm:$0xff] %v5919_v37  ;;  %v816_v50 = vpack.c.bf16 %v528_v44, %v524_v30  ;;  %v818_v59 = vpack.c.bf16 %v641_v49, %v637_v32  ;;  %v7439_v34 = vsub.s32 1, %v5841_v39 }
 0x182   :  { %v2302_v35 = vunpack.c.l.bf16 %v815_v43  ;;  %v2305_v7 = vunpack.c.h.bf16 %v815_v43  ;;  %v2304_v9 = vunpack.c.l.bf16 %v817_v45  ;;  %v2307_v13 = vunpack.c.h.bf16 %v817_v45 }
 0x183   :  { %v2303_v38 = vunpack.c.l.bf16 %v816_v50  ;;  %v2306_v42 = vunpack.c.h.bf16 %v816_v50  ;;  %v2656_v46 = vunpack.c.l.bf16 %v818_v59  ;;  %v2659_v47 = vunpack.c.h.bf16 %v818_v59 }
 0x184   :  { %v5922_v48 = vadd.f32 %v2304_v9, %v5867_v33  ;;  %v5925_v54 = vadd.f32 %v2307_v13, %v5867_v33  ;;  %v5928_v63 = vadd.f32 %v2302_v35, %v5863_v31  ;;  %v5934_v6 = vadd.f32 %v2305_v7, %v5863_v31 }
 0x185   :  { %v532_v56 = vpop.f32.mrb[16].mxu0  ;;  %v645_v57 = vpop.f32.mrb[16].mxu1  ;;  %v5931_v3 = vadd.f32 %v2303_v38, %v5871_v36  ;;  %v5937_v14 = vadd.f32 %v2306_v42, %v5871_v36  ;;  %v5940_v17 = vadd.f32 %v2656_v46, %v5853_v12  ;;  %v5943_v24 = vadd.f32 %v2659_v47, %v5853_v12 }
 0x186   :  { %7415 = vst [vmem:[#allocation36_spill] sm:$0xff] %v5922_v48  ;;  %7416 = vst [vmem:[#allocation37_spill] sm:$0xff] %v5925_v54  ;;  %v534_v15 = vpop.f32.mrb[17].mxu0  ;;  %v647_v16 = vpop.f32.mrb[17].mxu1 }
 0x187   :  { %7417 = vst [vmem:[#allocation38_spill] sm:$0xff] %v5928_v63  ;;  %7418 = vst [vmem:[#allocation39_spill] sm:$0xff] %v5931_v3  ;;  %v536_v25 = vpop.f32.mrb[18].mxu0  ;;  %v649_v30 = vpop.f32.mrb[18].mxu1  ;;  %v6284_v3 = vld [vmem:[#allocation10 + $0x4] ss:$24 sps:$4 sm:$0xff]  }
 0x188   :  { %7419 = vst [vmem:[#allocation40_spill] sm:$0xff] %v5934_v6  ;;  %7420 = vst [vmem:[#allocation41_spill] sm:$0xff] %v5937_v14  ;;  %v821_v32 = vpack.c.bf16 %v536_v25, %v532_v56  ;;  %v538_v40 = vpop.f32.mrb[19].mxu0  ;;  %v823_v41 = vpack.c.bf16 %v649_v30, %v645_v57  ;;  %v651_v43 = vpop.f32.mrb[19].mxu1  ;;  %v6278_v14 = vld [vmem:[#allocation10 + $0x15c] ss:$24 sps:$4 sm:$0xff]  }
 0x189   :  { %7421 = vst [vmem:[#allocation42_spill] sm:$0xff] %v5940_v17  ;;  %7422 = vst [vmem:[#allocation43_spill] sm:$0xff] %v5943_v24  ;;  %v822_v44 = vpack.c.bf16 %v538_v40, %v534_v15  ;;  %v824_v45 = vpack.c.bf16 %v651_v43, %v647_v16  ;;  %v6281_v6 = vld [vmem:[#allocation10 + $0x164] ss:$24 sps:$4 sm:$0xff]  }
 0x18a   :  { %v2647_v49 = vunpack.c.l.bf16 %v821_v32  ;;  %v2650_v50 = vunpack.c.h.bf16 %v821_v32  ;;  %v2649_v59 = vunpack.c.l.bf16 %v823_v41  ;;  %v2652_v35 = vunpack.c.h.bf16 %v823_v41 }
 0x18b   :  { %v2648_v7 = vunpack.c.l.bf16 %v822_v44  ;;  %v2651_v9 = vunpack.c.h.bf16 %v822_v44  ;;  %v2314_v13 = vunpack.c.l.bf16 %v824_v45  ;;  %v2317_v38 = vunpack.c.h.bf16 %v824_v45 }
 0x18c   :  { %v5946_v42 = vadd.f32 %v2649_v59, %v5867_v33  ;;  %v5949_v46 = vadd.f32 %v2652_v35, %v5867_v33  ;;  %v5952_v47 = vadd.f32 %v2647_v49, %v5863_v31  ;;  %v5955_v56 = vadd.f32 %v2650_v50, %v5863_v31 }
 0x18d   :  { %v542_v57 = vpop.f32.mrb[20].mxu0  ;;  %v655_v15 = vpop.f32.mrb[20].mxu1  ;;  %v5958_v16 = vadd.f32 %v2314_v13, %v5853_v12  ;;  %v5961_v25 = vadd.f32 %v2317_v38, %v5853_v12  ;;  %v5964_v30 = vadd.f32 %v2648_v7, %v5871_v36  ;;  %v5967_v32 = vadd.f32 %v2651_v9, %v5871_v36 }
 0x18e   :  { %7423 = vst [vmem:[#allocation44_spill] sm:$0xff] %v5946_v42  ;;  %7424 = vst [vmem:[#allocation45_spill] sm:$0xff] %v5949_v46  ;;  %v544_v40 = vpop.f32.mrb[21].mxu0  ;;  %v657_v41 = vpop.f32.mrb[21].mxu1 }
 0x18f   :  { %7425 = vst [vmem:[#allocation46_spill] sm:$0xff] %v5952_v47  ;;  %7426 = vst [vmem:[#allocation47_spill] sm:$0xff] %v5955_v56  ;;  %v546_v43 = vpop.f32.mrb[22].mxu0  ;;  %v659_v44 = vpop.f32.mrb[22].mxu1 }
 0x190   :  { %7427 = vst [vmem:[#allocation48_spill] sm:$0xff] %v5958_v16  ;;  %7428 = vst [vmem:[#allocation49_spill] sm:$0xff] %v5961_v25  ;;  %v827_v45 = vpack.c.bf16 %v546_v43, %v542_v57  ;;  %v548_v49 = vpop.f32.mrb[23].mxu0  ;;  %v829_v50 = vpack.c.bf16 %v659_v44, %v655_v15  ;;  %v661_v59 = vpop.f32.mrb[23].mxu1  ;;  %v6263_v25 = vld [vmem:[#allocation10 + $0x12c] ss:$24 sps:$4 sm:$0xff]  }
 0x191   :  { %7429 = vst [vmem:[#allocation50_spill] sm:$0xff] %v5964_v30  ;;  %7430 = vst [vmem:[#allocation51_spill] sm:$0xff] %v5967_v32  ;;  %v828_v35 = vpack.c.bf16 %v548_v49, %v544_v40  ;;  %v830_v13 = vpack.c.bf16 %v661_v59, %v657_v41  ;;  %v1016_v49 = vunpack.c.h.bf16 %v5846_v61  ;;  %v1014_v59 = vunpack.c.l.bf16 %v5850_v5  ;;  %v6269_v16 = vld [vmem:[#allocation13 + $0x1] ss:$0 sm:$0xff] }
 0x192   :  { %v2957_v0 = vunpack.c.l.bf16 %v827_v45  ;;  %v2960_v18 = vunpack.c.h.bf16 %v827_v45  ;;  %v2959_v38 = vunpack.c.l.bf16 %v829_v50  ;;  %v2962_v8 = vunpack.c.h.bf16 %v829_v50 }
 0x193   :  { %v2958_v20 = vunpack.c.l.bf16 %v828_v35  ;;  %v2961_v7 = vunpack.c.h.bf16 %v828_v35  ;;  %v1966_v22 = vunpack.c.l.bf16 %v830_v13  ;;  %v1969_v21 = vunpack.c.h.bf16 %v830_v13 }
 0x194   :  { %v5970_v9 = vadd.f32 %v2959_v38, %v5867_v33  ;;  %v5973_v4 = vadd.f32 %v2962_v8, %v5867_v33  ;;  %v5976_v57 = vadd.f32 %v2957_v0, %v5863_v31  ;;  %v5979_v15 = vadd.f32 %v2960_v18, %v5863_v31 }
 0x195   :  { %v552_v40 = vpop.f32.mrb[24].mxu0  ;;  %v665_v41 = vpop.f32.mrb[24].mxu1  ;;  %v5982_v43 = vadd.f32 %v1966_v22, %v5853_v12  ;;  %v5985_v44 = vadd.f32 %v1969_v21, %v5853_v12  ;;  %v5988_v45 = vadd.f32 %v2958_v20, %v5871_v36  ;;  %v5991_v8 = vadd.f32 %v2961_v7, %v5871_v36 }
 0x196   :  { %7431 = vst [vmem:[#allocation52_spill] sm:$0xff] %v5970_v9  ;;  %7432 = vst [vmem:[#allocation53_spill] sm:$0xff] %v5973_v4  ;;  %v1013_v0 = vunpack.c.l.bf16 %v5846_v61  ;;  %v554_v18 = vpop.f32.mrb[25].mxu0  ;;  %v667_v50 = vpop.f32.mrb[25].mxu1  ;;  %v1017_v20 = vunpack.c.h.bf16 %v5850_v5  ;;  %v6004_v61 = vrot.slane %v5843_v51, %v7439_v34 }
 0x197   :  { %7433 = vst [vmem:[#allocation54_spill] sm:$0xff] %v5976_v57  ;;  %7434 = vst [vmem:[#allocation55_spill] sm:$0xff] %v5979_v15  ;;  %v556_v35 = vpop.f32.mrb[26].mxu0  ;;  %v669_v22 = vpop.f32.mrb[26].mxu1 }
 0x198   :  { %7435 = vst [vmem:[#allocation56_spill] sm:$0xff] %v5982_v43  ;;  %7436 = vst [vmem:[#allocation57_spill] sm:$0xff] %v5985_v44  ;;  %v5996_v13 = vpack.c.bf16 %v556_v35, %v552_v40  ;;  %v558_v21 = vpop.f32.mrb[27].mxu0  ;;  %v835_v38 = vpack.c.bf16 %v669_v22, %v665_v41  ;;  %v671_v1 = vpop.f32.mrb[27].mxu1  ;;  %v6008_v40 = vadd.f32 %v1016_v49, %v5863_v31 }
 0x199   :  { %7437 = vst [vmem:[#allocation58_spill] sm:$0xff] %v5988_v45  ;;  %7438 = vst [vmem:[#allocation59_spill] sm:$0xff] %v5991_v8  ;;  %v5999_v37 = vpack.c.bf16 %v558_v21, %v554_v18  ;;  %v836_v7 = vpack.c.bf16 %v671_v1, %v667_v50  ;;  %v1455_v8 = vadd.f32 %v1013_v0, %v5863_v31  ;;  %v7442_v50 = vmov 0.0  }
 0x19a   :  { %v3269_v4 = vunpack.c.l.bf16 %v835_v38  ;;  %v3272_v9 = vunpack.c.h.bf16 %v835_v38  ;;  %v3267_v41 = vunpack.c.l.bf16 %v5996_v13  ;;  %v3270_v35 = vunpack.c.h.bf16 %v5996_v13 }
 0x19b   :  { %v3268_v5 = vunpack.c.l.bf16 %v5999_v37  ;;  %v1456_v1 = vadd.f32 %v1014_v59, %v5871_v36  ;;  %v4121_v22 = vsel %vm1894_vm9, 1.0, %v7442_v50  ;;  %v4122_v13 = vsel %vm1895_vm10, 1.0, %v7442_v50 }
 0x19c   :  { %v6015_v18 = vadd.f32 %v3269_v4, %v5867_v33  ;;  %v6018_v34 = vadd.f32 %v3272_v9, %v5867_v33  ;;  %v4674_v21 = vpack.i.bf16 %v4122_v13, %v4121_v22  ;;  %v4123_v9 = vsel %vm1900_vm11, 1.0, %v7442_v50 }
 0x19d   :  { %v562_v0 = vpop.f32.mrb[28].mxu0  ;;  %v675_v49 = vpop.f32.mrb[28].mxu1  ;;  %v4124_v38 = vsel %vm1901_vm12, 1.0, %v7442_v50  ;;  %v4135_v22 = vsel %vm2248_vm13, 1.0, %v7442_v50  ;;  %v4136_v13 = vsel %vm2249_vm14, 1.0, %v7442_v50  ;;  %v1621_v32 = vunpack.c.h.bf16 %v836_v7 }
 0x19e   :  { %7440 = vst [vmem:[#allocation60_spill] sm:$0xff] %v6015_v18  ;;  %7441 = vst [vmem:[#allocation61_spill] sm:$0xff] %v6018_v34  ;;  %v564_v59 = vpop.f32.mrb[29].mxu0  ;;  %v677_v4 = vpop.f32.mrb[29].mxu1  ;;  %v1618_v18 = vunpack.c.l.bf16 %v836_v7  ;;  %v4679_v45 = vpack.i.bf16 %v4124_v38, %v4123_v9  ;;  %4675 = vperm.xlu1 %4673, %v4674_v21   ;;  %v3271_v9 = vunpack.c.h.bf16 %v5999_v37  ;;  %v4147_v10 = vsel %vm2596_vm15, 1.0, %v7442_v50 }
 0x19f   :  { %v566_v34 = vpop.f32.mrb[30].mxu0  ;;  %v679_v15 = vpop.f32.mrb[30].mxu1 }
 0x1a0   :  { %v839_v57 = vpack.c.bf16 %v566_v34, %v562_v0  ;;  %v568_v24 = vpop.f32.mrb[31].mxu0  ;;  %v841_v17 = vpack.c.bf16 %v679_v15, %v675_v49  ;;  %v681_v46 = vpop.f32.mrb[31].mxu1  ;;  %v4689_v49 = vpack.i.bf16 %v4136_v13, %v4135_v22  ;;  %v6046_v11 = vadd.f32 %v1618_v18, %v5853_v12 }
 0x1a1   :  { %v840_v42 = vpack.c.bf16 %v568_v24, %v564_v59  ;;  %v6033_v56 = vpack.c.bf16 %v681_v46, %v677_v4  ;;  %v4148_v46 = vsel %vm2597_vm0, 1.0, %v7442_v50  ;;  %v1459_v59 = vadd.f32 %v1017_v20, %v5871_v36 }
 0x1a2   :  { %v3579_v38 = vunpack.c.l.bf16 %v841_v17  ;;  %v3582_v30 = vunpack.c.h.bf16 %v841_v17  ;;  %v3577_v34 = vunpack.c.l.bf16 %v839_v57  ;;  %v3580_v15 = vunpack.c.h.bf16 %v839_v57  ;;  %4680 = vperm.xlu1 %4673, %v4679_v45  }
 0x1a3   :  { %v3578_v0 = vunpack.c.l.bf16 %v840_v42  ;;  %v3581_v37 = vunpack.c.h.bf16 %v840_v42  ;;  %v4699_v57 = vpack.i.bf16 %v4148_v46, %v4147_v10  ;;  %v6050_v4 = vadd.f32 %v1621_v32, %v5853_v12 }
 0x1a4   :  { %v6039_v21 = vadd.f32 %v3579_v38, %v5867_v33  ;;  %v6042_v24 = vadd.f32 %v3582_v30, %v5867_v33  ;;  %v6053_v30 = vadd.f32 %v3267_v41, %v5863_v31  ;;  %v6056_v45 = vadd.f32 %v3268_v5, %v5871_v36 }
 0x1a5   :  { %v718_v17 = vpop.f32.mrb[32].mxu0  ;;  %v1193_v7 = vpop.f32.mrb[32].mxu1  ;;  %v6059_v18 = vadd.f32 %v3270_v35, %v5863_v31  ;;  %v6062_v20 = vadd.f32 %v3271_v9, %v5871_v36  ;;  %v6065_v32 = vadd.f32 %v3577_v34, %v5863_v31  ;;  %v6072_v35 = vadd.f32 %v3580_v15, %v5863_v31 }
 0x1a6   :  { %7443 = vst [vmem:[#allocation62_spill] sm:$0xff] %v6039_v21  ;;  %7444 = vst [vmem:[#allocation63_spill] sm:$0xff] %v6042_v24  ;;  %v1461_v22 = vadd.f32 %v1455_v8, %v1193_v7  ;;  %v720_v13 = vpop.f32.mrb[33].mxu0  ;;  %v1195_v38 = vpop.f32.mrb[33].mxu1  ;;  %v6068_v8 = vadd.f32 %v3578_v0, %v5871_v36  ;;  %4690 = vperm.xlu1 %4673, %v4689_v49   ;;  %v7452_v9 = vsub.s32 2, %v5841_v39 }
 0x1a7   :  { %7445 = vst [vmem:[#allocation64_spill] sm:$0xff] %v6053_v30  ;;  %7446 = vst [vmem:[#allocation65_spill] sm:$0xff] %v6056_v45  ;;  %v1475_v42 = vadd.f32 %v1456_v1, %v1195_v38  ;;  %v722_v24 = vpop.f32.mrb[34].mxu0  ;;  %v1197_v21 = vpop.f32.mrb[34].mxu1  ;;  %v6080_v0 = vadd.f32 %v3581_v37, %v5871_v36 }
 0x1a8   :  { %7447 = vst [vmem:[#allocation66_spill] sm:$0xff] %v6059_v18  ;;  %7448 = vst [vmem:[#allocation67_spill] sm:$0xff] %v6062_v20  ;;  %v4101_v41 = vmul.f32 -1.442695, %v1461_v22  ;;  %v801_v10 = vpack.c.bf16 %v722_v24, %v718_v17  ;;  %v1462_v5 = vadd.f32 %v6008_v40, %v1197_v21  ;;  %v724_v46 = vpop.f32.mrb[35].mxu0  ;;  %v1199_v7 = vpop.f32.mrb[35].mxu1  ;;  %v6077_v38 = vrot.slane %v5843_v51, %v7452_v9 }
 0x1a9   :  { %7449 = vst [vmem:[#allocation68_spill] sm:$0xff] %v6065_v32  ;;  %7450 = vst [vmem:[#allocation69_spill] sm:$0xff] %v6068_v8  ;;  %v802_v1 = vpack.c.bf16 %v724_v46, %v720_v13  ;;  %v1476_v34 = vadd.f32 %v1459_v59, %v1199_v7 }
 0x1aa   :  { %7451 = vst [vmem:[#allocation70_spill] sm:$0xff] %v6072_v35  ;;  %7453 = vst [vmem:[#allocation71_spill] sm:$0xff] %v6080_v0  ;;  %v3587_v22 = vunpack.c.l.bf16 %v801_v10  ;;  %v3590_v24 = vunpack.c.h.bf16 %v801_v10  ;;  %v4102_v17 = vmul.f32 -1.442695, %v1462_v5  ;;  %4848 = vpow2.f32 %v4101_v41  ;;  %4700 = vperm.xlu1 %4673, %v4699_v57  }
 0x1ab   :  { %v3588_v40 = vunpack.c.l.bf16 %v802_v1  ;;  %v3591_v21 = vunpack.c.h.bf16 %v802_v1  ;;  %v4103_v5 = vmul.f32 -1.442695, %v1475_v42  ;;  %v4104_v1 = vmul.f32 -1.442695, %v1476_v34 }
 0x1ac   :  { %v6083_v31 = vadd.f32 %v3587_v22, %v6004_v61  ;;  %v6086_v15 = vadd.f32 %v3590_v24, %v6004_v61  ;;  %4850 = vpow2.f32 %v4102_v17 }
 0x1ad   :  { %v6089_v39 = vadd.f32 %v3588_v40, %v6077_v38  ;;  %v6092_v51 = vadd.f32 %v3591_v21, %v6077_v38  ;;  %v728_v36 = vpop.f32.mrb[36].mxu0  ;;  %4852 = vpow2.f32 %v4103_v5 }
 0x1ae   :  { %7454 = vst [vmem:[#allocation72_spill] sm:$0xff] %v6083_v31  ;;  %7455 = vst [vmem:[#allocation73_spill] sm:$0xff] %v6086_v15  ;;  %v730_v49 = vpop.f32.mrb[37].mxu0  ;;  %4854 = vpow2.f32 %v4104_v1 }
 0x1af   :  { %7456 = vst [vmem:[#allocation74_spill] sm:$0xff] %v6089_v39  ;;  %7457 = vst [vmem:[#allocation75_spill] sm:$0xff] %v6092_v51  ;;  %v732_v37 = vpop.f32.mrb[38].mxu0 }
 0x1b0   :  { %v807_v59 = vpack.c.bf16 %v732_v37, %v728_v36  ;;  %v734_v13 = vpop.f32.mrb[39].mxu0 }
 0x1b1   :  { %v808_v41 = vpack.c.bf16 %v734_v13, %v730_v49 }
 0x1b2   :  { %v3277_v57 = vunpack.c.l.bf16 %v807_v59  ;;  %v3280_v10 = vunpack.c.h.bf16 %v807_v59 }
 0x1b3   :  { %v3278_v46 = vunpack.c.l.bf16 %v808_v41  ;;  %v3281_v7 = vunpack.c.h.bf16 %v808_v41 }
 0x1b4   :  { %v6095_v9 = vadd.f32 %v3277_v57, %v6004_v61  ;;  %v6098_v22 = vadd.f32 %v3280_v10, %v6004_v61  ;;  %v4849_v21 = vpop.eup %4848 }
 0x1b5   :  { %v6101_v24 = vadd.f32 %v3278_v46, %v6077_v38  ;;  %v6104_v17 = vadd.f32 %v3281_v7, %v6077_v38  ;;  %v738_v40 = vpop.f32.mrb[40].mxu0  ;;  %v1469_v59 = vadd.f32 1.0, %v4849_v21 }
 0x1b6   :  { %7458 = vst [vmem:[#allocation76_spill] sm:$0xff] %v6095_v9  ;;  %7459 = vst [vmem:[#allocation77_spill] sm:$0xff] %v6098_v22  ;;  %v740_v36 = vpop.f32.mrb[41].mxu0  ;;  %v4851_v49 = vpop.eup %4850 }
 0x1b7   :  { %7460 = vst [vmem:[#allocation78_spill] sm:$0xff] %v6101_v24  ;;  %7461 = vst [vmem:[#allocation79_spill] sm:$0xff] %v6104_v17  ;;  %v742_v42 = vpop.f32.mrb[42].mxu0  ;;  %v1470_v10 = vadd.f32 1.0, %v4851_v49  ;;  %4856 = vrcp.f32 %v1469_v59 }
 0x1b8   :  { %v813_v34 = vpack.c.bf16 %v742_v42, %v738_v40  ;;  %v744_v37 = vpop.f32.mrb[43].mxu0 }
 0x1b9   :  { %v814_v13 = vpack.c.bf16 %v744_v37, %v740_v36  ;;  %4858 = vrcp.f32 %v1470_v10 }
 0x1ba   :  { %v2967_v41 = vunpack.c.l.bf16 %v813_v34  ;;  %v2970_v57 = vunpack.c.h.bf16 %v813_v34  ;;  %v4853_v34 = vpop.eup %4852 }
 0x1bb   :  { %v2968_v51 = vunpack.c.l.bf16 %v814_v13  ;;  %v2971_v46 = vunpack.c.h.bf16 %v814_v13  ;;  %v4855_v13 = vpop.eup %4854  ;;  %v1483_v0 = vadd.f32 1.0, %v4853_v34 }
 0x1bc   :  { %v6107_v39 = vadd.f32 %v2967_v41, %v6004_v61  ;;  %v6110_v7 = vadd.f32 %v2970_v57, %v6004_v61  ;;  %v1015_v57 = vunpack.c.l.bf16 %v5848_v2 }
 0x1bd   :  { %v6113_v5 = vadd.f32 %v2968_v51, %v6077_v38  ;;  %v6116_v1 = vadd.f32 %v2971_v46, %v6077_v38  ;;  %v748_v40 = vpop.f32.mrb[44].mxu0  ;;  %v6119_v51 = vld [vmem:[#allocation13] ss:$0 sm:$0xff]  ;;  %4860 = vrcp.f32 %v1483_v0 }
 0x1be   :  { %7462 = vst [vmem:[#allocation80_spill] sm:$0xff] %v6107_v39  ;;  %7463 = vst [vmem:[#allocation81_spill] sm:$0xff] %v6110_v7  ;;  %v750_v21 = vpop.f32.mrb[45].mxu0  ;;  %v1457_v32 = vadd.f32 %v1015_v57, %v5867_v33 }
 0x1bf   :  { %7464 = vst [vmem:[#allocation82_spill] sm:$0xff] %v6113_v5  ;;  %7465 = vst [vmem:[#allocation83_spill] sm:$0xff] %v6116_v1  ;;  %v752_v36 = vpop.f32.mrb[46].mxu0 }
 0x1c0   :  { %v819_v42 = vpack.c.bf16 %v752_v36, %v748_v40  ;;  %v754_v49 = vpop.f32.mrb[47].mxu0  ;;  %v1018_v40 = vunpack.c.h.bf16 %v5848_v2  ;;  %v1484_v36 = vadd.f32 1.0, %v4855_v13 }
 0x1c1   :  { %v820_v37 = vpack.c.bf16 %v754_v49, %v750_v21 }
 0x1c2   :  { %v2657_v41 = vunpack.c.l.bf16 %v819_v42  ;;  %v2660_v15 = vunpack.c.h.bf16 %v819_v42  ;;  %v1460_v9 = vadd.f32 %v1018_v40, %v5867_v33  ;;  %4862 = vrcp.f32 %v1484_v36 }
 0x1c3   :  { %v2658_v59 = vunpack.c.l.bf16 %v820_v37  ;;  %v2661_v31 = vunpack.c.h.bf16 %v820_v37 }
 0x1c4   :  { %v6122_v46 = vadd.f32 %v2657_v41, %v6004_v61  ;;  %v6125_v10 = vadd.f32 %v2660_v15, %v6004_v61  ;;  %v4857_v41 = vpop.eup %4856 }
 0x1c5   :  { %v6129_v21 = vadd.f32 %v2658_v59, %v6077_v38  ;;  %v6132_v42 = vadd.f32 %v2661_v31, %v6077_v38  ;;  %v1236_v49 = vpop.f32.mrb[36].mxu1  ;;  %v758_v37 = vpop.f32.mrb[48].mxu0 }
 0x1c6   :  { %7466 = vst [vmem:[#allocation84_spill] sm:$0xff] %v6122_v46  ;;  %7467 = vst [vmem:[#allocation85_spill] sm:$0xff] %v6125_v10  ;;  %v1489_v35 = vadd.f32 %v6119_v51, %v1236_v49  ;;  %v4343_v34 = vpop.f32.mrb[37].mxu1  ;;  %v760_v8 = vpop.f32.mrb[49].mxu0 }
 0x1c7   :  { %7468 = vst [vmem:[#allocation86_spill] sm:$0xff] %v6129_v21  ;;  %7469 = vst [vmem:[#allocation87_spill] sm:$0xff] %v6132_v42  ;;  %v1239_v15 = vpop.f32.mrb[38].mxu1  ;;  %v762_v17 = vpop.f32.mrb[50].mxu0 }
 0x1c8   :  { %v1491_v2 = vmul.f32 %v4857_v41, %v1489_v35  ;;  %v1490_v13 = vadd.f32 %v6119_v51, %v1239_v15  ;;  %v825_v59 = vpack.c.bf16 %v762_v17, %v758_v37  ;;  %v764_v24 = vpop.f32.mrb[51].mxu0  ;;  %v4344_v22 = vpop.f32.mrb[39].mxu1 }
 0x1c9   :  { %v4859_v31 = vpop.eup %4858  ;;  %v826_v20 = vpack.c.bf16 %v764_v24, %v760_v8  ;;  %v4665_v15 = vpop.permute.xlu0 %4664 }
 0x1ca   :  { %v1493_v49 = vadd.f32 %v1491_v2, %v1457_v32  ;;  %v1492_v34 = vmul.f32 %v4859_v31, %v1490_v13  ;;  %v2315_v18 = vunpack.c.l.bf16 %v825_v59  ;;  %v2318_v45 = vunpack.c.h.bf16 %v825_v59 }
 0x1cb   :  { %v2316_v30 = vunpack.c.l.bf16 %v826_v20  ;;  %v2319_v57 = vunpack.c.h.bf16 %v826_v20 }
 0x1cc   :  { %4864 = vtanh.f32 %v1493_v49  ;;  %v1494_v1 = vadd.f32 %v1492_v34, %v1460_v9  ;;  %v6139_v35 = vadd.f32 %v2315_v18, %v6004_v61  ;;  %v6142_v0 = vadd.f32 %v2318_v45, %v6004_v61  ;;  %v4861_v9 = vpop.eup %4860 }
 0x1cd   :  { %v6145_v22 = vadd.f32 %v2316_v30, %v6077_v38  ;;  %v6148_v33 = vadd.f32 %v2319_v57, %v6077_v38  ;;  %v768_v32 = vpop.f32.mrb[52].mxu0  ;;  %v4863_v37 = vpop.eup %4862  ;;  %v1497_v31 = vsub.f32 1.0, %v4861_v9  ;;  %v6162_v57 = vunpack.i.l.bf16 %v4665_v15 }
 0x1ce   :  { %7470 = vst [vmem:[#allocation88_spill] sm:$0xff] %v6139_v35  ;;  %7471 = vst [vmem:[#allocation89_spill] sm:$0xff] %v6142_v0  ;;  %4866 = vtanh.f32 %v1494_v1  ;;  %v770_v8 = vpop.f32.mrb[53].mxu0  ;;  %v1502_v5 = vmul.f32 0.0, %v4863_v37  ;;  %v6223_v0 = vld [vmem:[#allocation10 + $0x6c] ss:$24 sps:$4 sm:$0xff]  }
 0x1cf   :  { %7472 = vst [vmem:[#allocation90_spill] sm:$0xff] %v6145_v22  ;;  %7473 = vst [vmem:[#allocation91_spill] sm:$0xff] %v6148_v33  ;;  %v772_v24 = vpop.f32.mrb[54].mxu0  ;;  %v6219_v33 = vld [vmem:[#allocation10 + $0x70] ss:$24 sps:$4 sm:$0xff]  }
 0x1d0   :  { %v831_v17 = vpack.c.bf16 %v772_v24, %v768_v32  ;;  %v774_v20 = vpop.f32.mrb[55].mxu0  ;;  %7478 = vst [vmem:[#allocation96_spill] sm:$0xff] %v6162_v57  ;;  %v1498_v32 = vsub.f32 1.0, %v4863_v37  ;;  %v1501_v24 = vmul.f32 0.0, %v4861_v9 }
 0x1d1   :  { %v832_v40 = vpack.c.bf16 %v774_v20, %v770_v8 }
 0x1d2   :  { %v1967_v36 = vunpack.c.l.bf16 %v831_v17  ;;  %v1970_v18 = vunpack.c.h.bf16 %v831_v17 }
 0x1d3   :  { %v1968_v41 = vunpack.c.l.bf16 %v832_v40  ;;  %v1971_v45 = vunpack.c.h.bf16 %v832_v40  ;;  %v6164_v40 = vunpack.i.h.bf16 %v4665_v15 }
 0x1d4   :  { %v6151_v30 = vadd.f32 %v1967_v36, %v6004_v61  ;;  %v6154_v2 = vadd.f32 %v1970_v18, %v6004_v61 }
 0x1d5   :  { %v6157_v1 = vadd.f32 %v1968_v41, %v6077_v38  ;;  %v6160_v13 = vadd.f32 %v1971_v45, %v6077_v38  ;;  %v778_v59 = vpop.f32.mrb[56].mxu0  ;;  %7479 = vst [vmem:[#allocation97_spill] sm:$0xff] %v6164_v40 }
 0x1d6   :  { %7474 = vst [vmem:[#allocation92_spill] sm:$0xff] %v6151_v30  ;;  %7475 = vst [vmem:[#allocation93_spill] sm:$0xff] %v6154_v2  ;;  %v4865_v49 = vpop.eup %4864  ;;  %v780_v34 = vpop.f32.mrb[57].mxu0 }
 0x1d7   :  { %7476 = vst [vmem:[#allocation94_spill] sm:$0xff] %v6157_v1  ;;  %7477 = vst [vmem:[#allocation95_spill] sm:$0xff] %v6160_v13  ;;  %v1499_v8 = vmul.f32 %v4865_v49, %v1497_v31  ;;  %v782_v17 = vpop.f32.mrb[58].mxu0  ;;  %v1025_v49 = vunpack.c.l.bf16 %v6033_v56 }
 0x1d8   :  { %v4867_v20 = vpop.eup %4866  ;;  %v837_v36 = vpack.c.bf16 %v782_v17, %v778_v59  ;;  %v784_v18 = vpop.f32.mrb[59].mxu0 }
 0x1d9   :  { %v1500_v41 = vmul.f32 %v4867_v20, %v1498_v32  ;;  %v1503_v7 = vadd.f32 %v1501_v24, %v1499_v8  ;;  %v838_v45 = vpack.c.bf16 %v784_v18, %v780_v34  ;;  %v6192_v8 = vld [vmem:[#allocation10 + $0xc] ss:$24 sps:$4 sm:$0xff]   ;;  %v6198_v20 = vld [vmem:[#allocation10 + $0x40] ss:$24 sps:$4 sm:$0xff]   ;;  %v7482_v18 = vmov 0  }
 0x1da   :  { %v1619_v39 = vunpack.c.l.bf16 %v837_v36  ;;  %v1622_v42 = vunpack.c.h.bf16 %v837_v36  ;;  %v6195_v24 = vld [vmem:[#allocation10 + $0x14] ss:$24 sps:$4 sm:$0xff]   ;;  %v1505_v36 = vadd.f32 %v1025_v49, %v5853_v12  ;;  %v6213_v49 = vld [vmem:[#allocation10 + $0x44] ss:$24 sps:$4 sm:$0xff]  }
 0x1db   :  { %v1504_v21 = vadd.f32 %v1502_v5, %v1500_v41  ;;  %v6167_v10 = vmul.f32 %v6162_v57, %v1503_v7  ;;  %v1620_v46 = vunpack.c.l.bf16 %v838_v45  ;;  %v1623_v47 = vunpack.c.h.bf16 %v838_v45 }
 0x1dc   :  { %v6170_v9 = vadd.f32 %v1619_v39, %v6004_v61  ;;  %v6173_v15 = vadd.f32 %v1622_v42, %v6004_v61 }
 0x1dd   :  { %v6176_v59 = vmul.f32 %v6164_v40, %v1504_v21  ;;  %1579 = vst [vmem:[#allocation15] sm:$0xff] %v6167_v10  ;;  %v6180_v37 = vadd.f32 %v1620_v46, %v6077_v38  ;;  %v6183_v5 = vadd.f32 %v1623_v47, %v6077_v38  ;;  %v788_v7 = vpop.f32.mrb[60].mxu0  ;;  %v1028_v46 = vunpack.c.h.bf16 %v6033_v56 }
 0x1de   :  { %v790_v31 = vpop.f32.mrb[61].mxu0 }
 0x1df   :  { %7480 = vst [vmem:[#allocation98_spill] sm:$0xff] %v6180_v37  ;;  %7481 = vst [vmem:[#allocation99_spill] sm:$0xff] %v6183_v5  ;;  %v792_v39 = vpop.f32.mrb[62].mxu0  ;;  %v1624_v42 = vpack.c.bf16 %v6176_v59, %v6167_v10  ;;  %v4670_v5 = vpop.permute.xlu0 %4669 }
 0x1e0   :  { %1580 = vst [vmem:[#allocation15 + $0x8] sm:$0xff] %v6176_v59  ;;  %v843_v21 = vpack.c.bf16 %v792_v39, %v788_v7  ;;  %v794_v34 = vpop.f32.mrb[63].mxu0  ;;  %v1508_v39 = vadd.f32 %v1028_v46, %v5853_v12  ;;  %v6293_v37 = vunpack.i.h.bf16 %v4670_v5 }
 0x1e1   :  { %v6189_v32 = vpack.c.bf16 %v794_v34, %v790_v31  ;;  %1658 = vmatmul.mubr.bf16.vlgmr.msra.gmra.mrb[68].mxu0 %v1624_v42  ;;  %4382 = vmatmul.mubr.bf16.vlgmr.msra.gmra.mrb[44].mxu1 %v1624_v42 }
 0x1e2   :  { %v1026_v47 = vunpack.c.l.bf16 %v843_v21  ;;  %1711 = vmatpush1.bf16.msra.mxu0 %v6192_v8  ;;  %4386 = vmatpush3.bf16.msra.mxu1 %v6195_v24  ;;  %v1029_v17 = vunpack.c.h.bf16 %v843_v21  ;;  %v6210_v21 = vld [vmem:[#allocation10 + $0x3c] ss:$24 sps:$4 sm:$0xff]   ;;  %7483 = vst [vmem:[#allocation100_spill] sm:$0xff] %v6293_v37 }
 0x1e3   :  { %1712 = vmatprep.subr.bf16.mxu0 %v6198_v20  ;;  %4387 = vmatprep.subr.bf16.mxu1 %v7442_v50  ;;  %v1030_v63 = vunpack.c.h.bf16 %v6189_v32 }
 0x1e4   :  { %v1506_v56 = vadd.f32 %v1026_v47, %v6004_v61  ;;  %1742 = vmatprep.mubr.bf16.mxu0 %v7482_v18  ;;  %4401 = vmatprep.mubr.msk.bf16.mxu1 %vm5493_vm2, %v7442_v50  ;;  %v1509_v40 = vadd.f32 %v1029_v17, %v6004_v61  ;;  %v6226_v61 = vld [vmem:[#allocation10 + $0x74] ss:$24 sps:$4 sm:$0xff]   ;;  %v6229_v17 = vld [vmem:[#allocation10 + $0xa0] ss:$24 sps:$4 sm:$0xff]  }
 0x1e5   :  { %v1405_v41 = vpop.f32.mrb[64].mxu0  ;;  %v6207_v45 = vpop.f32.mrb[40].mxu1  ;;  %v1510_v30 = vadd.f32 %v1030_v63, %v6077_v38  ;;  %v6295_v63 = vunpack.i.l.bf16 %v4670_v5  ;;  %v6334_v5 = vld [vmem:[#allocation10 + $0x94] ss:$24 sps:$4 sm:$0xff]  }
 0x1e6   :  { %v1511_v7 = vadd.f32 %v1505_v36, %v1405_v41  ;;  %v1407_v31 = vpop.f32.mrb[65].mxu0  ;;  %v4363_v42 = vpop.f32.mrb[41].mxu1  ;;  %1713 = vmatpush1.bf16.msra.mxu0 %v6210_v21  ;;  %4388 = vmatpush3.bf16.msra.mxu1 %v6213_v49  ;;  %v1539_v48 = vadd.f32 %v6269_v16, %v6207_v45  ;;  %7489 = vst [vmem:[#allocation106_spill] sm:$0xff] %v6334_v5 }
 0x1e7   :  { %v1525_v34 = vadd.f32 %v1506_v56, %v1407_v31  ;;  %v1409_v47 = vpop.f32.mrb[66].mxu0  ;;  %v6217_v57 = vpop.f32.mrb[42].mxu1  ;;  %1714 = vmatprep.subr.bf16.mxu0 %v6219_v33  ;;  %4389 = vmatprep.subr.bf16.mxu1 %v7442_v50  ;;  %7484 = vst [vmem:[#allocation101_spill] sm:$0xff] %v6295_v63 }
 0x1e8   :  { %v4105_v12 = vmul.f32 -1.442695, %v1511_v7  ;;  %v1512_v46 = vadd.f32 %v1508_v39, %v1409_v47  ;;  %v1411_v36 = vpop.f32.mrb[67].mxu0  ;;  %v4364_v41 = vpop.f32.mrb[43].mxu1  ;;  %v6233_v7 = vld [vmem:[#allocation10 + $0x9c] ss:$24 sps:$4 sm:$0xff]   ;;  %v1540_v2 = vadd.f32 %v6269_v16, %v6217_v57 }
 0x1e9   :  { %v1526_v42 = vadd.f32 %v1509_v40, %v1411_v36  ;;  %v4107_v56 = vmul.f32 -1.442695, %v1525_v34  ;;  %v6236_v40 = vld [vmem:[#allocation10 + $0xa4] ss:$24 sps:$4 sm:$0xff]   ;;  %v6239_v39 = vld [vmem:[#allocation10 + $0xd0] ss:$24 sps:$4 sm:$0xff]  }
 0x1ea   :  { %4868 = vpow2.f32 %v4105_v12  ;;  %v4106_v22 = vmul.f32 -1.442695, %v1512_v46  ;;  %1715 = vmatpush1.bf16.msra.mxu0 %v6223_v0  ;;  %4390 = vmatpush3.bf16.msra.mxu1 %v6226_v61  ;;  %v6243_v47 = vld [vmem:[#allocation10 + $0xcc] ss:$24 sps:$4 sm:$0xff]   ;;  %v6249_v34 = vld [vmem:[#allocation10 + $0x100] ss:$24 sps:$4 sm:$0xff]  }
 0x1eb   :  { %1716 = vmatprep.subr.bf16.mxu0 %v6229_v17  ;;  %4391 = vmatprep.subr.bf16.mxu1 %v7442_v50  ;;  %v4108_v31 = vmul.f32 -1.442695, %v1526_v42  ;;  %v6253_v41 = vld [vmem:[#allocation10 + $0xfc] ss:$24 sps:$4 sm:$0xff]  }
 0x1ec   :  { %4870 = vpow2.f32 %v4106_v22  ;;  %v6246_v22 = vld [vmem:[#allocation10 + $0xd4] ss:$24 sps:$4 sm:$0xff]   ;;  %v6256_v42 = vld [vmem:[#allocation10 + $0x104] ss:$24 sps:$4 sm:$0xff]  }
 0x1ed   :  { %4872 = vpow2.f32 %v4107_v56 }
 0x1ee   :  { %1717 = vmatpush1.bf16.msra.mxu0 %v6233_v7  ;;  %4392 = vmatpush3.bf16.msra.mxu1 %v6236_v40  ;;  %4874 = vpow2.f32 %v4108_v31  ;;  %v6259_v31 = vld [vmem:[#allocation10 + $0x130] ss:$24 sps:$4 sm:$0xff]  }
 0x1ef   :  { %1718 = vmatprep.subr.bf16.mxu0 %v6239_v39  ;;  %4393 = vmatprep.subr.bf16.mxu1 %v7442_v50 }
 0x1f2   :  { %1719 = vmatpush1.bf16.msra.mxu0 %v6243_v47  ;;  %4394 = vmatpush3.bf16.msra.mxu1 %v6246_v22 }
 0x1f3   :  { %1720 = vmatprep.subr.bf16.mxu0 %v6249_v34  ;;  %4395 = vmatprep.subr.bf16.mxu1 %v7442_v50 }
 0x1f4   :  { %v4869_v12 = vpop.eup %4868 }
 0x1f5   :  { %v1519_v46 = vadd.f32 1.0, %v4869_v12  ;;  %v6266_v12 = vld [vmem:[#allocation10 + $0x134] ss:$24 sps:$4 sm:$0xff]  }
 0x1f6   :  { %v4871_v36 = vpop.eup %4870  ;;  %1721 = vmatpush1.bf16.msra.mxu0 %v6253_v41  ;;  %4396 = vmatpush3.bf16.msra.mxu1 %v6256_v42 }
 0x1f7   :  { %4876 = vrcp.f32 %v1519_v46  ;;  %v1520_v56 = vadd.f32 1.0, %v4871_v36  ;;  %1722 = vmatprep.subr.bf16.mxu0 %v6259_v31  ;;  %4397 = vmatprep.subr.bf16.mxu1 %v7442_v50  ;;  %v4873_v35 = vpop.eup %4872  ;;  %v6271_v46 = vld [vmem:[#allocation10 + $0x160] ss:$24 sps:$4 sm:$0xff]  }
 0x1f8   :  { %v4875_v36 = vpop.eup %4874  ;;  %v1533_v54 = vadd.f32 1.0, %v4873_v35 }
 0x1f9   :  { %4878 = vrcp.f32 %v1520_v56  ;;  %v1027_v56 = vunpack.c.l.bf16 %v6189_v32  ;;  %v1534_v35 = vadd.f32 1.0, %v4875_v36 }
 0x1fa   :  { %1723 = vmatpush1.bf16.msra.mxu0 %v6263_v25  ;;  %4398 = vmatpush3.bf16.msra.mxu1 %v6266_v12  ;;  %4880 = vrcp.f32 %v1533_v54 }
 0x1fb   :  { %1724 = vmatprep.subr.bf16.mxu0 %v6271_v46  ;;  %4399 = vmatprep.subr.bf16.mxu1 %v7442_v50  ;;  %v1507_v45 = vadd.f32 %v1027_v56, %v6077_v38  ;;  %4882 = vrcp.f32 %v1534_v35  ;;  %v6321_v38 = vld [vmem:[#allocation10 + $0x38] ss:$24 sps:$4 sm:$0xff]  }
 0x1fc   :  { %v6338_v35 = vld [vmem:[#allocation10 + $0x90] ss:$24 sps:$4 sm:$0xff]  }
 0x1fd   :  { %7490 = vst [vmem:[#allocation107_spill] sm:$0xff] %v6338_v35 }
 0x1fe   :  { %1725 = vmatpush1.bf16.msra.mxu0 %v6278_v14  ;;  %4400 = vmatpush3.bf16.msra.mxu1 %v6281_v6 }
 0x1ff   :  { %1973 = vmatprep.subr.bf16.mxu0 %v6284_v3  ;;  %4405 = vmatprep.subr.bf16.mxu1 %v7442_v50 }
 0x201   :  { %v4877_v13 = vpop.eup %4876 }
 0x202   :  { %v1541_v1 = vmul.f32 %v4877_v13, %v1539_v48 }
 0x203   :  { %v4879_v44 = vpop.eup %4878 }
 0x204   :  { %v1543_v43 = vadd.f32 %v1541_v1, %v1507_v45  ;;  %v1542_v23 = vmul.f32 %v4879_v44, %v1540_v2  ;;  %v4881_v29 = vpop.eup %4880  ;;  %v6328_v2 = vld [vmem:[#allocation10 + $0x60] ss:$24 sps:$4 sm:$0xff]  }
 0x205   :  { %v4883_v32 = vpop.eup %4882  ;;  %v1547_v36 = vsub.f32 1.0, %v4881_v29  ;;  %v1551_v27 = vmul.f32 0.0, %v4881_v29  ;;  %7487 = vst [vmem:[#allocation104_spill] sm:$0xff] %v6328_v2  ;;  %v6331_v1 = vld [vmem:[#allocation10 + $0x68] ss:$24 sps:$4 sm:$0xff]  }
 0x206   :  { %4884 = vtanh.f32 %v1543_v43  ;;  %v1544_v19 = vadd.f32 %v1542_v23, %v1510_v30  ;;  %v1548_v56 = vsub.f32 1.0, %v4883_v32  ;;  %v1552_v13 = vmul.f32 0.0, %v4883_v32  ;;  %v6311_v43 = vld [vmem:[#allocation10 + $0x34] ss:$24 sps:$4 sm:$0xff]   ;;  %v6324_v30 = vld [vmem:[#allocation10 + $0x64] ss:$24 sps:$4 sm:$0xff]  }
 0x207   :  { %7488 = vst [vmem:[#allocation105_spill] sm:$0xff] %v6331_v1  ;;  %v6341_v45 = vld [vmem:[#allocation10 + $0x98] ss:$24 sps:$4 sm:$0xff]   ;;  %v6344_v32 = vld [vmem:[#allocation10 + $0xc4] ss:$24 sps:$4 sm:$0xff]  }
 0x208   :  { %4886 = vtanh.f32 %v1544_v19  ;;  %7491 = vst [vmem:[#allocation108_spill] sm:$0xff] %v6341_v45  ;;  %7492 = vst [vmem:[#allocation109_spill] sm:$0xff] %v6344_v32 }
 0x210   :  { %v4885_v28 = vpop.eup %4884 }
 0x211   :  { %v1549_v54 = vmul.f32 %v4885_v28, %v1547_v36  ;;  %v6305_v28 = vld [vmem:[#allocation10] ss:$24 sps:$4 sm:$0xff]  }
 0x212   :  { %v4887_v48 = vpop.eup %4886  ;;  %v6348_v36 = vld [vmem:[#allocation10 + $0xc0] ss:$24 sps:$4 sm:$0xff]  }
 0x213   :  { %v1553_v26 = vadd.f32 %v1551_v27, %v1549_v54  ;;  %v1550_v57 = vmul.f32 %v4887_v48, %v1548_v56  ;;  %v6308_v27 = vld [vmem:[#allocation10 + $0x8] ss:$24 sps:$4 sm:$0xff]   ;;  %7493 = vst [vmem:[#allocation110_spill] sm:$0xff] %v6348_v36  ;;  %v6354_v54 = vld [vmem:[#allocation10 + $0xf4] ss:$24 sps:$4 sm:$0xff]  }
 0x214   :  { %v6351_v56 = vld [vmem:[#allocation10 + $0xc8] ss:$24 sps:$4 sm:$0xff]   ;;  %7495 = vst [vmem:[#allocation112_spill] sm:$0xff] %v6354_v54 }
 0x215   :  { %v1554_v44 = vadd.f32 %v1552_v13, %v1550_v57  ;;  %v6298_v23 = vmul.f32 %v6295_v63, %v1553_v26  ;;  %v6318_v26 = vld [vmem:[#allocation10 + $0x30] ss:$24 sps:$4 sm:$0xff]   ;;  %7494 = vst [vmem:[#allocation111_spill] sm:$0xff] %v6351_v56  ;;  %v6364_v57 = vld [vmem:[#allocation10 + $0x124] ss:$24 sps:$4 sm:$0xff]  }
 0x216   :  { %v6358_v48 = vld [vmem:[#allocation10 + $0xf0] ss:$24 sps:$4 sm:$0xff]   ;;  %7498 = vst [vmem:[#allocation115_spill] sm:$0xff] %v6364_v57 }
 0x217   :  { %7485 = vst [vmem:[#allocation102_spill] sm:$0xff] %v6298_v23  ;;  %v6301_v19 = vmul.f32 %v6293_v37, %v1554_v44  ;;  %7496 = vst [vmem:[#allocation113_spill] sm:$0xff] %v6358_v48  ;;  %v6361_v13 = vld [vmem:[#allocation10 + $0xf8] ss:$24 sps:$4 sm:$0xff]   ;;  %v6374_v37 = vld [vmem:[#allocation10 + $0x154] ss:$24 sps:$4 sm:$0xff]  }
 0x218   :  { %7497 = vst [vmem:[#allocation114_spill] sm:$0xff] %v6361_v13  ;;  %v6368_v44 = vld [vmem:[#allocation10 + $0x120] ss:$24 sps:$4 sm:$0xff]   ;;  %7501 = vst [vmem:[#allocation118_spill] sm:$0xff] %v6374_v37  ;;  %v6378_v63 = vld [vmem:[#allocation10 + $0x150] ss:$24 sps:$4 sm:$0xff]  }
 0x219   :  { %7486 = vst [vmem:[#allocation103_spill] sm:$0xff] %v6301_v19  ;;  %v1709_v29 = vpack.c.bf16 %v6301_v19, %v6298_v23  ;;  %7499 = vst [vmem:[#allocation116_spill] sm:$0xff] %v6368_v44 }
 0x21a   :  { %7502 = vst [vmem:[#allocation119_spill] sm:$0xff] %v6378_v63 }
 0x21b   :  { %1743 = vmatmul.mubr.bf16.vlgmr.msra.gmra.mrb[72].mxu0 %v1709_v29  ;;  %4402 = vmatmul.mubr.bf16.vlgmr.msra.gmra.mrb[48].mxu1 %v1709_v29  ;;  %v6371_v29 = vld [vmem:[#allocation10 + $0x128] ss:$24 sps:$4 sm:$0xff]  }
 0x21c   :  { %1974 = vmatpush1.bf16.msra.mxu0 %v6305_v28  ;;  %4406 = vmatpush3.bf16.msra.mxu1 %v6308_v27  ;;  %7500 = vst [vmem:[#allocation117_spill] sm:$0xff] %v6371_v29 }
 0x21d   :  { %1975 = vmatprep.subr.bf16.mxu0 %v6311_v43  ;;  %4407 = vmatprep.subr.bf16.mxu1 %v7442_v50 }
 0x21e   :  { %2005 = vmatprep.mubr.bf16.mxu0 %v7482_v18  ;;  %4421 = vmatprep.mubr.msk.bf16.mxu1 %vm5493_vm2, %v7442_v50 }
 0x220   :  { %1976 = vmatpush1.bf16.msra.mxu0 %v6318_v26  ;;  %4408 = vmatpush3.bf16.msra.mxu1 %v6321_v38 }
 0x221   :  { %1977 = vmatprep.subr.bf16.mxu0 %v6324_v30  ;;  %4409 = vmatprep.subr.bf16.mxu1 %v7442_v50 }
 0x224   :  { %1978 = vmatpush1.bf16.msra.mxu0 %v6328_v2  ;;  %4410 = vmatpush3.bf16.msra.mxu1 %v6331_v1 }
 0x225   :  { %1979 = vmatprep.subr.bf16.mxu0 %v6334_v5  ;;  %4411 = vmatprep.subr.bf16.mxu1 %v7442_v50 }
 0x228   :  { %1980 = vmatpush1.bf16.msra.mxu0 %v6338_v35  ;;  %4412 = vmatpush3.bf16.msra.mxu1 %v6341_v45 }
 0x229   :  { %1981 = vmatprep.subr.bf16.mxu0 %v6344_v32  ;;  %4413 = vmatprep.subr.bf16.mxu1 %v7442_v50 }
 0x22c   :  { %1982 = vmatpush1.bf16.msra.mxu0 %v6348_v36  ;;  %4414 = vmatpush3.bf16.msra.mxu1 %v6351_v56 }
 0x22d   :  { %1983 = vmatprep.subr.bf16.mxu0 %v6354_v54  ;;  %4415 = vmatprep.subr.bf16.mxu1 %v7442_v50 }
 0x230   :  { %1984 = vmatpush1.bf16.msra.mxu0 %v6358_v48  ;;  %4416 = vmatpush3.bf16.msra.mxu1 %v6361_v13  ;;  %v6384_v13 = vld [vmem:[#allocation10 + $0x10] ss:$24 sps:$4 sm:$0xff]  }
 0x231   :  { %1985 = vmatprep.subr.bf16.mxu0 %v6364_v57  ;;  %4417 = vmatprep.subr.bf16.mxu1 %v7442_v50  ;;  %v6381_v57 = vld [vmem:[#allocation10 + $0x158] ss:$24 sps:$4 sm:$0xff]   ;;  %7504 = vst [vmem:[#allocation121_spill] sm:$0xff] %v6384_v13 }
 0x232   :  { %7503 = vst [vmem:[#allocation120_spill] sm:$0xff] %v6381_v57 }
 0x234   :  { %1986 = vmatpush1.bf16.msra.mxu0 %v6368_v44  ;;  %4418 = vmatpush3.bf16.msra.mxu1 %v6371_v29 }
 0x235   :  { %1987 = vmatprep.subr.bf16.mxu0 %v6374_v37  ;;  %4419 = vmatprep.subr.bf16.mxu1 %v7442_v50 }
 0x238   :  { %1988 = vmatpush1.bf16.msra.mxu0 %v6378_v63  ;;  %4420 = vmatpush3.bf16.msra.mxu1 %v6381_v57 }
 0x239   :  { %2058 = vmatprep.subr.bf16.mxu0 %v6384_v13  ;;  %4425 = vmatprep.subr.bf16.mxu1 %v7442_v50 }
 0x2b4   :  { %v1659_v29 = vpop.f32.mrb[68].mxu0  ;;  %v1702_v44 = vpop.f32.mrb[44].mxu1 }
 0x2b5   :  { %v1800_v37 = vadd.f32 %v5880_v55, %v1659_v29  ;;  %v1661_v48 = vpop.f32.mrb[69].mxu0  ;;  %v4383_v54 = vpop.f32.mrb[45].mxu1 }
 0x2b6   :  { %v1814_v56 = vadd.f32 %v5886_v60, %v1661_v48  ;;  %v1663_v36 = vpop.f32.mrb[70].mxu0  ;;  %v1705_v63 = vpop.f32.mrb[46].mxu1 }
 0x2b7   :  { %v4113_v32 = vmul.f32 -1.442695, %v1800_v37  ;;  %v1801_v45 = vadd.f32 %v5883_v58, %v1663_v36  ;;  %v1665_v57 = vpop.f32.mrb[71].mxu0  ;;  %v4384_v35 = vpop.f32.mrb[47].mxu1 }
 0x2b8   :  { %v1815_v5 = vadd.f32 %v5889_v62, %v1665_v57  ;;  %v4115_v1 = vmul.f32 -1.442695, %v1814_v56  ;;  %v1828_v35 = vadd.f32 %v6119_v51, %v1702_v44 }
 0x2b9   :  { %4888 = vpow2.f32 %v4113_v32  ;;  %v4114_v13 = vmul.f32 -1.442695, %v1801_v45  ;;  %v1829_v45 = vadd.f32 %v6119_v51, %v1705_v63 }
 0x2ba   :  { %v4116_v2 = vmul.f32 -1.442695, %v1815_v5 }
 0x2bb   :  { %4890 = vpow2.f32 %v4114_v13 }
 0x2bc   :  { %4892 = vpow2.f32 %v4115_v1 }
 0x2bd   :  { %4894 = vpow2.f32 %v4116_v2 }
 0x2c3   :  { %v4889_v55 = vpop.eup %4888 }
 0x2c4   :  { %v1808_v54 = vadd.f32 1.0, %v4889_v55  ;;  %v4676_v55 = vpop.permute.xlu1 %4675 }
 0x2c5   :  { %v4891_v29 = vpop.eup %4890 }
 0x2c6   :  { %4896 = vrcp.f32 %v1808_v54  ;;  %v1809_v60 = vadd.f32 1.0, %v4891_v29  ;;  %v4893_v37 = vpop.eup %4892  ;;  %v6396_v29 = vunpack.i.l.bf16 %v4676_v55 }
 0x2c7   :  { %v4895_v48 = vpop.eup %4894  ;;  %v1822_v58 = vadd.f32 1.0, %v4893_v37 }
 0x2c8   :  { %4898 = vrcp.f32 %v1809_v60  ;;  %v1823_v36 = vadd.f32 1.0, %v4895_v48  ;;  %7505 = vst [vmem:[#allocation122_spill] sm:$0xff] %v6396_v29 }
 0x2c9   :  { %4900 = vrcp.f32 %v1822_v58  ;;  %v6399_v58 = vunpack.i.h.bf16 %v4676_v55 }
 0x2ca   :  { %4902 = vrcp.f32 %v1823_v36 }
 0x2cb   :  { %7506 = vst [vmem:[#allocation123_spill] sm:$0xff] %v6399_v58 }
 0x2d0   :  { %v4897_v62 = vpop.eup %4896 }
 0x2d1   :  { %v1830_v32 = vmul.f32 %v4897_v62, %v1828_v35 }
 0x2d2   :  { %v4899_v5 = vpop.eup %4898 }
 0x2d3   :  { %v1832_v2 = vadd.f32 %v1830_v32, %v5874_v52  ;;  %v1831_v1 = vmul.f32 %v4899_v5, %v1829_v45  ;;  %v4901_v13 = vpop.eup %4900 }
 0x2d4   :  { %v4903_v57 = vpop.eup %4902  ;;  %v1836_v54 = vsub.f32 1.0, %v4901_v13  ;;  %v1840_v63 = vmul.f32 %v4901_v13, %v6167_v10 }
 0x2d5   :  { %4904 = vtanh.f32 %v1832_v2  ;;  %v1833_v56 = vadd.f32 %v1831_v1, %v5877_v53  ;;  %v1837_v60 = vsub.f32 1.0, %v4903_v57  ;;  %v1841_v35 = vmul.f32 %v4903_v57, %v6176_v59 }
 0x2d7   :  { %4906 = vtanh.f32 %v1833_v56 }
 0x2df   :  { %v4905_v44 = vpop.eup %4904 }
 0x2e0   :  { %v1838_v37 = vmul.f32 %v4905_v44, %v1836_v54 }
 0x2e1   :  { %v4907_v48 = vpop.eup %4906 }
 0x2e2   :  { %v1839_v52 = vmul.f32 %v4907_v48, %v1837_v60  ;;  %v1842_v36 = vadd.f32 %v1840_v63, %v1838_v37 }
 0x2e4   :  { %v1843_v53 = vadd.f32 %v1841_v35, %v1839_v52  ;;  %v1916_v62 = vmul.f32 %v6396_v29, %v1842_v36  ;;  %v1936_v32 = vsub.f32 %v1842_v36, %v6167_v10 }
 0x2e6   :  { %v1917_v45 = vmul.f32 %v6399_v58, %v1843_v53  ;;  %1919 = vst [vmem:[#allocation15 + $0x10] sm:$0xff] %v1916_v62  ;;  %v1937_v5 = vsub.f32 %v1843_v53, %v6176_v59  ;;  %v1938_v2 = vmul.f32 %v6396_v29, %v1936_v32 }
 0x2e8   :  { %1920 = vst [vmem:[#allocation15 + $0x18] sm:$0xff] %v1917_v45  ;;  %v1939_v1 = vmul.f32 %v6399_v58, %v1937_v5  ;;  %v6409_v56 = vadd.f32 %v1938_v2, %v6167_v10  ;;  %v7531_v58 = vld [vmem:[#allocation30_spill] sm:$0xff] }
 0x2ea   :  { %v6412_v13 = vadd.f32 %v1939_v1, %v6176_v59 }
 0x2ec   :  { %v1972_v57 = vpack.c.bf16 %v6412_v13, %v6409_v56 }
 0x2ee   :  { %2006 = vmatmul.mubr.bf16.vlgmr.msra.gmra.mrb[76].mxu0 %v1972_v57  ;;  %4422 = vmatmul.mubr.bf16.vlgmr.msra.gmra.mrb[52].mxu1 %v1972_v57  ;;  %v1744_v55 = vpop.f32.mrb[72].mxu0  ;;  %v1787_v54 = vpop.f32.mrb[48].mxu1 }
 0x2ef   :  { %v1850_v44 = vadd.f32 %v6046_v11, %v1744_v55  ;;  %v1746_v60 = vpop.f32.mrb[73].mxu0  ;;  %v4403_v37 = vpop.f32.mrb[49].mxu1  ;;  %2059 = vmatpush1.bf16.msra.mxu0 %v6192_v8  ;;  %4426 = vmatpush3.bf16.msra.mxu1 %v6195_v24  ;;  %v1878_v57 = vadd.f32 %v6269_v16, %v1787_v54  ;;  %v7508_v54 = vld [vmem:[#allocation99_spill] sm:$0xff] }
 0x2f0   :  { %v1864_v10 = vadd.f32 %v6170_v9, %v1746_v60  ;;  %v1748_v63 = vpop.f32.mrb[74].mxu0  ;;  %v1790_v59 = vpop.f32.mrb[50].mxu1  ;;  %2060 = vmatprep.subr.bf16.mxu0 %v6198_v20  ;;  %4427 = vmatprep.subr.bf16.mxu1 %v7442_v50 }
 0x2f1   :  { %v4117_v48 = vmul.f32 -1.442695, %v1850_v44  ;;  %v1851_v52 = vadd.f32 %v6050_v4, %v1748_v63  ;;  %v1750_v35 = vpop.f32.mrb[75].mxu0  ;;  %v4404_v36 = vpop.f32.mrb[51].mxu1  ;;  %2090 = vmatprep.mubr.bf16.mxu0 %v7482_v18  ;;  %4441 = vmatprep.mubr.msk.bf16.mxu1 %vm5493_vm2, %v7442_v50  ;;  %v1879_v37 = vadd.f32 %v6269_v16, %v1790_v59  ;;  %v7507_v63 = vld [vmem:[#allocation98_spill] sm:$0xff] }
 0x2f2   :  { %v1865_v11 = vadd.f32 %v6173_v15, %v1750_v35  ;;  %v4119_v4 = vmul.f32 -1.442695, %v1864_v10 }
 0x2f3   :  { %4908 = vpow2.f32 %v4117_v48  ;;  %v4118_v9 = vmul.f32 -1.442695, %v1851_v52  ;;  %2061 = vmatpush1.bf16.msra.mxu0 %v6210_v21  ;;  %4428 = vmatpush3.bf16.msra.mxu1 %v6213_v49 }
 0x2f4   :  { %2062 = vmatprep.subr.bf16.mxu0 %v6219_v33  ;;  %4429 = vmatprep.subr.bf16.mxu1 %v7442_v50  ;;  %v4120_v53 = vmul.f32 -1.442695, %v1865_v11 }
 0x2f5   :  { %4910 = vpow2.f32 %v4118_v9 }
 0x2f6   :  { %4912 = vpow2.f32 %v4119_v4 }
 0x2f7   :  { %2063 = vmatpush1.bf16.msra.mxu0 %v6223_v0  ;;  %4430 = vmatpush3.bf16.msra.mxu1 %v6226_v61  ;;  %4914 = vpow2.f32 %v4120_v53 }
 0x2f8   :  { %2064 = vmatprep.subr.bf16.mxu0 %v6229_v17  ;;  %4431 = vmatprep.subr.bf16.mxu1 %v7442_v50 }
 0x2fb   :  { %2065 = vmatpush1.bf16.msra.mxu0 %v6233_v7  ;;  %4432 = vmatpush3.bf16.msra.mxu1 %v6236_v40 }
 0x2fc   :  { %2066 = vmatprep.subr.bf16.mxu0 %v6239_v39  ;;  %4433 = vmatprep.subr.bf16.mxu1 %v7442_v50 }
 0x2fd   :  { %v4909_v15 = vpop.eup %4908 }
 0x2fe   :  { %v1858_v62 = vadd.f32 1.0, %v4909_v15 }
 0x2ff   :  { %v4911_v32 = vpop.eup %4910  ;;  %2067 = vmatpush1.bf16.msra.mxu0 %v6243_v47  ;;  %4434 = vmatpush3.bf16.msra.mxu1 %v6246_v22 }
 0x300   :  { %4916 = vrcp.f32 %v1858_v62  ;;  %v1859_v45 = vadd.f32 1.0, %v4911_v32  ;;  %2068 = vmatprep.subr.bf16.mxu0 %v6249_v34  ;;  %4435 = vmatprep.subr.bf16.mxu1 %v7442_v50  ;;  %v4913_v5 = vpop.eup %4912 }
 0x301   :  { %v4915_v2 = vpop.eup %4914  ;;  %v1872_v1 = vadd.f32 1.0, %v4913_v5 }
 0x302   :  { %4918 = vrcp.f32 %v1859_v45  ;;  %v1873_v55 = vadd.f32 1.0, %v4915_v2  ;;  %v4681_v2 = vpop.permute.xlu1 %4680 }
 0x303   :  { %2069 = vmatpush1.bf16.msra.mxu0 %v6253_v41  ;;  %4436 = vmatpush3.bf16.msra.mxu1 %v6256_v42  ;;  %4920 = vrcp.f32 %v1872_v1  ;;  %v6463_v1 = vunpack.i.l.bf16 %v4681_v2 }
 0x304   :  { %2070 = vmatprep.subr.bf16.mxu0 %v6259_v31  ;;  %4437 = vmatprep.subr.bf16.mxu1 %v7442_v50  ;;  %4922 = vrcp.f32 %v1873_v55 }
 0x305   :  { %7510 = vst [vmem:[#allocation99_spill] sm:$0xff] %v6463_v1 }
 0x307   :  { %2071 = vmatpush1.bf16.msra.mxu0 %v6263_v25  ;;  %4438 = vmatpush3.bf16.msra.mxu1 %v6266_v12 }
 0x308   :  { %2072 = vmatprep.subr.bf16.mxu0 %v6271_v46  ;;  %4439 = vmatprep.subr.bf16.mxu1 %v7442_v50 }
 0x30a   :  { %v4917_v44 = vpop.eup %4916 }
 0x30b   :  { %v1880_v60 = vmul.f32 %v4917_v44, %v1878_v57  ;;  %2073 = vmatpush1.bf16.msra.mxu0 %v6278_v14  ;;  %4440 = vmatpush3.bf16.msra.mxu1 %v6281_v6  ;;  %v6469_v44 = vunpack.i.h.bf16 %v4681_v2  ;;  %v7525_v2 = vld [vmem:[#allocation116_spill] sm:$0xff] }
 0x30c   :  { %v4919_v10 = vpop.eup %4918  ;;  %2321 = vmatprep.subr.bf16.mxu0 %v6284_v3  ;;  %4445 = vmatprep.subr.bf16.mxu1 %v7442_v50 }
 0x30d   :  { %v1882_v48 = vadd.f32 %v1880_v60, %v7507_v63  ;;  %v1881_v52 = vmul.f32 %v4919_v10, %v1879_v37  ;;  %v4921_v36 = vpop.eup %4920  ;;  %7512 = vst [vmem:[#allocation125_spill] sm:$0xff] %v6469_v44 }
 0x30e   :  { %v4923_v11 = vpop.eup %4922  ;;  %v1886_v59 = vsub.f32 1.0, %v4921_v36  ;;  %v1890_v15 = vmul.f32 %v4921_v36, %v6298_v23  ;;  %v7515_v36 = vld [vmem:[#allocation106_spill] sm:$0xff] }
 0x30f   :  { %4924 = vtanh.f32 %v1882_v48  ;;  %v1883_v35 = vadd.f32 %v1881_v52, %v7508_v54  ;;  %v1887_v4 = vsub.f32 1.0, %v4923_v11  ;;  %v1891_v45 = vmul.f32 %v4923_v11, %v6301_v19  ;;  %v7513_v54 = vld [vmem:[#allocation104_spill] sm:$0xff]  ;;  %v7516_v11 = vld [vmem:[#allocation107_spill] sm:$0xff] }
 0x311   :  { %4926 = vtanh.f32 %v1883_v35  ;;  %v7514_v35 = vld [vmem:[#allocation105_spill] sm:$0xff] }
 0x319   :  { %v4925_v9 = vpop.eup %4924 }
 0x31a   :  { %v1888_v53 = vmul.f32 %v4925_v9, %v1886_v59  ;;  %v7517_v59 = vld [vmem:[#allocation108_spill] sm:$0xff]  ;;  %v7518_v9 = vld [vmem:[#allocation109_spill] sm:$0xff] }
 0x31b   :  { %v4927_v62 = vpop.eup %4926 }
 0x31c   :  { %v1889_v32 = vmul.f32 %v4927_v62, %v1887_v4  ;;  %v6461_v5 = vadd.f32 %v1890_v15, %v1888_v53  ;;  %v7519_v4 = vld [vmem:[#allocation110_spill] sm:$0xff]  ;;  %v7520_v53 = vld [vmem:[#allocation111_spill] sm:$0xff]  ;;  %v7521_v15 = vld [vmem:[#allocation112_spill] sm:$0xff] }
 0x31d   :  { %v7522_v62 = vld [vmem:[#allocation113_spill] sm:$0xff] }
 0x31e   :  { %7509 = vst [vmem:[#allocation98_spill] sm:$0xff] %v6461_v5  ;;  %v6465_v57 = vadd.f32 %v1891_v45, %v1889_v32  ;;  %v1942_v55 = vsub.f32 %v6461_v5, %v6298_v23  ;;  %v7523_v32 = vld [vmem:[#allocation114_spill] sm:$0xff]  ;;  %v7524_v45 = vld [vmem:[#allocation115_spill] sm:$0xff] }
 0x320   :  { %7511 = vst [vmem:[#allocation124_spill] sm:$0xff] %v6465_v57  ;;  %v1943_v60 = vsub.f32 %v6465_v57, %v6301_v19  ;;  %v1944_v37 = vmul.f32 %v6463_v1, %v1942_v55  ;;  %v7526_v55 = vld [vmem:[#allocation117_spill] sm:$0xff]  ;;  %v7532_v1 = vld [vmem:[#allocation31_spill] sm:$0xff] }
 0x322   :  { %v1945_v10 = vmul.f32 %v6469_v44, %v1943_v60  ;;  %v6476_v63 = vadd.f32 %v1944_v37, %v6298_v23  ;;  %v7527_v60 = vld [vmem:[#allocation118_spill] sm:$0xff]  ;;  %v7528_v37 = vld [vmem:[#allocation119_spill] sm:$0xff] }
 0x324   :  { %v6479_v48 = vadd.f32 %v1945_v10, %v6301_v19  ;;  %v7529_v10 = vld [vmem:[#allocation120_spill] sm:$0xff] }
 0x326   :  { %v2057_v52 = vpack.c.bf16 %v6479_v48, %v6476_v63 }
 0x328   :  { %2091 = vmatmul.mubr.bf16.vlgmr.msra.gmra.mrb[80].mxu0 %v2057_v52  ;;  %4442 = vmatmul.mubr.bf16.vlgmr.msra.gmra.mrb[56].mxu1 %v2057_v52  ;;  %v7530_v52 = vld [vmem:[#allocation121_spill] sm:$0xff] }
 0x329   :  { %2322 = vmatpush1.bf16.msra.mxu0 %v6305_v28  ;;  %4446 = vmatpush3.bf16.msra.mxu1 %v6308_v27 }
 0x32a   :  { %2323 = vmatprep.subr.bf16.mxu0 %v6311_v43  ;;  %4447 = vmatprep.subr.bf16.mxu1 %v7442_v50 }
 0x32b   :  { %2353 = vmatprep.mubr.bf16.mxu0 %v7482_v18  ;;  %4461 = vmatprep.mubr.msk.bf16.mxu1 %vm5493_vm2, %v7442_v50 }
 0x32d   :  { %2324 = vmatpush1.bf16.msra.mxu0 %v6318_v26  ;;  %4448 = vmatpush3.bf16.msra.mxu1 %v6321_v38 }
 0x32e   :  { %2325 = vmatprep.subr.bf16.mxu0 %v6324_v30  ;;  %4449 = vmatprep.subr.bf16.mxu1 %v7442_v50 }
 0x331   :  { %2326 = vmatpush1.bf16.msra.mxu0 %v7513_v54  ;;  %4450 = vmatpush3.bf16.msra.mxu1 %v7514_v35 }
 0x332   :  { %2327 = vmatprep.subr.bf16.mxu0 %v7515_v36  ;;  %4451 = vmatprep.subr.bf16.mxu1 %v7442_v50 }
 0x335   :  { %2328 = vmatpush1.bf16.msra.mxu0 %v7516_v11  ;;  %4452 = vmatpush3.bf16.msra.mxu1 %v7517_v59 }
 0x336   :  { %2329 = vmatprep.subr.bf16.mxu0 %v7518_v9  ;;  %4453 = vmatprep.subr.bf16.mxu1 %v7442_v50 }
 0x339   :  { %2330 = vmatpush1.bf16.msra.mxu0 %v7519_v4  ;;  %4454 = vmatpush3.bf16.msra.mxu1 %v7520_v53 }
 0x33a   :  { %2331 = vmatprep.subr.bf16.mxu0 %v7521_v15  ;;  %4455 = vmatprep.subr.bf16.mxu1 %v7442_v50 }
 0x33d   :  { %2332 = vmatpush1.bf16.msra.mxu0 %v7522_v62  ;;  %4456 = vmatpush3.bf16.msra.mxu1 %v7523_v32 }
 0x33e   :  { %2333 = vmatprep.subr.bf16.mxu0 %v7524_v45  ;;  %4457 = vmatprep.subr.bf16.mxu1 %v7442_v50  ;;  %v7533_v45 = vld [vmem:[#allocation32_spill] sm:$0xff] }
 0x341   :  { %2334 = vmatpush1.bf16.msra.mxu0 %v7525_v2  ;;  %4458 = vmatpush3.bf16.msra.mxu1 %v7526_v55 }
 0x342   :  { %2335 = vmatprep.subr.bf16.mxu0 %v7527_v60  ;;  %4459 = vmatprep.subr.bf16.mxu1 %v7442_v50 }
 0x345   :  { %2336 = vmatpush1.bf16.msra.mxu0 %v7528_v37  ;;  %4460 = vmatpush3.bf16.msra.mxu1 %v7529_v10  ;;  %v7534_v10 = vld [vmem:[#allocation33_spill] sm:$0xff] }
 0x346   :  { %2406 = vmatprep.subr.bf16.mxu0 %v7530_v52  ;;  %4465 = vmatprep.subr.bf16.mxu1 %v7442_v50 }
 0x3c1   :  { %v2007_v19 = vpop.f32.mrb[76].mxu0  ;;  %v2050_v23 = vpop.f32.mrb[52].mxu1 }
 0x3c2   :  { %v2148_v29 = vadd.f32 %v7531_v58, %v2007_v19  ;;  %v2009_v44 = vpop.f32.mrb[77].mxu0  ;;  %v4423_v57 = vpop.f32.mrb[53].mxu1 }
 0x3c3   :  { %v2162_v5 = vadd.f32 %v7532_v1, %v2009_v44  ;;  %v2011_v55 = vpop.f32.mrb[78].mxu0  ;;  %v2053_v60 = vpop.f32.mrb[54].mxu1 }
 0x3c4   :  { %v4125_v2 = vmul.f32 -1.442695, %v2148_v29  ;;  %v2149_v32 = vadd.f32 %v7533_v45, %v2011_v55  ;;  %v2013_v37 = vpop.f32.mrb[79].mxu0  ;;  %v4424_v62 = vpop.f32.mrb[55].mxu1 }
 0x3c5   :  { %v2163_v15 = vadd.f32 %v7534_v10, %v2013_v37  ;;  %v4127_v53 = vmul.f32 -1.442695, %v2162_v5  ;;  %v2176_v62 = vadd.f32 %v6119_v51, %v2050_v23  ;;  %v2177_v5 = vadd.f32 %v6119_v51, %v2053_v60  ;;  %v7536_v10 = vld [vmem:[#allocation29_spill] sm:$0xff] }
 0x3c6   :  { %4928 = vpow2.f32 %v4125_v2  ;;  %v4126_v52 = vmul.f32 -1.442695, %v2149_v32 }
 0x3c7   :  { %v4128_v4 = vmul.f32 -1.442695, %v2163_v15 }
 0x3c8   :  { %4930 = vpow2.f32 %v4126_v52 }
 0x3c9   :  { %4932 = vpow2.f32 %v4127_v53  ;;  %v7535_v53 = vld [vmem:[#allocation28_spill] sm:$0xff] }
 0x3ca   :  { %4934 = vpow2.f32 %v4128_v4 }
 0x3d0   :  { %v4929_v19 = vpop.eup %4928 }
 0x3d1   :  { %v2156_v58 = vadd.f32 1.0, %v4929_v19 }
 0x3d2   :  { %v4931_v57 = vpop.eup %4930 }
 0x3d3   :  { %4936 = vrcp.f32 %v2156_v58  ;;  %v2157_v1 = vadd.f32 1.0, %v4931_v57  ;;  %v4933_v29 = vpop.eup %4932 }
 0x3d4   :  { %v4935_v44 = vpop.eup %4934  ;;  %v2170_v45 = vadd.f32 1.0, %v4933_v29 }
 0x3d5   :  { %4938 = vrcp.f32 %v2157_v1  ;;  %v2171_v55 = vadd.f32 1.0, %v4935_v44 }
 0x3d6   :  { %4940 = vrcp.f32 %v2170_v45 }
 0x3d7   :  { %4942 = vrcp.f32 %v2171_v55 }
 0x3dd   :  { %v4937_v37 = vpop.eup %4936 }
 0x3de   :  { %v2178_v2 = vmul.f32 %v4937_v37, %v2176_v62  ;;  %v4686_v62 = vpop.permute.xlu0 %4685 }
 0x3df   :  { %v4939_v15 = vpop.eup %4938  ;;  %v6527_v51 = vunpack.i.l.bf16 %v4686_v62 }
 0x3e0   :  { %v2180_v4 = vadd.f32 %v2178_v2, %v7535_v53  ;;  %v2179_v32 = vmul.f32 %v4939_v15, %v2177_v5  ;;  %v4941_v19 = vpop.eup %4940  ;;  %v6530_v2 = vunpack.i.h.bf16 %v4686_v62 }
 0x3e1   :  { %v4943_v58 = vpop.eup %4942  ;;  %v2184_v57 = vsub.f32 1.0, %v4941_v19  ;;  %v2188_v29 = vmul.f32 %v4941_v19, %v6409_v56  ;;  %7537 = vst [vmem:[#allocation104_spill] sm:$0xff] %v6527_v51 }
 0x3e2   :  { %4944 = vtanh.f32 %v2180_v4  ;;  %v2181_v52 = vadd.f32 %v2179_v32, %v7536_v10  ;;  %v2185_v44 = vsub.f32 1.0, %v4943_v58  ;;  %v2189_v55 = vmul.f32 %v4943_v58, %v6412_v13  ;;  %7538 = vst [vmem:[#allocation105_spill] sm:$0xff] %v6530_v2 }
 0x3e4   :  { %4946 = vtanh.f32 %v2181_v52 }
 0x3ec   :  { %v4945_v1 = vpop.eup %4944 }
 0x3ed   :  { %v2186_v23 = vmul.f32 %v4945_v1, %v2184_v57 }
 0x3ee   :  { %v4947_v45 = vpop.eup %4946 }
 0x3ef   :  { %v2190_v60 = vadd.f32 %v2188_v29, %v2186_v23  ;;  %v2187_v37 = vmul.f32 %v4947_v45, %v2185_v44  ;;  %v7539_v29 = vld [vmem:[#allocation56_spill] sm:$0xff] }
 0x3f1   :  { %v2264_v5 = vmul.f32 %v6527_v51, %v2190_v60  ;;  %v2191_v15 = vadd.f32 %v2189_v55, %v2187_v37  ;;  %v2284_v53 = vsub.f32 %v2190_v60, %v6409_v56 }
 0x3f3   :  { %2267 = vst [vmem:[#allocation15 + $0x20] sm:$0xff] %v2264_v5  ;;  %v2265_v4 = vmul.f32 %v6530_v2, %v2191_v15  ;;  %v2285_v32 = vsub.f32 %v2191_v15, %v6412_v13  ;;  %v2286_v10 = vmul.f32 %v6527_v51, %v2284_v53  ;;  %v7541_v5 = vld [vmem:[#allocation57_spill] sm:$0xff]  ;;  %v6871_v51 = vld [vmem:[#allocation10 + $0x128] ss:$24 sps:$4 sm:$0xff]  }
 0x3f5   :  { %2268 = vst [vmem:[#allocation15 + $0x28] sm:$0xff] %v2265_v4  ;;  %v2287_v52 = vmul.f32 %v6530_v2, %v2285_v32  ;;  %v6539_v19 = vadd.f32 %v2286_v10, %v6409_v56  ;;  %v7540_v56 = vld [vmem:[#allocation92_spill] sm:$0xff]  ;;  %v6868_v2 = vld [vmem:[#allocation10 + $0x120] ss:$24 sps:$4 sm:$0xff]  }
 0x3f7   :  { %v6542_v58 = vadd.f32 %v2287_v52, %v6412_v13 }
 0x3f9   :  { %v2320_v57 = vpack.c.bf16 %v6542_v58, %v6539_v19 }
 0x3fb   :  { %2354 = vmatmul.mubr.bf16.vlgmr.msra.gmra.mrb[84].mxu0 %v2320_v57  ;;  %4462 = vmatmul.mubr.bf16.vlgmr.msra.gmra.mrb[60].mxu1 %v2320_v57  ;;  %v2092_v1 = vpop.f32.mrb[80].mxu0  ;;  %v2135_v23 = vpop.f32.mrb[56].mxu1 }
 0x3fc   :  { %v2198_v44 = vadd.f32 %v7539_v29, %v2092_v1  ;;  %v2094_v45 = vpop.f32.mrb[81].mxu0  ;;  %v4443_v62 = vpop.f32.mrb[57].mxu1  ;;  %2407 = vmatpush1.bf16.msra.mxu0 %v6192_v8  ;;  %4466 = vmatpush3.bf16.msra.mxu1 %v6195_v24  ;;  %v7542_v8 = vld [vmem:[#allocation93_spill] sm:$0xff] }
 0x3fd   :  { %v2212_v60 = vadd.f32 %v7540_v56, %v2094_v45  ;;  %v2096_v37 = vpop.f32.mrb[82].mxu0  ;;  %v2138_v13 = vpop.f32.mrb[58].mxu1  ;;  %2408 = vmatprep.subr.bf16.mxu0 %v6198_v20  ;;  %4467 = vmatprep.subr.bf16.mxu1 %v7442_v50 }
 0x3fe   :  { %v4129_v55 = vmul.f32 -1.442695, %v2198_v44  ;;  %v2199_v15 = vadd.f32 %v7541_v5, %v2096_v37  ;;  %v2098_v53 = vpop.f32.mrb[83].mxu0  ;;  %v4444_v4 = vpop.f32.mrb[59].mxu1  ;;  %2438 = vmatprep.mubr.bf16.mxu0 %v7482_v18  ;;  %4481 = vmatprep.mubr.msk.bf16.mxu1 %vm5493_vm2, %v7442_v50 }
 0x3ff   :  { %v2213_v24 = vadd.f32 %v7542_v8, %v2098_v53  ;;  %v4131_v20 = vmul.f32 -1.442695, %v2212_v60  ;;  %v4691_v62 = vpop.permute.xlu1 %4690 }
 0x400   :  { %4948 = vpow2.f32 %v4129_v55  ;;  %v4130_v32 = vmul.f32 -1.442695, %v2199_v15  ;;  %2409 = vmatpush1.bf16.msra.mxu0 %v6210_v21  ;;  %4468 = vmatpush3.bf16.msra.mxu1 %v6213_v49  ;;  %v6593_v56 = vunpack.i.l.bf16 %v4691_v62 }
 0x401   :  { %2410 = vmatprep.subr.bf16.mxu0 %v6219_v33  ;;  %4469 = vmatprep.subr.bf16.mxu1 %v7442_v50  ;;  %v4132_v10 = vmul.f32 -1.442695, %v2213_v24  ;;  %v7561_v24 = vld [vmem:[#allocation38_spill] sm:$0xff] }
 0x402   :  { %4950 = vpow2.f32 %v4130_v32  ;;  %7546 = vst [vmem:[#allocation107_spill] sm:$0xff] %v6593_v56 }
 0x403   :  { %4952 = vpow2.f32 %v4131_v20 }
 0x404   :  { %2411 = vmatpush1.bf16.msra.mxu0 %v6223_v0  ;;  %4470 = vmatpush3.bf16.msra.mxu1 %v6226_v61  ;;  %4954 = vpow2.f32 %v4132_v10 }
 0x405   :  { %2412 = vmatprep.subr.bf16.mxu0 %v6229_v17  ;;  %4471 = vmatprep.subr.bf16.mxu1 %v7442_v50 }
 0x408   :  { %2413 = vmatpush1.bf16.msra.mxu0 %v6233_v7  ;;  %4472 = vmatpush3.bf16.msra.mxu1 %v6236_v40  ;;  %v2226_v40 = vadd.f32 %v6269_v16, %v2135_v23 }
 0x409   :  { %2414 = vmatprep.subr.bf16.mxu0 %v6239_v39  ;;  %4473 = vmatprep.subr.bf16.mxu1 %v7442_v50 }
 0x40a   :  { %v4949_v33 = vpop.eup %4948 }
 0x40b   :  { %v2206_v21 = vadd.f32 1.0, %v4949_v33  ;;  %v7562_v33 = vld [vmem:[#allocation39_spill] sm:$0xff] }
 0x40c   :  { %v4951_v0 = vpop.eup %4950  ;;  %2415 = vmatpush1.bf16.msra.mxu0 %v6243_v47  ;;  %4474 = vmatpush3.bf16.msra.mxu1 %v6246_v22 }
 0x40d   :  { %4956 = vrcp.f32 %v2206_v21  ;;  %v2207_v49 = vadd.f32 1.0, %v4951_v0  ;;  %2416 = vmatprep.subr.bf16.mxu0 %v6249_v34  ;;  %4475 = vmatprep.subr.bf16.mxu1 %v7442_v50  ;;  %v4953_v61 = vpop.eup %4952  ;;  %v2227_v34 = vadd.f32 %v6269_v16, %v2138_v13  ;;  %v6599_v13 = vunpack.i.h.bf16 %v4691_v62  ;;  %v7565_v62 = vld [vmem:[#allocation36_spill] sm:$0xff] }
 0x40e   :  { %v4955_v17 = vpop.eup %4954  ;;  %v2220_v7 = vadd.f32 1.0, %v4953_v61 }
 0x40f   :  { %4958 = vrcp.f32 %v2207_v49  ;;  %v2221_v39 = vadd.f32 1.0, %v4955_v17  ;;  %7548 = vst [vmem:[#allocation109_spill] sm:$0xff] %v6599_v13  ;;  %v7563_v17 = vld [vmem:[#allocation40_spill] sm:$0xff] }
 0x410   :  { %2417 = vmatpush1.bf16.msra.mxu0 %v6253_v41  ;;  %4476 = vmatpush3.bf16.msra.mxu1 %v6256_v42  ;;  %4960 = vrcp.f32 %v2220_v7 }
 0x411   :  { %2418 = vmatprep.subr.bf16.mxu0 %v6259_v31  ;;  %4477 = vmatprep.subr.bf16.mxu1 %v7442_v50  ;;  %4962 = vrcp.f32 %v2221_v39 }
 0x414   :  { %2419 = vmatpush1.bf16.msra.mxu0 %v6263_v25  ;;  %4478 = vmatpush3.bf16.msra.mxu1 %v6266_v12  ;;  %v7543_v25 = vld [vmem:[#allocation94_spill] sm:$0xff]  ;;  %v7544_v12 = vld [vmem:[#allocation95_spill] sm:$0xff] }
 0x415   :  { %2420 = vmatprep.subr.bf16.mxu0 %v6271_v46  ;;  %4479 = vmatprep.subr.bf16.mxu1 %v7442_v50 }
 0x417   :  { %v4957_v47 = vpop.eup %4956 }
 0x418   :  { %v2228_v22 = vmul.f32 %v4957_v47, %v2226_v40  ;;  %2421 = vmatpush1.bf16.msra.mxu0 %v6278_v14  ;;  %4480 = vmatpush3.bf16.msra.mxu1 %v6281_v6  ;;  %v7564_v47 = vld [vmem:[#allocation41_spill] sm:$0xff] }
 0x419   :  { %v4959_v41 = vpop.eup %4958  ;;  %2663 = vmatprep.subr.bf16.mxu0 %v6284_v3  ;;  %4485 = vmatprep.subr.bf16.mxu1 %v7442_v50 }
 0x41a   :  { %v2230_v42 = vadd.f32 %v2228_v22, %v7543_v25  ;;  %v2229_v31 = vmul.f32 %v4959_v41, %v2227_v34  ;;  %v4961_v52 = vpop.eup %4960 }
 0x41b   :  { %v4963_v57 = vpop.eup %4962  ;;  %v2234_v16 = vsub.f32 1.0, %v4961_v52  ;;  %v2238_v6 = vmul.f32 %v4961_v52, %v6476_v63 }
 0x41c   :  { %4964 = vtanh.f32 %v2230_v42  ;;  %v2231_v46 = vadd.f32 %v2229_v31, %v7544_v12  ;;  %v2235_v23 = vsub.f32 1.0, %v4963_v57  ;;  %v2239_v45 = vmul.f32 %v4963_v57, %v6479_v48 }
 0x41e   :  { %4966 = vtanh.f32 %v2231_v46 }
 0x426   :  { %v4965_v1 = vpop.eup %4964 }
 0x427   :  { %v2236_v14 = vmul.f32 %v4965_v1, %v2234_v16  ;;  %v6652_v1 = vld [vmem:[#allocation13] ss:$0 sm:$0xff] }
 0x428   :  { %v4967_v29 = vpop.eup %4966 }
 0x429   :  { %v6590_v3 = vadd.f32 %v2238_v6, %v2236_v14  ;;  %v2237_v44 = vmul.f32 %v4967_v29, %v2235_v23 }
 0x42b   :  { %7545 = vst [vmem:[#allocation106_spill] sm:$0xff] %v6590_v3  ;;  %v6595_v60 = vadd.f32 %v2239_v45, %v2237_v44  ;;  %v2290_v37 = vsub.f32 %v6590_v3, %v6476_v63  ;;  %v6884_v3 = vld [vmem:[#allocation10 + $0x10] ss:$24 sps:$4 sm:$0xff]  }
 0x42d   :  { %7547 = vst [vmem:[#allocation108_spill] sm:$0xff] %v6595_v60  ;;  %v2291_v55 = vsub.f32 %v6595_v60, %v6479_v48  ;;  %v2292_v5 = vmul.f32 %v6593_v56, %v2290_v37  ;;  %v6878_v60 = vld [vmem:[#allocation10 + $0x150] ss:$24 sps:$4 sm:$0xff]  }
 0x42e   :  { %v6881_v56 = vld [vmem:[#allocation10 + $0x158] ss:$24 sps:$4 sm:$0xff]  }
 0x42f   :  { %v2293_v15 = vmul.f32 %v6599_v13, %v2291_v55  ;;  %v6606_v53 = vadd.f32 %v2292_v5, %v6476_v63  ;;  %v7555_v63 = vld [vmem:[#allocation116_spill] sm:$0xff]  ;;  %v7566_v5 = vld [vmem:[#allocation37_spill] sm:$0xff] }
 0x430   :  { %v6874_v13 = vld [vmem:[#allocation10 + $0x154] ss:$24 sps:$4 sm:$0xff]   ;;  %7591 = vst [vmem:[#allocation116_spill] sm:$0xff] %v6881_v56 }
 0x431   :  { %v6609_v4 = vadd.f32 %v2293_v15, %v6479_v48  ;;  %v7556_v48 = vld [vmem:[#allocation117_spill] sm:$0xff] }
 0x432   :  { %7592 = vst [vmem:[#allocation117_spill] sm:$0xff] %v6884_v3 }
 0x433   :  { %v2405_v8 = vpack.c.bf16 %v6609_v4, %v6606_v53 }
 0x435   :  { %2439 = vmatmul.mubr.bf16.vlgmr.msra.gmra.mrb[88].mxu0 %v2405_v8  ;;  %4482 = vmatmul.mubr.bf16.vlgmr.msra.gmra.mrb[64].mxu1 %v2405_v8 }
 0x436   :  { %2664 = vmatpush1.bf16.msra.mxu0 %v6305_v28  ;;  %4486 = vmatpush3.bf16.msra.mxu1 %v6308_v27  ;;  %v7549_v28 = vld [vmem:[#allocation110_spill] sm:$0xff]  ;;  %v7550_v27 = vld [vmem:[#allocation111_spill] sm:$0xff] }
 0x437   :  { %2665 = vmatprep.subr.bf16.mxu0 %v6311_v43  ;;  %4487 = vmatprep.subr.bf16.mxu1 %v7442_v50  ;;  %v7551_v43 = vld [vmem:[#allocation112_spill] sm:$0xff] }
 0x438   :  { %2695 = vmatprep.mubr.bf16.mxu0 %v7482_v18  ;;  %4501 = vmatprep.mubr.msk.bf16.mxu1 %vm5493_vm2, %v7442_v50  ;;  %7587 = vst [vmem:[#allocation112_spill] sm:$0xff] %v6868_v2 }
 0x43a   :  { %2666 = vmatpush1.bf16.msra.mxu0 %v6318_v26  ;;  %4488 = vmatpush3.bf16.msra.mxu1 %v6321_v38  ;;  %v7552_v26 = vld [vmem:[#allocation113_spill] sm:$0xff]  ;;  %v7553_v38 = vld [vmem:[#allocation114_spill] sm:$0xff] }
 0x43b   :  { %2667 = vmatprep.subr.bf16.mxu0 %v6324_v30  ;;  %4489 = vmatprep.subr.bf16.mxu1 %v7442_v50  ;;  %v7554_v30 = vld [vmem:[#allocation115_spill] sm:$0xff]  ;;  %7588 = vst [vmem:[#allocation113_spill] sm:$0xff] %v6871_v51  ;;  %7589 = vst [vmem:[#allocation114_spill] sm:$0xff] %v6874_v13 }
 0x43c   :  { %7590 = vst [vmem:[#allocation115_spill] sm:$0xff] %v6878_v60 }
 0x43e   :  { %2668 = vmatpush1.bf16.msra.mxu0 %v7513_v54  ;;  %4490 = vmatpush3.bf16.msra.mxu1 %v7514_v35  ;;  %v7557_v54 = vld [vmem:[#allocation118_spill] sm:$0xff]  ;;  %v7558_v35 = vld [vmem:[#allocation119_spill] sm:$0xff] }
 0x43f   :  { %2669 = vmatprep.subr.bf16.mxu0 %v7515_v36  ;;  %4491 = vmatprep.subr.bf16.mxu1 %v7442_v50  ;;  %v7559_v36 = vld [vmem:[#allocation120_spill] sm:$0xff] }
 0x442   :  { %2670 = vmatpush1.bf16.msra.mxu0 %v7516_v11  ;;  %4492 = vmatpush3.bf16.msra.mxu1 %v7517_v59  ;;  %v7560_v11 = vld [vmem:[#allocation121_spill] sm:$0xff] }
 0x443   :  { %2671 = vmatprep.subr.bf16.mxu0 %v7518_v9  ;;  %4493 = vmatprep.subr.bf16.mxu1 %v7442_v50 }
 0x446   :  { %2672 = vmatpush1.bf16.msra.mxu0 %v7549_v28  ;;  %4494 = vmatpush3.bf16.msra.mxu1 %v7550_v27 }
 0x447   :  { %2673 = vmatprep.subr.bf16.mxu0 %v7551_v43  ;;  %4495 = vmatprep.subr.bf16.mxu1 %v7442_v50 }
 0x44a   :  { %2674 = vmatpush1.bf16.msra.mxu0 %v7552_v26  ;;  %4496 = vmatpush3.bf16.msra.mxu1 %v7553_v38 }
 0x44b   :  { %2675 = vmatprep.subr.bf16.mxu0 %v7554_v30  ;;  %4497 = vmatprep.subr.bf16.mxu1 %v7442_v50 }
 0x44e   :  { %2676 = vmatpush1.bf16.msra.mxu0 %v7555_v63  ;;  %4498 = vmatpush3.bf16.msra.mxu1 %v7556_v48  ;;  %v4696_v48 = vpop.permute.xlu0 %4695 }
 0x44f   :  { %2677 = vmatprep.subr.bf16.mxu0 %v7557_v54  ;;  %4499 = vmatprep.subr.bf16.mxu1 %v7442_v50 }
 0x452   :  { %2678 = vmatpush1.bf16.msra.mxu0 %v7558_v35  ;;  %4500 = vmatpush3.bf16.msra.mxu1 %v7559_v36 }
 0x453   :  { %2748 = vmatprep.subr.bf16.mxu0 %v7560_v11  ;;  %4505 = vmatprep.subr.bf16.mxu1 %v7442_v50  ;;  %v6662_v11 = vunpack.i.l.bf16 %v4696_v48 }
 0x4ce   :  { %v2355_v59 = vpop.f32.mrb[84].mxu0  ;;  %v2398_v9 = vpop.f32.mrb[60].mxu1 }
 0x4cf   :  { %v2496_v32 = vadd.f32 %v7561_v24, %v2355_v59  ;;  %v2357_v20 = vpop.f32.mrb[85].mxu0  ;;  %v4463_v10 = vpop.f32.mrb[61].mxu1  ;;  %v2524_v14 = vadd.f32 %v6652_v1, %v2398_v9  ;;  %v6668_v24 = vunpack.i.h.bf16 %v4696_v48  ;;  %v6743_v48 = vld [vmem:[#allocation10 + $0xfc] ss:$24 sps:$4 sm:$0xff]  }
 0x4d0   :  { %v2510_v21 = vadd.f32 %v7562_v33, %v2357_v20  ;;  %v2359_v0 = vpop.f32.mrb[86].mxu0  ;;  %v2401_v49 = vpop.f32.mrb[62].mxu1 }
 0x4d1   :  { %v4137_v61 = vmul.f32 -1.442695, %v2496_v32  ;;  %v2497_v7 = vadd.f32 %v7563_v17, %v2359_v0  ;;  %v2361_v40 = vpop.f32.mrb[87].mxu0  ;;  %v4464_v39 = vpop.f32.mrb[63].mxu1  ;;  %v2525_v44 = vadd.f32 %v6652_v1, %v2401_v49  ;;  %v7567_v17 = vld [vmem:[#allocation48_spill] sm:$0xff] }
 0x4d2   :  { %v2511_v22 = vadd.f32 %v7564_v47, %v2361_v40  ;;  %v4139_v41 = vmul.f32 -1.442695, %v2510_v21  ;;  %v6685_v47 = vld [vmem:[#allocation10 + $0xc] ss:$24 sps:$4 sm:$0xff]  }
 0x4d3   :  { %4968 = vpow2.f32 %v4137_v61  ;;  %v4138_v34 = vmul.f32 -1.442695, %v2497_v7 }
 0x4d4   :  { %v4140_v25 = vmul.f32 -1.442695, %v2511_v22 }
 0x4d5   :  { %4970 = vpow2.f32 %v4138_v34 }
 0x4d6   :  { %4972 = vpow2.f32 %v4139_v41 }
 0x4d7   :  { %4974 = vpow2.f32 %v4140_v25  ;;  %v6694_v25 = vld [vmem:[#allocation10 + $0x40] ss:$24 sps:$4 sm:$0xff]  }
 0x4dd   :  { %v4969_v42 = vpop.eup %4968 }
 0x4de   :  { %v2504_v31 = vadd.f32 1.0, %v4969_v42 }
 0x4df   :  { %v4971_v12 = vpop.eup %4970 }
 0x4e0   :  { %4976 = vrcp.f32 %v2504_v31  ;;  %v2505_v46 = vadd.f32 1.0, %v4971_v12  ;;  %v4973_v52 = vpop.eup %4972  ;;  %v7569_v31 = vld [vmem:[#allocation49_spill] sm:$0xff] }
 0x4e1   :  { %v4975_v57 = vpop.eup %4974  ;;  %v2518_v16 = vadd.f32 1.0, %v4973_v52 }
 0x4e2   :  { %4978 = vrcp.f32 %v2505_v46  ;;  %v2519_v6 = vadd.f32 1.0, %v4975_v57  ;;  %v7570_v57 = vld [vmem:[#allocation89_spill] sm:$0xff] }
 0x4e3   :  { %4980 = vrcp.f32 %v2518_v16 }
 0x4e4   :  { %4982 = vrcp.f32 %v2519_v6  ;;  %v6703_v6 = vld [vmem:[#allocation10 + $0x3c] ss:$24 sps:$4 sm:$0xff]  }
 0x4ea   :  { %v4977_v23 = vpop.eup %4976 }
 0x4eb   :  { %v2526_v29 = vmul.f32 %v4977_v23, %v2524_v14  ;;  %v6706_v23 = vld [vmem:[#allocation10 + $0x44] ss:$24 sps:$4 sm:$0xff]  }
 0x4ec   :  { %v4979_v45 = vpop.eup %4978 }
 0x4ed   :  { %v2528_v37 = vadd.f32 %v2526_v29, %v7565_v62  ;;  %v2527_v55 = vmul.f32 %v4979_v45, %v2525_v44  ;;  %v4981_v8 = vpop.eup %4980  ;;  %v6709_v29 = vld [vmem:[#allocation10 + $0x70] ss:$24 sps:$4 sm:$0xff]   ;;  %v6713_v45 = vld [vmem:[#allocation10 + $0x6c] ss:$24 sps:$4 sm:$0xff]  }
 0x4ee   :  { %v4983_v28 = vpop.eup %4982  ;;  %v2532_v27 = vsub.f32 1.0, %v4981_v8  ;;  %v2536_v38 = vmul.f32 %v4981_v8, %v6539_v19  ;;  %v6716_v62 = vld [vmem:[#allocation10 + $0x74] ss:$24 sps:$4 sm:$0xff]   ;;  %v6729_v8 = vld [vmem:[#allocation10 + $0xd0] ss:$24 sps:$4 sm:$0xff]  }
 0x4ef   :  { %4984 = vtanh.f32 %v2528_v37  ;;  %v2529_v15 = vadd.f32 %v2527_v55, %v7566_v5  ;;  %v2533_v30 = vsub.f32 1.0, %v4983_v28  ;;  %v2537_v36 = vmul.f32 %v4983_v28, %v6542_v58  ;;  %v6719_v55 = vld [vmem:[#allocation10 + $0xa0] ss:$24 sps:$4 sm:$0xff]   ;;  %v6723_v5 = vld [vmem:[#allocation10 + $0x9c] ss:$24 sps:$4 sm:$0xff]  }
 0x4f1   :  { %4986 = vtanh.f32 %v2529_v15  ;;  %v6726_v15 = vld [vmem:[#allocation10 + $0xa4] ss:$24 sps:$4 sm:$0xff]  }
 0x4f9   :  { %v4985_v43 = vpop.eup %4984 }
 0x4fa   :  { %v2534_v26 = vmul.f32 %v4985_v43, %v2532_v27 }
 0x4fb   :  { %v4987_v63 = vpop.eup %4986 }
 0x4fc   :  { %v6659_v54 = vadd.f32 %v2536_v38, %v2534_v26  ;;  %v2535_v35 = vmul.f32 %v4987_v63, %v2533_v30  ;;  %v6733_v26 = vld [vmem:[#allocation10 + $0xcc] ss:$24 sps:$4 sm:$0xff]   ;;  %v6739_v63 = vld [vmem:[#allocation10 + $0x100] ss:$24 sps:$4 sm:$0xff]  }
 0x4fd   :  { %v6736_v38 = vld [vmem:[#allocation10 + $0xd4] ss:$24 sps:$4 sm:$0xff]  }
 0x4fe   :  { %v6664_v59 = vadd.f32 %v2537_v36, %v2535_v35  ;;  %v2632_v9 = vsub.f32 %v6659_v54, %v6539_v19  ;;  %v6746_v35 = vld [vmem:[#allocation10 + $0x104] ss:$24 sps:$4 sm:$0xff]  }
 0x500   :  { %v2633_v32 = vsub.f32 %v6664_v59, %v6542_v58  ;;  %v2634_v20 = vmul.f32 %v6662_v11, %v2632_v9  ;;  %v6749_v9 = vld [vmem:[#allocation10 + $0x130] ss:$24 sps:$4 sm:$0xff]  }
 0x502   :  { %v2635_v10 = vmul.f32 %v6668_v24, %v2633_v32  ;;  %v6675_v33 = vadd.f32 %v2634_v20, %v6539_v19  ;;  %v6688_v19 = vld [vmem:[#allocation10 + $0x14] ss:$24 sps:$4 sm:$0xff]  }
 0x504   :  { %v6678_v21 = vadd.f32 %v2635_v10, %v6542_v58  ;;  %v7568_v58 = vld [vmem:[#allocation88_spill] sm:$0xff] }
 0x505   :  { %v6753_v10 = vld [vmem:[#allocation10 + $0x12c] ss:$24 sps:$4 sm:$0xff]  }
 0x506   :  { %v2662_v0 = vpack.c.bf16 %v6678_v21, %v6675_v33 }
 0x508   :  { %2696 = vmatmul.mubr.bf16.vlgmr.msra.gmra.mrb[92].mxu0 %v2662_v0  ;;  %4502 = vmatmul.mubr.bf16.vlgmr.msra.gmra.mrb[68].mxu1 %v2662_v0  ;;  %v2440_v49 = vpop.f32.mrb[88].mxu0  ;;  %v6682_v61 = vpop.f32.mrb[64].mxu1  ;;  %v6756_v0 = vld [vmem:[#allocation10 + $0x134] ss:$24 sps:$4 sm:$0xff]  }
 0x509   :  { %v2546_v7 = vadd.f32 %v7567_v17, %v2440_v49  ;;  %v2442_v40 = vpop.f32.mrb[89].mxu0  ;;  %v4483_v39 = vpop.f32.mrb[65].mxu1  ;;  %2749 = vmatpush1.bf16.msra.mxu0 %v6685_v47  ;;  %4506 = vmatpush3.bf16.msra.mxu1 %v6688_v19  ;;  %v6759_v49 = vld [vmem:[#allocation10 + $0x160] ss:$24 sps:$4 sm:$0xff]   ;;  %v6763_v17 = vld [vmem:[#allocation13 + $0x1] ss:$0 sm:$0xff] }
 0x50a   :  { %v2560_v22 = vadd.f32 %v7568_v58, %v2442_v40  ;;  %v2444_v34 = vpop.f32.mrb[90].mxu0  ;;  %v6692_v41 = vpop.f32.mrb[66].mxu1  ;;  %2750 = vmatprep.subr.bf16.mxu0 %v6694_v25  ;;  %4507 = vmatprep.subr.bf16.mxu1 %v7442_v50 }
 0x50b   :  { %v4141_v42 = vmul.f32 -1.442695, %v2546_v7  ;;  %v2547_v12 = vadd.f32 %v7569_v31, %v2444_v34  ;;  %v2446_v46 = vpop.f32.mrb[91].mxu0  ;;  %v4484_v52 = vpop.f32.mrb[67].mxu1  ;;  %2780 = vmatprep.mubr.bf16.mxu0 %v7482_v18  ;;  %4521 = vmatprep.mubr.msk.bf16.mxu1 %vm5493_vm2, %v7442_v50  ;;  %v2574_v7 = vadd.f32 %v6763_v17, %v6682_v61  ;;  %v6769_v34 = vld [vmem:[#allocation10 + $0x15c] ss:$24 sps:$4 sm:$0xff]  }
 0x50c   :  { %v2561_v16 = vadd.f32 %v7570_v57, %v2446_v46  ;;  %v4143_v44 = vmul.f32 -1.442695, %v2560_v22  ;;  %v2575_v22 = vadd.f32 %v6763_v17, %v6692_v41  ;;  %v7571_v61 = vld [vmem:[#allocation90_spill] sm:$0xff]  ;;  %v7572_v41 = vld [vmem:[#allocation91_spill] sm:$0xff] }
 0x50d   :  { %4988 = vpow2.f32 %v4141_v42  ;;  %v4142_v14 = vmul.f32 -1.442695, %v2547_v12  ;;  %2751 = vmatpush1.bf16.msra.mxu0 %v6703_v6  ;;  %4508 = vmatpush3.bf16.msra.mxu1 %v6706_v23  ;;  %v6772_v42 = vld [vmem:[#allocation10 + $0x164] ss:$24 sps:$4 sm:$0xff]  }
 0x50e   :  { %2752 = vmatprep.subr.bf16.mxu0 %v6709_v29  ;;  %4509 = vmatprep.subr.bf16.mxu1 %v7442_v50  ;;  %v4144_v37 = vmul.f32 -1.442695, %v2561_v16  ;;  %v6775_v12 = vld [vmem:[#allocation10 + $0x4] ss:$24 sps:$4 sm:$0xff]  }
 0x50f   :  { %4990 = vpow2.f32 %v4142_v14 }
 0x510   :  { %4992 = vpow2.f32 %v4143_v44 }
 0x511   :  { %2753 = vmatpush1.bf16.msra.mxu0 %v6713_v45  ;;  %4510 = vmatpush3.bf16.msra.mxu1 %v6716_v62  ;;  %4994 = vpow2.f32 %v4144_v37 }
 0x512   :  { %2754 = vmatprep.subr.bf16.mxu0 %v6719_v55  ;;  %4511 = vmatprep.subr.bf16.mxu1 %v7442_v50 }
 0x515   :  { %2755 = vmatpush1.bf16.msra.mxu0 %v6723_v5  ;;  %4512 = vmatpush3.bf16.msra.mxu1 %v6726_v15 }
 0x516   :  { %2756 = vmatprep.subr.bf16.mxu0 %v6729_v8  ;;  %4513 = vmatprep.subr.bf16.mxu1 %v7442_v50 }
 0x517   :  { %v4989_v28 = vpop.eup %4988 }
 0x518   :  { %v2554_v27 = vadd.f32 1.0, %v4989_v28 }
 0x519   :  { %v4991_v43 = vpop.eup %4990  ;;  %2757 = vmatpush1.bf16.msra.mxu0 %v6733_v26  ;;  %4514 = vmatpush3.bf16.msra.mxu1 %v6736_v38 }
 0x51a   :  { %4996 = vrcp.f32 %v2554_v27  ;;  %v2555_v30 = vadd.f32 1.0, %v4991_v43  ;;  %2758 = vmatprep.subr.bf16.mxu0 %v6739_v63  ;;  %4515 = vmatprep.subr.bf16.mxu1 %v7442_v50  ;;  %v4993_v36 = vpop.eup %4992 }
 0x51b   :  { %v4995_v32 = vpop.eup %4994  ;;  %v2568_v20 = vadd.f32 1.0, %v4993_v36  ;;  %v4701_v36 = vpop.permute.xlu1 %4700 }
 0x51c   :  { %4998 = vrcp.f32 %v2555_v30  ;;  %v2569_v40 = vadd.f32 1.0, %v4995_v32 }
 0x51d   :  { %2759 = vmatpush1.bf16.msra.mxu0 %v6743_v48  ;;  %4516 = vmatpush3.bf16.msra.mxu1 %v6746_v35  ;;  %5000 = vrcp.f32 %v2568_v20 }
 0x51e   :  { %2760 = vmatprep.subr.bf16.mxu0 %v6749_v9  ;;  %4517 = vmatprep.subr.bf16.mxu1 %v7442_v50  ;;  %5002 = vrcp.f32 %v2569_v40  ;;  %v6785_v40 = vunpack.i.l.bf16 %v4701_v36 }
 0x521   :  { %2761 = vmatpush1.bf16.msra.mxu0 %v6753_v10  ;;  %4518 = vmatpush3.bf16.msra.mxu1 %v6756_v0 }
 0x522   :  { %2762 = vmatprep.subr.bf16.mxu0 %v6759_v49  ;;  %4519 = vmatprep.subr.bf16.mxu1 %v7442_v50 }
 0x524   :  { %v4997_v39 = vpop.eup %4996 }
 0x525   :  { %v2576_v58 = vmul.f32 %v4997_v39, %v2574_v7  ;;  %2763 = vmatpush1.bf16.msra.mxu0 %v6769_v34  ;;  %4520 = vmatpush3.bf16.msra.mxu1 %v6772_v42 }
 0x526   :  { %v4999_v31 = vpop.eup %4998  ;;  %2973 = vmatprep.subr.bf16.mxu0 %v6775_v12  ;;  %4525 = vmatprep.subr.bf16.mxu1 %v7442_v50 }
 0x527   :  { %v2578_v46 = vadd.f32 %v2576_v58, %v7571_v61  ;;  %v2577_v52 = vmul.f32 %v4999_v31, %v2575_v22  ;;  %v5001_v16 = vpop.eup %5000  ;;  %v6791_v22 = vunpack.i.h.bf16 %v4701_v36  ;;  %v6841_v36 = vld [vmem:[#allocation10 + $0x98] ss:$24 sps:$4 sm:$0xff]  }
 0x528   :  { %v5003_v14 = vpop.eup %5002  ;;  %v2582_v44 = vsub.f32 1.0, %v5001_v16  ;;  %v2586_v27 = vmul.f32 %v5001_v16, %v6606_v53  ;;  %v6805_v16 = vld [vmem:[#allocation10] ss:$24 sps:$4 sm:$0xff]   ;;  %7579 = vst [vmem:[#allocation56_spill] sm:$0xff] %v6841_v36 }
 0x529   :  { %5004 = vtanh.f32 %v2578_v46  ;;  %v2579_v57 = vadd.f32 %v2577_v52, %v7572_v41  ;;  %v2583_v43 = vsub.f32 1.0, %v5003_v14  ;;  %v2587_v7 = vmul.f32 %v5003_v14, %v6609_v4  ;;  %v6808_v14 = vld [vmem:[#allocation10 + $0x8] ss:$24 sps:$4 sm:$0xff]  }
 0x52b   :  { %5006 = vtanh.f32 %v2579_v57 }
 0x533   :  { %v5005_v37 = vpop.eup %5004 }
 0x534   :  { %v2584_v28 = vmul.f32 %v5005_v37, %v2582_v44  ;;  %v6811_v44 = vld [vmem:[#allocation10 + $0x34] ss:$24 sps:$4 sm:$0xff]   ;;  %v6824_v37 = vld [vmem:[#allocation10 + $0x64] ss:$24 sps:$4 sm:$0xff]  }
 0x535   :  { %v5007_v30 = vpop.eup %5006  ;;  %7574 = vst [vmem:[#allocation31_spill] sm:$0xff] %v6824_v37 }
 0x536   :  { %v6782_v32 = vadd.f32 %v2586_v27, %v2584_v28  ;;  %v2585_v20 = vmul.f32 %v5007_v30, %v2583_v43  ;;  %v6828_v28 = vld [vmem:[#allocation10 + $0x60] ss:$24 sps:$4 sm:$0xff]   ;;  %v6834_v43 = vld [vmem:[#allocation10 + $0x94] ss:$24 sps:$4 sm:$0xff]   ;;  %v6838_v30 = vld [vmem:[#allocation10 + $0x90] ss:$24 sps:$4 sm:$0xff]  }
 0x537   :  { %7575 = vst [vmem:[#allocation32_spill] sm:$0xff] %v6828_v28  ;;  %v6831_v27 = vld [vmem:[#allocation10 + $0x68] ss:$24 sps:$4 sm:$0xff]   ;;  %7577 = vst [vmem:[#allocation28_spill] sm:$0xff] %v6834_v43 }
 0x538   :  { %v6787_v39 = vadd.f32 %v2587_v7, %v2585_v20  ;;  %v2638_v58 = vsub.f32 %v6782_v32, %v6606_v53  ;;  %7576 = vst [vmem:[#allocation33_spill] sm:$0xff] %v6831_v27  ;;  %7578 = vst [vmem:[#allocation29_spill] sm:$0xff] %v6838_v30  ;;  %v6844_v20 = vld [vmem:[#allocation10 + $0xc4] ss:$24 sps:$4 sm:$0xff]   ;;  %v6848_v7 = vld [vmem:[#allocation10 + $0xc0] ss:$24 sps:$4 sm:$0xff]  }
 0x539   :  { %7580 = vst [vmem:[#allocation92_spill] sm:$0xff] %v6844_v20  ;;  %7581 = vst [vmem:[#allocation57_spill] sm:$0xff] %v6848_v7 }
 0x53a   :  { %v2639_v31 = vsub.f32 %v6787_v39, %v6609_v4  ;;  %v2640_v61 = vmul.f32 %v6785_v40, %v2638_v58  ;;  %v6851_v58 = vld [vmem:[#allocation10 + $0xc8] ss:$24 sps:$4 sm:$0xff]  }
 0x53b   :  { %7582 = vst [vmem:[#allocation93_spill] sm:$0xff] %v6851_v58 }
 0x53c   :  { %v2641_v46 = vmul.f32 %v6791_v22, %v2639_v31  ;;  %v6798_v52 = vadd.f32 %v2640_v61, %v6606_v53  ;;  %v6818_v53 = vld [vmem:[#allocation10 + $0x30] ss:$24 sps:$4 sm:$0xff]   ;;  %v6854_v31 = vld [vmem:[#allocation10 + $0xf4] ss:$24 sps:$4 sm:$0xff]  }
 0x53d   :  { %7583 = vst [vmem:[#allocation94_spill] sm:$0xff] %v6854_v31  ;;  %v6858_v61 = vld [vmem:[#allocation10 + $0xf0] ss:$24 sps:$4 sm:$0xff]  }
 0x53e   :  { %v6801_v41 = vadd.f32 %v2641_v46, %v6609_v4  ;;  %v6821_v4 = vld [vmem:[#allocation10 + $0x38] ss:$24 sps:$4 sm:$0xff]   ;;  %7584 = vst [vmem:[#allocation95_spill] sm:$0xff] %v6858_v61 }
 0x53f   :  { %7573 = vst [vmem:[#allocation30_spill] sm:$0xff] %v6821_v4  ;;  %v6861_v46 = vld [vmem:[#allocation10 + $0xf8] ss:$24 sps:$4 sm:$0xff]  }
 0x540   :  { %v2747_v57 = vpack.c.bf16 %v6801_v41, %v6798_v52  ;;  %7585 = vst [vmem:[#allocation110_spill] sm:$0xff] %v6861_v46 }
 0x542   :  { %2781 = vmatmul.mubr.bf16.vlgmr.msra.gmra.mrb[96].mxu0 %v2747_v57  ;;  %4522 = vmatmul.mubr.bf16.vlgmr.msra.gmra.mrb[72].mxu1 %v2747_v57  ;;  %v6864_v57 = vld [vmem:[#allocation10 + $0x124] ss:$24 sps:$4 sm:$0xff]  }
 0x543   :  { %2974 = vmatpush1.bf16.msra.mxu0 %v6805_v16  ;;  %4526 = vmatpush3.bf16.msra.mxu1 %v6808_v14  ;;  %7586 = vst [vmem:[#allocation111_spill] sm:$0xff] %v6864_v57 }
 0x544   :  { %2975 = vmatprep.subr.bf16.mxu0 %v6811_v44  ;;  %4527 = vmatprep.subr.bf16.mxu1 %v7442_v50 }
 0x545   :  { %3005 = vmatprep.mubr.bf16.mxu0 %v7482_v18  ;;  %4541 = vmatprep.mubr.msk.bf16.mxu1 %vm5493_vm2, %v7442_v50 }
 0x547   :  { %2976 = vmatpush1.bf16.msra.mxu0 %v6818_v53  ;;  %4528 = vmatpush3.bf16.msra.mxu1 %v6821_v4 }
 0x548   :  { %2977 = vmatprep.subr.bf16.mxu0 %v6824_v37  ;;  %4529 = vmatprep.subr.bf16.mxu1 %v7442_v50 }
 0x54b   :  { %2978 = vmatpush1.bf16.msra.mxu0 %v6828_v28  ;;  %4530 = vmatpush3.bf16.msra.mxu1 %v6831_v27  ;;  %v7596_v27 = vld [vmem:[#allocation51_spill] sm:$0xff] }
 0x54c   :  { %2979 = vmatprep.subr.bf16.mxu0 %v6834_v43  ;;  %4531 = vmatprep.subr.bf16.mxu1 %v7442_v50 }
 0x54f   :  { %2980 = vmatpush1.bf16.msra.mxu0 %v6838_v30  ;;  %4532 = vmatpush3.bf16.msra.mxu1 %v6841_v36  ;;  %v7595_v36 = vld [vmem:[#allocation47_spill] sm:$0xff] }
 0x550   :  { %2981 = vmatprep.subr.bf16.mxu0 %v6844_v20  ;;  %4533 = vmatprep.subr.bf16.mxu1 %v7442_v50 }
 0x553   :  { %2982 = vmatpush1.bf16.msra.mxu0 %v6848_v7  ;;  %4534 = vmatpush3.bf16.msra.mxu1 %v6851_v58 }
 0x554   :  { %2983 = vmatprep.subr.bf16.mxu0 %v6854_v31  ;;  %4535 = vmatprep.subr.bf16.mxu1 %v7442_v50  ;;  %v7594_v31 = vld [vmem:[#allocation50_spill] sm:$0xff] }
 0x557   :  { %2984 = vmatpush1.bf16.msra.mxu0 %v6858_v61  ;;  %4536 = vmatpush3.bf16.msra.mxu1 %v6861_v46 }
 0x558   :  { %2985 = vmatprep.subr.bf16.mxu0 %v6864_v57  ;;  %4537 = vmatprep.subr.bf16.mxu1 %v7442_v50  ;;  %v7593_v57 = vld [vmem:[#allocation46_spill] sm:$0xff] }
 0x55b   :  { %2986 = vmatpush1.bf16.msra.mxu0 %v6868_v2  ;;  %4538 = vmatpush3.bf16.msra.mxu1 %v6871_v51 }
 0x55c   :  { %2987 = vmatprep.subr.bf16.mxu0 %v6874_v13  ;;  %4539 = vmatprep.subr.bf16.mxu1 %v7442_v50 }
 0x55f   :  { %2988 = vmatpush1.bf16.msra.mxu0 %v6878_v60  ;;  %4540 = vmatpush3.bf16.msra.mxu1 %v6881_v56 }
 0x560   :  { %3058 = vmatprep.subr.bf16.mxu0 %v6884_v3  ;;  %4545 = vmatprep.subr.bf16.mxu1 %v7442_v50 }
 0x5db   :  { %v2697_v51 = vpop.f32.mrb[92].mxu0  ;;  %v2740_v2 = vpop.f32.mrb[68].mxu1 }
 0x5dc   :  { %v2838_v13 = vadd.f32 %v7593_v57, %v2697_v51  ;;  %v2699_v46 = vpop.f32.mrb[93].mxu0  ;;  %v4503_v61 = vpop.f32.mrb[69].mxu1 }
 0x5dd   :  { %v2852_v58 = vadd.f32 %v7594_v31, %v2699_v46  ;;  %v2701_v7 = vpop.f32.mrb[94].mxu0  ;;  %v2743_v60 = vpop.f32.mrb[70].mxu1 }
 0x5de   :  { %v4149_v20 = vmul.f32 -1.442695, %v2838_v13  ;;  %v2839_v30 = vadd.f32 %v7595_v36, %v2701_v7  ;;  %v2703_v56 = vpop.f32.mrb[95].mxu0  ;;  %v4504_v43 = vpop.f32.mrb[71].mxu1 }
 0x5df   :  { %v2853_v28 = vadd.f32 %v7596_v27, %v2703_v56  ;;  %v4151_v37 = vmul.f32 -1.442695, %v2852_v58  ;;  %v2866_v43 = vadd.f32 %v6652_v1, %v2740_v2 }
 0x5e0   :  { %5008 = vpow2.f32 %v4149_v20  ;;  %v4150_v3 = vmul.f32 -1.442695, %v2839_v30  ;;  %v7598_v20 = vld [vmem:[#allocation45_spill] sm:$0xff] }
 0x5e1   :  { %v4152_v4 = vmul.f32 -1.442695, %v2853_v28 }
 0x5e2   :  { %5010 = vpow2.f32 %v4150_v3  ;;  %v2867_v3 = vadd.f32 %v6652_v1, %v2743_v60 }
 0x5e3   :  { %5012 = vpow2.f32 %v4151_v37  ;;  %v7597_v37 = vld [vmem:[#allocation44_spill] sm:$0xff] }
 0x5e4   :  { %5014 = vpow2.f32 %v4152_v4 }
 0x5ea   :  { %v5009_v51 = vpop.eup %5008 }
 0x5eb   :  { %v2846_v61 = vadd.f32 1.0, %v5009_v51 }
 0x5ec   :  { %v5011_v57 = vpop.eup %5010 }
 0x5ed   :  { %5016 = vrcp.f32 %v2846_v61  ;;  %v2847_v31 = vadd.f32 1.0, %v5011_v57  ;;  %v5013_v13 = vpop.eup %5012 }
 0x5ee   :  { %v5015_v46 = vpop.eup %5014  ;;  %v2860_v36 = vadd.f32 1.0, %v5013_v13 }
 0x5ef   :  { %5018 = vrcp.f32 %v2847_v31  ;;  %v2861_v7 = vadd.f32 1.0, %v5015_v46 }
 0x5f0   :  { %5020 = vrcp.f32 %v2860_v36 }
 0x5f1   :  { %5022 = vrcp.f32 %v2861_v7  ;;  %v2627_v7 = vmul.f32 %v6785_v40, %v6782_v32 }
 0x5f7   :  { %v5017_v56 = vpop.eup %5016 }
 0x5f8   :  { %v2868_v27 = vmul.f32 %v5017_v56, %v2866_v43 }
 0x5f9   :  { %v5019_v28 = vpop.eup %5018 }
 0x5fa   :  { %v2870_v4 = vadd.f32 %v2868_v27, %v7597_v37  ;;  %v2869_v30 = vmul.f32 %v5019_v28, %v2867_v3  ;;  %v5021_v51 = vpop.eup %5020  ;;  %v2628_v37 = vmul.f32 %v6791_v22, %v6787_v39 }
 0x5fb   :  { %v5023_v61 = vpop.eup %5022  ;;  %v2874_v57 = vsub.f32 1.0, %v5021_v51  ;;  %v2878_v13 = vmul.f32 %v5021_v51, %v6675_v33 }
 0x5fc   :  { %5024 = vtanh.f32 %v2870_v4  ;;  %v2871_v58 = vadd.f32 %v2869_v30, %v7598_v20  ;;  %v2875_v46 = vsub.f32 1.0, %v5023_v61  ;;  %v2879_v56 = vmul.f32 %v5023_v61, %v6678_v21 }
 0x5fe   :  { %5026 = vtanh.f32 %v2871_v58 }
 0x606   :  { %v5025_v31 = vpop.eup %5024 }
 0x607   :  { %v2876_v2 = vmul.f32 %v5025_v31, %v2874_v57 }
 0x608   :  { %v5027_v36 = vpop.eup %5026 }
 0x609   :  { %v2880_v43 = vadd.f32 %v2878_v13, %v2876_v2  ;;  %v2877_v60 = vmul.f32 %v5027_v36, %v2875_v46  ;;  %v7599_v13 = vld [vmem:[#allocation42_spill] sm:$0xff] }
 0x60b   :  { %v2932_v27 = vmul.f32 %v6785_v40, %v2880_v43  ;;  %v2881_v3 = vadd.f32 %v2879_v56, %v2877_v60  ;;  %v2942_v28 = vsub.f32 %v2880_v43, %v6675_v33  ;;  %v7601_v56 = vld [vmem:[#allocation43_spill] sm:$0xff] }
 0x60d   :  { %v3928_v4 = vadd.f32 %v2932_v27, %v2627_v7  ;;  %v2933_v30 = vmul.f32 %v6791_v22, %v2881_v3  ;;  %v2943_v20 = vsub.f32 %v2881_v3, %v6678_v21  ;;  %v2944_v58 = vmul.f32 %v6785_v40, %v2942_v28  ;;  %v7602_v28 = vld [vmem:[#allocation85_spill] sm:$0xff] }
 0x60f   :  { %3944 = vst [vmem:[#allocation15 + $0x40] sm:$0xff] %v3928_v4  ;;  %v3929_v51 = vadd.f32 %v2933_v30, %v2628_v37  ;;  %v2945_v61 = vmul.f32 %v6791_v22, %v2943_v20  ;;  %v6909_v32 = vadd.f32 %v2944_v58, %v6675_v33  ;;  %v7600_v33 = vld [vmem:[#allocation84_spill] sm:$0xff] }
 0x611   :  { %3945 = vst [vmem:[#allocation15 + $0x48] sm:$0xff] %v3929_v51  ;;  %v6912_v57 = vadd.f32 %v2945_v61, %v6678_v21 }
 0x613   :  { %v2972_v39 = vpack.c.bf16 %v6912_v57, %v6909_v32 }
 0x615   :  { %3006 = vmatmul.mubr.bf16.vlgmr.msra.gmra.mrb[100].mxu0 %v2972_v39  ;;  %4542 = vmatmul.mubr.bf16.vlgmr.msra.gmra.mrb[76].mxu1 %v2972_v39  ;;  %v2782_v31 = vpop.f32.mrb[96].mxu0  ;;  %v2825_v2 = vpop.f32.mrb[72].mxu1 }
 0x616   :  { %v2888_v40 = vadd.f32 %v7599_v13, %v2782_v31  ;;  %v2784_v46 = vpop.f32.mrb[97].mxu0  ;;  %v4523_v36 = vpop.f32.mrb[73].mxu1  ;;  %3059 = vmatpush1.bf16.msra.mxu0 %v6685_v47  ;;  %4546 = vmatpush3.bf16.msra.mxu1 %v6688_v19 }
 0x617   :  { %v2902_v22 = vadd.f32 %v7600_v33, %v2784_v46  ;;  %v2786_v43 = vpop.f32.mrb[98].mxu0  ;;  %v2828_v21 = vpop.f32.mrb[74].mxu1  ;;  %3060 = vmatprep.subr.bf16.mxu0 %v6694_v25  ;;  %4547 = vmatprep.subr.bf16.mxu1 %v7442_v50  ;;  %v2916_v46 = vadd.f32 %v6763_v17, %v2825_v2  ;;  %v7604_v2 = vld [vmem:[#allocation87_spill] sm:$0xff] }
 0x618   :  { %v4153_v60 = vmul.f32 -1.442695, %v2888_v40  ;;  %v2889_v7 = vadd.f32 %v7601_v56, %v2786_v43  ;;  %v2788_v27 = vpop.f32.mrb[99].mxu0  ;;  %v4524_v3 = vpop.f32.mrb[75].mxu1  ;;  %3090 = vmatprep.mubr.bf16.mxu0 %v7482_v18  ;;  %4561 = vmatprep.mubr.msk.bf16.mxu1 %vm5493_vm2, %v7442_v50  ;;  %v2917_v43 = vadd.f32 %v6763_v17, %v2828_v21  ;;  %v7603_v56 = vld [vmem:[#allocation86_spill] sm:$0xff] }
 0x619   :  { %v2903_v37 = vadd.f32 %v7602_v28, %v2788_v27  ;;  %v4155_v30 = vmul.f32 -1.442695, %v2902_v22 }
 0x61a   :  { %5028 = vpow2.f32 %v4153_v60  ;;  %v4154_v4 = vmul.f32 -1.442695, %v2889_v7  ;;  %3061 = vmatpush1.bf16.msra.mxu0 %v6703_v6  ;;  %4548 = vmatpush3.bf16.msra.mxu1 %v6706_v23 }
 0x61b   :  { %3062 = vmatprep.subr.bf16.mxu0 %v6709_v29  ;;  %4549 = vmatprep.subr.bf16.mxu1 %v7442_v50  ;;  %v4156_v20 = vmul.f32 -1.442695, %v2903_v37 }
 0x61c   :  { %5030 = vpow2.f32 %v4154_v4 }
 0x61d   :  { %5032 = vpow2.f32 %v4155_v30 }
 0x61e   :  { %3063 = vmatpush1.bf16.msra.mxu0 %v6713_v45  ;;  %4550 = vmatpush3.bf16.msra.mxu1 %v6716_v62  ;;  %5034 = vpow2.f32 %v4156_v20 }
 0x61f   :  { %3064 = vmatprep.subr.bf16.mxu0 %v6719_v55  ;;  %4551 = vmatprep.subr.bf16.mxu1 %v7442_v50 }
 0x622   :  { %3065 = vmatpush1.bf16.msra.mxu0 %v6723_v5  ;;  %4552 = vmatpush3.bf16.msra.mxu1 %v6726_v15 }
 0x623   :  { %3066 = vmatprep.subr.bf16.mxu0 %v6729_v8  ;;  %4553 = vmatprep.subr.bf16.mxu1 %v7442_v50 }
 0x624   :  { %v5029_v58 = vpop.eup %5028 }
 0x625   :  { %v2896_v51 = vadd.f32 1.0, %v5029_v58 }
 0x626   :  { %v5031_v61 = vpop.eup %5030  ;;  %3067 = vmatpush1.bf16.msra.mxu0 %v6733_v26  ;;  %4554 = vmatpush3.bf16.msra.mxu1 %v6736_v38 }
 0x627   :  { %5036 = vrcp.f32 %v2896_v51  ;;  %v2897_v39 = vadd.f32 1.0, %v5031_v61  ;;  %3068 = vmatprep.subr.bf16.mxu0 %v6739_v63  ;;  %4555 = vmatprep.subr.bf16.mxu1 %v7442_v50  ;;  %v5033_v31 = vpop.eup %5032 }
 0x628   :  { %v5035_v13 = vpop.eup %5034  ;;  %v2910_v40 = vadd.f32 1.0, %v5033_v31 }
 0x629   :  { %5038 = vrcp.f32 %v2897_v39  ;;  %v2911_v36 = vadd.f32 1.0, %v5035_v13  ;;  %v2612_v13 = vmul.f32 %v6662_v11, %v6659_v54 }
 0x62a   :  { %3069 = vmatpush1.bf16.msra.mxu0 %v6743_v48  ;;  %4556 = vmatpush3.bf16.msra.mxu1 %v6746_v35  ;;  %5040 = vrcp.f32 %v2910_v40 }
 0x62b   :  { %3070 = vmatprep.subr.bf16.mxu0 %v6749_v9  ;;  %4557 = vmatprep.subr.bf16.mxu1 %v7442_v50  ;;  %5042 = vrcp.f32 %v2911_v36 }
 0x62e   :  { %3071 = vmatpush1.bf16.msra.mxu0 %v6753_v10  ;;  %4558 = vmatpush3.bf16.msra.mxu1 %v6756_v0 }
 0x62f   :  { %3072 = vmatprep.subr.bf16.mxu0 %v6759_v49  ;;  %4559 = vmatprep.subr.bf16.mxu1 %v7442_v50 }
 0x631   :  { %v5037_v33 = vpop.eup %5036 }
 0x632   :  { %v2918_v22 = vmul.f32 %v5037_v33, %v2916_v46  ;;  %3073 = vmatpush1.bf16.msra.mxu0 %v6769_v34  ;;  %4560 = vmatpush3.bf16.msra.mxu1 %v6772_v42  ;;  %v2613_v33 = vmul.f32 %v6668_v24, %v6664_v59 }
 0x633   :  { %v5039_v60 = vpop.eup %5038  ;;  %3283 = vmatprep.subr.bf16.mxu0 %v6775_v12  ;;  %4565 = vmatprep.subr.bf16.mxu1 %v7442_v50 }
 0x634   :  { %v2920_v7 = vadd.f32 %v2918_v22, %v7603_v56  ;;  %v2919_v27 = vmul.f32 %v5039_v60, %v2917_v43  ;;  %v5041_v28 = vpop.eup %5040 }
 0x635   :  { %v5043_v37 = vpop.eup %5042  ;;  %v2924_v21 = vsub.f32 1.0, %v5041_v28  ;;  %v2928_v20 = vmul.f32 %v5041_v28, %v6798_v52  ;;  %v7610_v28 = vld [vmem:[#allocation29_spill] sm:$0xff] }
 0x636   :  { %5044 = vtanh.f32 %v2920_v7  ;;  %v2921_v3 = vadd.f32 %v2919_v27, %v7604_v2  ;;  %v2925_v58 = vsub.f32 1.0, %v5043_v37  ;;  %v2929_v31 = vmul.f32 %v5043_v37, %v6801_v41  ;;  %v7611_v37 = vld [vmem:[#allocation56_spill] sm:$0xff] }
 0x638   :  { %5046 = vtanh.f32 %v2921_v3  ;;  %v7609_v3 = vld [vmem:[#allocation28_spill] sm:$0xff] }
 0x640   :  { %v5045_v4 = vpop.eup %5044 }
 0x641   :  { %v2926_v30 = vmul.f32 %v5045_v4, %v2924_v21  ;;  %v7612_v21 = vld [vmem:[#allocation92_spill] sm:$0xff]  ;;  %v7613_v4 = vld [vmem:[#allocation57_spill] sm:$0xff] }
 0x642   :  { %v5047_v51 = vpop.eup %5046 }
 0x643   :  { %v2930_v61 = vadd.f32 %v2928_v20, %v2926_v30  ;;  %v2927_v39 = vmul.f32 %v5047_v51, %v2925_v58  ;;  %v7614_v30 = vld [vmem:[#allocation93_spill] sm:$0xff]  ;;  %v7615_v20 = vld [vmem:[#allocation94_spill] sm:$0xff]  ;;  %v7616_v58 = vld [vmem:[#allocation95_spill] sm:$0xff] }
 0x644   :  { %v7617_v51 = vld [vmem:[#allocation110_spill] sm:$0xff] }
 0x645   :  { %v2937_v40 = vmul.f32 %v6662_v11, %v2930_v61  ;;  %v2931_v46 = vadd.f32 %v2929_v31, %v2927_v39  ;;  %v2948_v36 = vsub.f32 %v2930_v61, %v6798_v52  ;;  %v7618_v61 = vld [vmem:[#allocation111_spill] sm:$0xff]  ;;  %v7619_v39 = vld [vmem:[#allocation112_spill] sm:$0xff]  ;;  %v7620_v31 = vld [vmem:[#allocation113_spill] sm:$0xff] }
 0x647   :  { %v3926_v22 = vadd.f32 %v2937_v40, %v2612_v13  ;;  %v2938_v43 = vmul.f32 %v6668_v24, %v2931_v46  ;;  %v2949_v60 = vsub.f32 %v2931_v46, %v6801_v41  ;;  %v2950_v56 = vmul.f32 %v6662_v11, %v2948_v36  ;;  %v7605_v11 = vld [vmem:[#allocation30_spill] sm:$0xff]  ;;  %v7622_v40 = vld [vmem:[#allocation115_spill] sm:$0xff]  ;;  %v7623_v46 = vld [vmem:[#allocation116_spill] sm:$0xff] }
 0x648   :  { %v7621_v13 = vld [vmem:[#allocation114_spill] sm:$0xff]  ;;  %v7624_v36 = vld [vmem:[#allocation117_spill] sm:$0xff] }
 0x649   :  { %3942 = vst [vmem:[#allocation15 + $0x30] sm:$0xff] %v3926_v22  ;;  %v3927_v7 = vadd.f32 %v2938_v43, %v2613_v33  ;;  %v2951_v27 = vmul.f32 %v6668_v24, %v2949_v60  ;;  %v6972_v54 = vadd.f32 %v2950_v56, %v6798_v52  ;;  %v7606_v24 = vld [vmem:[#allocation31_spill] sm:$0xff]  ;;  %v7607_v52 = vld [vmem:[#allocation32_spill] sm:$0xff]  ;;  %v7625_v43 = vld [vmem:[#allocation54_spill] sm:$0xff] }
 0x64b   :  { %3943 = vst [vmem:[#allocation15 + $0x38] sm:$0xff] %v3927_v7  ;;  %v6975_v2 = vadd.f32 %v2951_v27, %v6801_v41  ;;  %v7608_v41 = vld [vmem:[#allocation33_spill] sm:$0xff]  ;;  %v7626_v27 = vld [vmem:[#allocation58_spill] sm:$0xff] }
 0x64d   :  { %v3057_v59 = vpack.c.bf16 %v6975_v2, %v6972_v54 }
 0x64f   :  { %3091 = vmatmul.mubr.bf16.vlgmr.msra.gmra.mrb[104].mxu0 %v3057_v59  ;;  %4562 = vmatmul.mubr.bf16.vlgmr.msra.gmra.mrb[80].mxu1 %v3057_v59 }
 0x650   :  { %3284 = vmatpush1.bf16.msra.mxu0 %v6805_v16  ;;  %4566 = vmatpush3.bf16.msra.mxu1 %v6808_v14 }
 0x651   :  { %3285 = vmatprep.subr.bf16.mxu0 %v6811_v44  ;;  %4567 = vmatprep.subr.bf16.mxu1 %v7442_v50 }
 0x652   :  { %3315 = vmatprep.mubr.bf16.mxu0 %v7482_v18  ;;  %4581 = vmatprep.mubr.msk.bf16.mxu1 %vm5493_vm2, %v7442_v50 }
 0x654   :  { %3286 = vmatpush1.bf16.msra.mxu0 %v6818_v53  ;;  %4568 = vmatpush3.bf16.msra.mxu1 %v7605_v11 }
 0x655   :  { %3287 = vmatprep.subr.bf16.mxu0 %v7606_v24  ;;  %4569 = vmatprep.subr.bf16.mxu1 %v7442_v50 }
 0x658   :  { %3288 = vmatpush1.bf16.msra.mxu0 %v7607_v52  ;;  %4570 = vmatpush3.bf16.msra.mxu1 %v7608_v41 }
 0x659   :  { %3289 = vmatprep.subr.bf16.mxu0 %v7609_v3  ;;  %4571 = vmatprep.subr.bf16.mxu1 %v7442_v50 }
 0x65c   :  { %3290 = vmatpush1.bf16.msra.mxu0 %v7610_v28  ;;  %4572 = vmatpush3.bf16.msra.mxu1 %v7611_v37 }
 0x65d   :  { %3291 = vmatprep.subr.bf16.mxu0 %v7612_v21  ;;  %4573 = vmatprep.subr.bf16.mxu1 %v7442_v50 }
 0x660   :  { %3292 = vmatpush1.bf16.msra.mxu0 %v7613_v4  ;;  %4574 = vmatpush3.bf16.msra.mxu1 %v7614_v30 }
 0x661   :  { %3293 = vmatprep.subr.bf16.mxu0 %v7615_v20  ;;  %4575 = vmatprep.subr.bf16.mxu1 %v7442_v50 }
 0x664   :  { %3294 = vmatpush1.bf16.msra.mxu0 %v7616_v58  ;;  %4576 = vmatpush3.bf16.msra.mxu1 %v7617_v51 }
 0x665   :  { %3295 = vmatprep.subr.bf16.mxu0 %v7618_v61  ;;  %4577 = vmatprep.subr.bf16.mxu1 %v7442_v50  ;;  %v7627_v61 = vld [vmem:[#allocation55_spill] sm:$0xff] }
 0x668   :  { %3296 = vmatpush1.bf16.msra.mxu0 %v7619_v39  ;;  %4578 = vmatpush3.bf16.msra.mxu1 %v7620_v31 }
 0x669   :  { %3297 = vmatprep.subr.bf16.mxu0 %v7621_v13  ;;  %4579 = vmatprep.subr.bf16.mxu1 %v7442_v50 }
 0x66c   :  { %3298 = vmatpush1.bf16.msra.mxu0 %v7622_v40  ;;  %4580 = vmatpush3.bf16.msra.mxu1 %v7623_v46  ;;  %v7628_v46 = vld [vmem:[#allocation59_spill] sm:$0xff] }
 0x66d   :  { %3368 = vmatprep.subr.bf16.mxu0 %v7624_v36  ;;  %4585 = vmatprep.subr.bf16.mxu1 %v7442_v50 }
 0x6e8   :  { %v3007_v33 = vpop.f32.mrb[100].mxu0  ;;  %v3050_v22 = vpop.f32.mrb[76].mxu1 }
 0x6e9   :  { %v3148_v60 = vadd.f32 %v7625_v43, %v3007_v33  ;;  %v3009_v56 = vpop.f32.mrb[101].mxu0  ;;  %v4543_v7 = vpop.f32.mrb[77].mxu1 }
 0x6ea   :  { %v3162_v59 = vadd.f32 %v7626_v27, %v3009_v56  ;;  %v3011_v31 = vpop.f32.mrb[102].mxu0  ;;  %v3053_v13 = vpop.f32.mrb[78].mxu1 }
 0x6eb   :  { %v4157_v39 = vmul.f32 -1.442695, %v3148_v60  ;;  %v3149_v51 = vadd.f32 %v7627_v61, %v3011_v31  ;;  %v3013_v40 = vpop.f32.mrb[103].mxu0  ;;  %v4544_v58 = vpop.f32.mrb[79].mxu1 }
 0x6ec   :  { %v3163_v20 = vadd.f32 %v7628_v46, %v3013_v40  ;;  %v4159_v30 = vmul.f32 -1.442695, %v3162_v59  ;;  %v3176_v58 = vadd.f32 %v6652_v1, %v3050_v22 }
 0x6ed   :  { %5048 = vpow2.f32 %v4157_v39  ;;  %v4158_v36 = vmul.f32 -1.442695, %v3149_v51  ;;  %v3177_v51 = vadd.f32 %v6652_v1, %v3053_v13 }
 0x6ee   :  { %v4160_v4 = vmul.f32 -1.442695, %v3163_v20 }
 0x6ef   :  { %5050 = vpow2.f32 %v4158_v36  ;;  %v7630_v36 = vld [vmem:[#allocation53_spill] sm:$0xff] }
 0x6f0   :  { %5052 = vpow2.f32 %v4159_v30  ;;  %v7629_v30 = vld [vmem:[#allocation52_spill] sm:$0xff] }
 0x6f1   :  { %5054 = vpow2.f32 %v4160_v4 }
 0x6f7   :  { %v5049_v33 = vpop.eup %5048 }
 0x6f8   :  { %v3156_v43 = vadd.f32 1.0, %v5049_v33 }
 0x6f9   :  { %v5051_v7 = vpop.eup %5050 }
 0x6fa   :  { %5056 = vrcp.f32 %v3156_v43  ;;  %v3157_v56 = vadd.f32 1.0, %v5051_v7  ;;  %v5053_v60 = vpop.eup %5052 }
 0x6fb   :  { %v5055_v27 = vpop.eup %5054  ;;  %v3170_v61 = vadd.f32 1.0, %v5053_v60 }
 0x6fc   :  { %5058 = vrcp.f32 %v3157_v56  ;;  %v3171_v31 = vadd.f32 1.0, %v5055_v27 }
 0x6fd   :  { %5060 = vrcp.f32 %v3170_v61 }
 0x6fe   :  { %5062 = vrcp.f32 %v3171_v31 }
 0x704   :  { %v5057_v40 = vpop.eup %5056 }
 0x705   :  { %v3178_v39 = vmul.f32 %v5057_v40, %v3176_v58  ;;  %v7631_v40 = vld [vmem:[#allocation106_spill] sm:$0xff] }
 0x706   :  { %v5059_v20 = vpop.eup %5058 }
 0x707   :  { %v3180_v4 = vadd.f32 %v3178_v39, %v7629_v30  ;;  %v3179_v46 = vmul.f32 %v5059_v20, %v3177_v51  ;;  %v5061_v33 = vpop.eup %5060  ;;  %v7632_v39 = vld [vmem:[#allocation107_spill] sm:$0xff] }
 0x708   :  { %v5063_v43 = vpop.eup %5062  ;;  %v3184_v7 = vsub.f32 1.0, %v5061_v33  ;;  %v3188_v60 = vmul.f32 %v5061_v33, %v6909_v32  ;;  %v2279_v31 = vmul.f32 %v7632_v39, %v7631_v40 }
 0x709   :  { %5064 = vtanh.f32 %v3180_v4  ;;  %v3181_v59 = vadd.f32 %v3179_v46, %v7630_v36  ;;  %v3185_v27 = vsub.f32 1.0, %v5063_v43  ;;  %v3189_v13 = vmul.f32 %v5063_v43, %v6912_v57  ;;  %v7633_v4 = vld [vmem:[#allocation108_spill] sm:$0xff]  ;;  %v7634_v46 = vld [vmem:[#allocation109_spill] sm:$0xff] }
 0x70a   :  { %v2280_v36 = vmul.f32 %v7634_v46, %v7633_v4  ;;  %v7637_v4 = vld [vmem:[#allocation35_spill] sm:$0xff] }
 0x70b   :  { %5066 = vtanh.f32 %v3181_v59 }
 0x713   :  { %v5065_v56 = vpop.eup %5064 }
 0x714   :  { %v3186_v22 = vmul.f32 %v5065_v56, %v3184_v7 }
 0x715   :  { %v5067_v61 = vpop.eup %5066 }
 0x716   :  { %v3190_v58 = vadd.f32 %v3188_v60, %v3186_v22  ;;  %v3187_v1 = vmul.f32 %v5067_v61, %v3185_v27 }
 0x718   :  { %v3242_v51 = vmul.f32 %v7632_v39, %v3190_v58  ;;  %v3191_v20 = vadd.f32 %v3189_v13, %v3187_v1  ;;  %v3252_v30 = vsub.f32 %v3190_v58, %v6909_v32  ;;  %v7635_v13 = vld [vmem:[#allocation34_spill] sm:$0xff] }
 0x71a   :  { %v3930_v59 = vadd.f32 %v3242_v51, %v2279_v31  ;;  %v3243_v33 = vmul.f32 %v7634_v46, %v3191_v20  ;;  %v3253_v7 = vsub.f32 %v3191_v20, %v6912_v57  ;;  %v3254_v56 = vmul.f32 %v7632_v39, %v3252_v30 }
 0x71c   :  { %3946 = vst [vmem:[#allocation15 + $0x50] sm:$0xff] %v3930_v59  ;;  %v3931_v43 = vadd.f32 %v3243_v33, %v2280_v36  ;;  %v3255_v22 = vmul.f32 %v7634_v46, %v3253_v7  ;;  %v7035_v60 = vadd.f32 %v3254_v56, %v6909_v32  ;;  %v7636_v32 = vld [vmem:[#allocation80_spill] sm:$0xff] }
 0x71e   :  { %3947 = vst [vmem:[#allocation15 + $0x58] sm:$0xff] %v3931_v43  ;;  %v7038_v27 = vadd.f32 %v3255_v22, %v6912_v57 }
 0x720   :  { %v3282_v61 = vpack.c.bf16 %v7038_v27, %v7035_v60 }
 0x722   :  { %3316 = vmatmul.mubr.bf16.vlgmr.msra.gmra.mrb[108].mxu0 %v3282_v61  ;;  %4582 = vmatmul.mubr.bf16.vlgmr.msra.gmra.mrb[84].mxu1 %v3282_v61  ;;  %v3092_v58 = vpop.f32.mrb[104].mxu0  ;;  %v3135_v1 = vpop.f32.mrb[80].mxu1 }
 0x723   :  { %v3198_v40 = vadd.f32 %v7635_v13, %v3092_v58  ;;  %v3094_v39 = vpop.f32.mrb[105].mxu0  ;;  %v4563_v31 = vpop.f32.mrb[81].mxu1  ;;  %3369 = vmatpush1.bf16.msra.mxu0 %v6685_v47  ;;  %4586 = vmatpush3.bf16.msra.mxu1 %v6688_v19  ;;  %v7638_v47 = vld [vmem:[#allocation81_spill] sm:$0xff] }
 0x724   :  { %v3212_v51 = vadd.f32 %v7636_v32, %v3094_v39  ;;  %v3096_v20 = vpop.f32.mrb[106].mxu0  ;;  %v3138_v57 = vpop.f32.mrb[82].mxu1  ;;  %3370 = vmatprep.subr.bf16.mxu0 %v6694_v25  ;;  %4587 = vmatprep.subr.bf16.mxu1 %v7442_v50 }
 0x725   :  { %v4161_v30 = vmul.f32 -1.442695, %v3198_v40  ;;  %v3199_v46 = vadd.f32 %v7637_v4, %v3096_v20  ;;  %v3098_v36 = vpop.f32.mrb[107].mxu0  ;;  %v4564_v59 = vpop.f32.mrb[83].mxu1  ;;  %3400 = vmatprep.mubr.bf16.mxu0 %v7482_v18  ;;  %4601 = vmatprep.mubr.msk.bf16.mxu1 %vm5493_vm2, %v7442_v50  ;;  %v7641_v40 = vld [vmem:[#allocation104_spill] sm:$0xff] }
 0x726   :  { %v3213_v19 = vadd.f32 %v7638_v47, %v3098_v36  ;;  %v4163_v25 = vmul.f32 -1.442695, %v3212_v51  ;;  %v3892_v51 = vld [vmem:[#allocation15 + $0x20] sm:$0xff]  ;;  %v3893_v36 = vld [vmem:[#allocation15 + $0x28] sm:$0xff] }
 0x727   :  { %5068 = vpow2.f32 %v4161_v30  ;;  %v4162_v33 = vmul.f32 -1.442695, %v3199_v46  ;;  %3371 = vmatpush1.bf16.msra.mxu0 %v6703_v6  ;;  %4588 = vmatpush3.bf16.msra.mxu1 %v6706_v23 }
 0x728   :  { %3372 = vmatprep.subr.bf16.mxu0 %v6709_v29  ;;  %4589 = vmatprep.subr.bf16.mxu1 %v7442_v50  ;;  %v4164_v7 = vmul.f32 -1.442695, %v3213_v19 }
 0x729   :  { %5070 = vpow2.f32 %v4162_v33 }
 0x72a   :  { %5072 = vpow2.f32 %v4163_v25 }
 0x72b   :  { %3373 = vmatpush1.bf16.msra.mxu0 %v6713_v45  ;;  %4590 = vmatpush3.bf16.msra.mxu1 %v6716_v62  ;;  %5074 = vpow2.f32 %v4164_v7  ;;  %v7655_v7 = vld [vmem:[#allocation64_spill] sm:$0xff] }
 0x72c   :  { %3374 = vmatprep.subr.bf16.mxu0 %v6719_v55  ;;  %4591 = vmatprep.subr.bf16.mxu1 %v7442_v50 }
 0x72f   :  { %3375 = vmatpush1.bf16.msra.mxu0 %v6723_v5  ;;  %4592 = vmatpush3.bf16.msra.mxu1 %v6726_v15  ;;  %v3226_v15 = vadd.f32 %v6763_v17, %v3135_v1 }
 0x730   :  { %3376 = vmatprep.subr.bf16.mxu0 %v6729_v8  ;;  %4593 = vmatprep.subr.bf16.mxu1 %v7442_v50 }
 0x731   :  { %v5069_v6 = vpop.eup %5068 }
 0x732   :  { %v3206_v23 = vadd.f32 1.0, %v5069_v6 }
 0x733   :  { %v5071_v29 = vpop.eup %5070  ;;  %3377 = vmatpush1.bf16.msra.mxu0 %v6733_v26  ;;  %4594 = vmatpush3.bf16.msra.mxu1 %v6736_v38 }
 0x734   :  { %5076 = vrcp.f32 %v3206_v23  ;;  %v3207_v45 = vadd.f32 1.0, %v5071_v29  ;;  %3378 = vmatprep.subr.bf16.mxu0 %v6739_v63  ;;  %4595 = vmatprep.subr.bf16.mxu1 %v7442_v50  ;;  %v5073_v62 = vpop.eup %5072  ;;  %v3227_v63 = vadd.f32 %v6763_v17, %v3138_v57  ;;  %v7642_v57 = vld [vmem:[#allocation105_spill] sm:$0xff] }
 0x735   :  { %v5075_v55 = vpop.eup %5074  ;;  %v3220_v5 = vadd.f32 1.0, %v5073_v62 }
 0x736   :  { %5078 = vrcp.f32 %v3207_v45  ;;  %v3221_v8 = vadd.f32 1.0, %v5075_v55  ;;  %v7656_v45 = vld [vmem:[#allocation65_spill] sm:$0xff] }
 0x737   :  { %3379 = vmatpush1.bf16.msra.mxu0 %v6743_v48  ;;  %4596 = vmatpush3.bf16.msra.mxu1 %v6746_v35  ;;  %5080 = vrcp.f32 %v3220_v5  ;;  %v7639_v35 = vld [vmem:[#allocation82_spill] sm:$0xff] }
 0x738   :  { %3380 = vmatprep.subr.bf16.mxu0 %v6749_v9  ;;  %4597 = vmatprep.subr.bf16.mxu1 %v7442_v50  ;;  %5082 = vrcp.f32 %v3221_v8  ;;  %v7657_v8 = vld [vmem:[#allocation66_spill] sm:$0xff] }
 0x73b   :  { %3381 = vmatpush1.bf16.msra.mxu0 %v6753_v10  ;;  %4598 = vmatpush3.bf16.msra.mxu1 %v6756_v0  ;;  %v7640_v0 = vld [vmem:[#allocation83_spill] sm:$0xff] }
 0x73c   :  { %3382 = vmatprep.subr.bf16.mxu0 %v6759_v49  ;;  %4599 = vmatprep.subr.bf16.mxu1 %v7442_v50 }
 0x73e   :  { %v5077_v26 = vpop.eup %5076 }
 0x73f   :  { %v3228_v38 = vmul.f32 %v5077_v26, %v3226_v15  ;;  %3383 = vmatpush1.bf16.msra.mxu0 %v6769_v34  ;;  %4600 = vmatpush3.bf16.msra.mxu1 %v6772_v42 }
 0x740   :  { %v5079_v48 = vpop.eup %5078  ;;  %3593 = vmatprep.subr.bf16.mxu0 %v6775_v12  ;;  %4605 = vmatprep.subr.bf16.mxu1 %v7442_v50 }
 0x741   :  { %v3230_v9 = vadd.f32 %v3228_v38, %v7639_v35  ;;  %v3229_v10 = vmul.f32 %v5079_v48, %v3227_v63  ;;  %v5081_v56 = vpop.eup %5080  ;;  %v7658_v48 = vld [vmem:[#allocation67_spill] sm:$0xff] }
 0x742   :  { %v5083_v43 = vpop.eup %5082  ;;  %v3234_v17 = vsub.f32 1.0, %v5081_v56  ;;  %v3238_v42 = vmul.f32 %v5081_v56, %v6972_v54 }
 0x743   :  { %5084 = vtanh.f32 %v3230_v9  ;;  %v3231_v49 = vadd.f32 %v3229_v10, %v7640_v0  ;;  %v3235_v61 = vsub.f32 1.0, %v5083_v43  ;;  %v3239_v13 = vmul.f32 %v5083_v43, %v6975_v2 }
 0x745   :  { %5086 = vtanh.f32 %v3231_v49 }
 0x74d   :  { %v5085_v22 = vpop.eup %5084 }
 0x74e   :  { %v3236_v34 = vmul.f32 %v5085_v22, %v3234_v17 }
 0x74f   :  { %v5087_v58 = vpop.eup %5086 }
 0x750   :  { %v3240_v12 = vadd.f32 %v3238_v42, %v3236_v34  ;;  %v3237_v1 = vmul.f32 %v5087_v58, %v3235_v61  ;;  %v7140_v61 = vld [vmem:[#allocation13] ss:$0 sm:$0xff] }
 0x752   :  { %v3247_v39 = vmul.f32 %v7641_v40, %v3240_v12  ;;  %v3241_v31 = vadd.f32 %v3239_v13, %v3237_v1  ;;  %v3258_v32 = vsub.f32 %v3240_v12, %v6972_v54 }
 0x754   :  { %v3924_v20 = vadd.f32 %v3892_v51, %v3247_v39  ;;  %v3248_v30 = vmul.f32 %v7642_v57, %v3241_v31  ;;  %v3259_v4 = vsub.f32 %v3241_v31, %v6975_v2  ;;  %v3260_v46 = vmul.f32 %v7641_v40, %v3258_v32  ;;  %v7659_v31 = vld [vmem:[#allocation60_spill] sm:$0xff] }
 0x756   :  { %3940 = vst [vmem:[#allocation15 + $0x20] sm:$0xff] %v3924_v20  ;;  %v3925_v59 = vadd.f32 %v3893_v36, %v3248_v30  ;;  %v3261_v47 = vmul.f32 %v7642_v57, %v3259_v4  ;;  %v7094_v19 = vadd.f32 %v3260_v46, %v6972_v54  ;;  %v7647_v54 = vld [vmem:[#allocation110_spill] sm:$0xff]  ;;  %v7660_v20 = vld [vmem:[#allocation61_spill] sm:$0xff] }
 0x758   :  { %3941 = vst [vmem:[#allocation15 + $0x28] sm:$0xff] %v3925_v59  ;;  %v7097_v33 = vadd.f32 %v3261_v47, %v6975_v2  ;;  %v7648_v2 = vld [vmem:[#allocation111_spill] sm:$0xff] }
 0x75a   :  { %v3367_v25 = vpack.c.bf16 %v7097_v33, %v7094_v19 }
 0x75c   :  { %3401 = vmatmul.mubr.bf16.vlgmr.msra.gmra.mrb[112].mxu0 %v3367_v25  ;;  %4602 = vmatmul.mubr.bf16.vlgmr.msra.gmra.mrb[88].mxu1 %v3367_v25 }
 0x75d   :  { %3594 = vmatpush1.bf16.msra.mxu0 %v6805_v16  ;;  %4606 = vmatpush3.bf16.msra.mxu1 %v6808_v14  ;;  %v7643_v16 = vld [vmem:[#allocation57_spill] sm:$0xff] }
 0x75e   :  { %3595 = vmatprep.subr.bf16.mxu0 %v6811_v44  ;;  %4607 = vmatprep.subr.bf16.mxu1 %v7442_v50  ;;  %v7644_v14 = vld [vmem:[#allocation93_spill] sm:$0xff]  ;;  %v7645_v44 = vld [vmem:[#allocation94_spill] sm:$0xff] }
 0x75f   :  { %3625 = vmatprep.mubr.bf16.mxu0 %v7482_v18  ;;  %4621 = vmatprep.mubr.msk.bf16.mxu1 %vm5493_vm2, %v7442_v50 }
 0x761   :  { %3596 = vmatpush1.bf16.msra.mxu0 %v6818_v53  ;;  %4608 = vmatpush3.bf16.msra.mxu1 %v7605_v11  ;;  %v7646_v53 = vld [vmem:[#allocation95_spill] sm:$0xff]  ;;  %v7649_v11 = vld [vmem:[#allocation112_spill] sm:$0xff] }
 0x762   :  { %3597 = vmatprep.subr.bf16.mxu0 %v7606_v24  ;;  %4609 = vmatprep.subr.bf16.mxu1 %v7442_v50  ;;  %v7650_v24 = vld [vmem:[#allocation113_spill] sm:$0xff] }
 0x765   :  { %3598 = vmatpush1.bf16.msra.mxu0 %v7607_v52  ;;  %4610 = vmatpush3.bf16.msra.mxu1 %v7608_v41  ;;  %v7651_v52 = vld [vmem:[#allocation114_spill] sm:$0xff]  ;;  %v7652_v41 = vld [vmem:[#allocation115_spill] sm:$0xff] }
 0x766   :  { %3599 = vmatprep.subr.bf16.mxu0 %v7609_v3  ;;  %4611 = vmatprep.subr.bf16.mxu1 %v7442_v50  ;;  %v7653_v3 = vld [vmem:[#allocation116_spill] sm:$0xff] }
 0x769   :  { %3600 = vmatpush1.bf16.msra.mxu0 %v7610_v28  ;;  %4612 = vmatpush3.bf16.msra.mxu1 %v7611_v37  ;;  %v7654_v28 = vld [vmem:[#allocation117_spill] sm:$0xff] }
 0x76a   :  { %3601 = vmatprep.subr.bf16.mxu0 %v7612_v21  ;;  %4613 = vmatprep.subr.bf16.mxu1 %v7442_v50 }
 0x76d   :  { %3602 = vmatpush1.bf16.msra.mxu0 %v7643_v16  ;;  %4614 = vmatpush3.bf16.msra.mxu1 %v7644_v14 }
 0x76e   :  { %3603 = vmatprep.subr.bf16.mxu0 %v7645_v44  ;;  %4615 = vmatprep.subr.bf16.mxu1 %v7442_v50 }
 0x771   :  { %3604 = vmatpush1.bf16.msra.mxu0 %v7646_v53  ;;  %4616 = vmatpush3.bf16.msra.mxu1 %v7647_v54  ;;  %v7661_v54 = vld [vmem:[#allocation98_spill] sm:$0xff] }
 0x772   :  { %3605 = vmatprep.subr.bf16.mxu0 %v7648_v2  ;;  %4617 = vmatprep.subr.bf16.mxu1 %v7442_v50  ;;  %v7662_v2 = vld [vmem:[#allocation99_spill] sm:$0xff] }
 0x775   :  { %3606 = vmatpush1.bf16.msra.mxu0 %v7649_v11  ;;  %4618 = vmatpush3.bf16.msra.mxu1 %v7650_v24  ;;  %v1931_v11 = vmul.f32 %v7662_v2, %v7661_v54  ;;  %v5284_v54 = vld [vmem:[#allocation10 + $0x130] ss:$24 sps:$4 sm:$0xff]  }
 0x776   :  { %3607 = vmatprep.subr.bf16.mxu0 %v7651_v52  ;;  %4619 = vmatprep.subr.bf16.mxu1 %v7442_v50 }
 0x779   :  { %3608 = vmatpush1.bf16.msra.mxu0 %v7652_v41  ;;  %4620 = vmatpush3.bf16.msra.mxu1 %v7653_v3  ;;  %v7663_v3 = vld [vmem:[#allocation124_spill] sm:$0xff] }
 0x77a   :  { %3678 = vmatprep.subr.bf16.mxu0 %v7654_v28  ;;  %4625 = vmatprep.subr.bf16.mxu1 %v7442_v50  ;;  %v7664_v28 = vld [vmem:[#allocation125_spill] sm:$0xff] }
 0x7f5   :  { %v3317_v37 = vpop.f32.mrb[108].mxu0  ;;  %v3360_v21 = vpop.f32.mrb[84].mxu1 }
 0x7f6   :  { %v3458_v6 = vadd.f32 %v7655_v7, %v3317_v37  ;;  %v3319_v23 = vpop.f32.mrb[109].mxu0  ;;  %v4583_v29 = vpop.f32.mrb[85].mxu1  ;;  %v3486_v58 = vadd.f32 %v7140_v61, %v3360_v21  ;;  %v1932_v37 = vmul.f32 %v7664_v28, %v7663_v3  ;;  %v7184_v3 = vld [vmem:[#allocation13 + $0x1] ss:$0 sm:$0xff] }
 0x7f7   :  { %v3472_v62 = vadd.f32 %v7656_v45, %v3319_v23  ;;  %v3321_v55 = vpop.f32.mrb[110].mxu0  ;;  %v3363_v5 = vpop.f32.mrb[86].mxu1 }
 0x7f8   :  { %v4165_v15 = vmul.f32 -1.442695, %v3458_v6  ;;  %v3459_v26 = vadd.f32 %v7657_v8, %v3321_v55  ;;  %v3323_v38 = vpop.f32.mrb[111].mxu0  ;;  %v4584_v63 = vpop.f32.mrb[87].mxu1  ;;  %v3487_v40 = vadd.f32 %v7140_v61, %v3363_v5 }
 0x7f9   :  { %v3473_v35 = vadd.f32 %v7658_v48, %v3323_v38  ;;  %v4167_v10 = vmul.f32 -1.442695, %v3472_v62 }
 0x7fa   :  { %5088 = vpow2.f32 %v4165_v15  ;;  %v4166_v9 = vmul.f32 -1.442695, %v3459_v26  ;;  %v7665_v26 = vld [vmem:[#allocation26_spill] sm:$0xff] }
 0x7fb   :  { %v4168_v0 = vmul.f32 -1.442695, %v3473_v35  ;;  %v5267_v35 = vld [vmem:[#allocation10 + $0xc] ss:$24 sps:$4 sm:$0xff]  }
 0x7fc   :  { %5090 = vpow2.f32 %v4166_v9  ;;  %v5268_v9 = vld [vmem:[#allocation10 + $0x14] ss:$24 sps:$4 sm:$0xff]  }
 0x7fd   :  { %5092 = vpow2.f32 %v4167_v10 }
 0x7fe   :  { %5094 = vpow2.f32 %v4168_v0 }
 0x804   :  { %v5089_v49 = vpop.eup %5088 }
 0x805   :  { %v3466_v56 = vadd.f32 1.0, %v5089_v49  ;;  %v5269_v49 = vld [vmem:[#allocation10 + $0x40] ss:$24 sps:$4 sm:$0xff]  }
 0x806   :  { %v5091_v43 = vpop.eup %5090 }
 0x807   :  { %5096 = vrcp.f32 %v3466_v56  ;;  %v3467_v17 = vadd.f32 1.0, %v5091_v43  ;;  %v5093_v22 = vpop.eup %5092  ;;  %v7667_v43 = vld [vmem:[#allocation27_spill] sm:$0xff] }
 0x808   :  { %v5095_v34 = vpop.eup %5094  ;;  %v3480_v42 = vadd.f32 1.0, %v5093_v22 }
 0x809   :  { %5098 = vrcp.f32 %v3467_v17  ;;  %v3481_v12 = vadd.f32 1.0, %v5095_v34 }
 0x80a   :  { %5100 = vrcp.f32 %v3480_v42  ;;  %v7668_v42 = vld [vmem:[#allocation77_spill] sm:$0xff] }
 0x80b   :  { %5102 = vrcp.f32 %v3481_v12 }
 0x811   :  { %v5097_v1 = vpop.eup %5096 }
 0x812   :  { %v3488_v13 = vmul.f32 %v5097_v1, %v3486_v58  ;;  %v5270_v1 = vld [vmem:[#allocation10 + $0x3c] ss:$24 sps:$4 sm:$0xff]  }
 0x813   :  { %v5099_v39 = vpop.eup %5098 }
 0x814   :  { %v3490_v32 = vadd.f32 %v3488_v13, %v7659_v31  ;;  %v3489_v51 = vmul.f32 %v5099_v39, %v3487_v40  ;;  %v5101_v30 = vpop.eup %5100  ;;  %v5271_v13 = vld [vmem:[#allocation10 + $0x44] ss:$24 sps:$4 sm:$0xff]   ;;  %v5272_v40 = vld [vmem:[#allocation10 + $0x70] ss:$24 sps:$4 sm:$0xff]  }
 0x815   :  { %v5103_v4 = vpop.eup %5102  ;;  %v3494_v46 = vsub.f32 1.0, %v5101_v30  ;;  %v3498_v47 = vmul.f32 %v5101_v30, %v7035_v60  ;;  %v5273_v31 = vld [vmem:[#allocation10 + $0x6c] ss:$24 sps:$4 sm:$0xff]   ;;  %v5278_v30 = vld [vmem:[#allocation10 + $0xd0] ss:$24 sps:$4 sm:$0xff]  }
 0x816   :  { %5104 = vtanh.f32 %v3490_v32  ;;  %v3491_v57 = vadd.f32 %v3489_v51, %v7660_v20  ;;  %v3495_v25 = vsub.f32 1.0, %v5103_v4  ;;  %v3499_v53 = vmul.f32 %v5103_v4, %v7038_v27  ;;  %v5275_v51 = vld [vmem:[#allocation10 + $0xa0] ss:$24 sps:$4 sm:$0xff]   ;;  %v5276_v20 = vld [vmem:[#allocation10 + $0x9c] ss:$24 sps:$4 sm:$0xff]  }
 0x818   :  { %5106 = vtanh.f32 %v3491_v57  ;;  %v5277_v57 = vld [vmem:[#allocation10 + $0xa4] ss:$24 sps:$4 sm:$0xff]  }
 0x820   :  { %v5105_v36 = vpop.eup %5104 }
 0x821   :  { %v3496_v59 = vmul.f32 %v5105_v36, %v3494_v46 }
 0x822   :  { %v5107_v16 = vpop.eup %5106 }
 0x823   :  { %v3500_v14 = vadd.f32 %v3498_v47, %v3496_v59  ;;  %v3497_v44 = vmul.f32 %v5107_v16, %v3495_v25  ;;  %v5279_v59 = vld [vmem:[#allocation10 + $0xcc] ss:$24 sps:$4 sm:$0xff]   ;;  %v5281_v16 = vld [vmem:[#allocation10 + $0x100] ss:$24 sps:$4 sm:$0xff]  }
 0x824   :  { %v5280_v47 = vld [vmem:[#allocation10 + $0xd4] ss:$24 sps:$4 sm:$0xff]  }
 0x825   :  { %v3552_v24 = vmul.f32 %v7662_v2, %v3500_v14  ;;  %v3501_v52 = vadd.f32 %v3499_v53, %v3497_v44  ;;  %v3562_v41 = vsub.f32 %v3500_v14, %v7035_v60  ;;  %v5282_v14 = vld [vmem:[#allocation10 + $0xfc] ss:$24 sps:$4 sm:$0xff]  }
 0x826   :  { %v5283_v44 = vld [vmem:[#allocation10 + $0x104] ss:$24 sps:$4 sm:$0xff]  }
 0x827   :  { %v3932_v21 = vadd.f32 %v3552_v24, %v1931_v11  ;;  %v3553_v7 = vmul.f32 %v7664_v28, %v3501_v52  ;;  %v3563_v6 = vsub.f32 %v3501_v52, %v7038_v27  ;;  %v3564_v23 = vmul.f32 %v7662_v2, %v3562_v41  ;;  %v5285_v24 = vld [vmem:[#allocation10 + $0x12c] ss:$24 sps:$4 sm:$0xff]   ;;  %v5287_v41 = vld [vmem:[#allocation10 + $0x160] ss:$24 sps:$4 sm:$0xff]  }
 0x828   :  { %v5286_v52 = vld [vmem:[#allocation10 + $0x134] ss:$24 sps:$4 sm:$0xff]  }
 0x829   :  { %3948 = vst [vmem:[#allocation15 + $0x60] sm:$0xff] %v3932_v21  ;;  %v3933_v29 = vadd.f32 %v3553_v7, %v1932_v37  ;;  %v3565_v45 = vmul.f32 %v7664_v28, %v3563_v6  ;;  %v7159_v62 = vadd.f32 %v3564_v23, %v7035_v60  ;;  %v7666_v60 = vld [vmem:[#allocation76_spill] sm:$0xff]  ;;  %v5289_v23 = vld [vmem:[#allocation10 + $0x15c] ss:$24 sps:$4 sm:$0xff]  }
 0x82b   :  { %3949 = vst [vmem:[#allocation15 + $0x68] sm:$0xff] %v3933_v29  ;;  %v7162_v55 = vadd.f32 %v3565_v45, %v7038_v27  ;;  %v5290_v29 = vld [vmem:[#allocation10 + $0x164] ss:$24 sps:$4 sm:$0xff]  }
 0x82d   :  { %v3592_v5 = vpack.c.bf16 %v7162_v55, %v7159_v62 }
 0x82f   :  { %3626 = vmatmul.mubr.bf16.vlgmr.msra.gmra.mrb[116].mxu0 %v3592_v5  ;;  %4622 = vmatmul.mubr.bf16.vlgmr.msra.gmra.mrb[92].mxu1 %v3592_v5  ;;  %v3402_v15 = vpop.f32.mrb[112].mxu0  ;;  %v7166_v8 = vpop.f32.mrb[88].mxu1  ;;  %v7669_v5 = vld [vmem:[#allocation78_spill] sm:$0xff] }
 0x830   :  { %v3508_v38 = vadd.f32 %v7665_v26, %v3402_v15  ;;  %v3404_v63 = vpop.f32.mrb[113].mxu0  ;;  %v4603_v48 = vpop.f32.mrb[89].mxu1  ;;  %3679 = vmatpush1.bf16.msra.mxu0 %v5267_v35  ;;  %4626 = vmatpush3.bf16.msra.mxu1 %v5268_v9  ;;  %v3536_v28 = vadd.f32 %v7184_v3, %v7166_v8  ;;  %v7670_v26 = vld [vmem:[#allocation79_spill] sm:$0xff] }
 0x831   :  { %v3522_v10 = vadd.f32 %v7666_v60, %v3404_v63  ;;  %v3406_v27 = vpop.f32.mrb[114].mxu0  ;;  %v7170_v0 = vpop.f32.mrb[90].mxu1  ;;  %3680 = vmatprep.subr.bf16.mxu0 %v5269_v49  ;;  %4627 = vmatprep.subr.bf16.mxu1 %v7442_v50 }
 0x832   :  { %v4169_v56 = vmul.f32 -1.442695, %v3508_v38  ;;  %v3509_v17 = vadd.f32 %v7667_v43, %v3406_v27  ;;  %v3408_v22 = vpop.f32.mrb[115].mxu0  ;;  %v4604_v34 = vpop.f32.mrb[91].mxu1  ;;  %3710 = vmatprep.mubr.bf16.mxu0 %v7482_v18  ;;  %4641 = vmatprep.mubr.msk.bf16.mxu1 %vm5493_vm2, %v7442_v50  ;;  %v5274_v18 = vld [vmem:[#allocation10 + $0x74] ss:$24 sps:$4 sm:$0xff]   ;;  %v3537_v6 = vadd.f32 %v7184_v3, %v7170_v0 }
 0x833   :  { %v3523_v58 = vadd.f32 %v7668_v42, %v3408_v22  ;;  %v4171_v39 = vmul.f32 -1.442695, %v3522_v10  ;;  %v7671_v43 = vld [vmem:[#allocation122_spill] sm:$0xff] }
 0x834   :  { %5108 = vpow2.f32 %v4169_v56  ;;  %v4170_v12 = vmul.f32 -1.442695, %v3509_v17  ;;  %3681 = vmatpush1.bf16.msra.mxu0 %v5270_v1  ;;  %4628 = vmatpush3.bf16.msra.mxu1 %v5271_v13  ;;  %v3890_v42 = vld [vmem:[#allocation15 + $0x10] sm:$0xff] }
 0x835   :  { %3682 = vmatprep.subr.bf16.mxu0 %v5272_v40  ;;  %4629 = vmatprep.subr.bf16.mxu1 %v7442_v50  ;;  %v4172_v32 = vmul.f32 -1.442695, %v3523_v58 }
 0x836   :  { %5110 = vpow2.f32 %v4170_v12  ;;  %v7672_v12 = vld [vmem:[#allocation123_spill] sm:$0xff] }
 0x837   :  { %5112 = vpow2.f32 %v4171_v39  ;;  %v3891_v39 = vld [vmem:[#allocation15 + $0x18] sm:$0xff] }
 0x838   :  { %3683 = vmatpush1.bf16.msra.mxu0 %v5273_v31  ;;  %4630 = vmatpush3.bf16.msra.mxu1 %v5274_v18  ;;  %5114 = vpow2.f32 %v4172_v32 }
 0x839   :  { %3684 = vmatprep.subr.bf16.mxu0 %v5275_v51  ;;  %4631 = vmatprep.subr.bf16.mxu1 %v7442_v50 }
 0x83c   :  { %3685 = vmatpush1.bf16.msra.mxu0 %v5276_v20  ;;  %4632 = vmatpush3.bf16.msra.mxu1 %v5277_v57 }
 0x83d   :  { %3686 = vmatprep.subr.bf16.mxu0 %v5278_v30  ;;  %4633 = vmatprep.subr.bf16.mxu1 %v7442_v50 }
 0x83e   :  { %v5109_v4 = vpop.eup %5108 }
 0x83f   :  { %v3516_v46 = vadd.f32 1.0, %v5109_v4  ;;  %v7673_v4 = vld [vmem:[#allocation68_spill] sm:$0xff] }
 0x840   :  { %v5111_v36 = vpop.eup %5110  ;;  %3687 = vmatpush1.bf16.msra.mxu0 %v5279_v59  ;;  %4634 = vmatpush3.bf16.msra.mxu1 %v5280_v47  ;;  %v7674_v47 = vld [vmem:[#allocation69_spill] sm:$0xff] }
 0x841   :  { %5116 = vrcp.f32 %v3516_v46  ;;  %v3517_v25 = vadd.f32 1.0, %v5111_v36  ;;  %3688 = vmatprep.subr.bf16.mxu0 %v5281_v16  ;;  %4635 = vmatprep.subr.bf16.mxu1 %v7442_v50  ;;  %v5113_v53 = vpop.eup %5112 }
 0x842   :  { %v5115_v2 = vpop.eup %5114  ;;  %v3530_v11 = vadd.f32 1.0, %v5113_v53 }
 0x843   :  { %5118 = vrcp.f32 %v3517_v25  ;;  %v3531_v37 = vadd.f32 1.0, %v5115_v2  ;;  %v7676_v2 = vld [vmem:[#allocation71_spill] sm:$0xff] }
 0x844   :  { %3689 = vmatpush1.bf16.msra.mxu0 %v5282_v14  ;;  %4636 = vmatpush3.bf16.msra.mxu1 %v5283_v44  ;;  %5120 = vrcp.f32 %v3530_v11  ;;  %v7675_v44 = vld [vmem:[#allocation70_spill] sm:$0xff] }
 0x845   :  { %3690 = vmatprep.subr.bf16.mxu0 %v5284_v54  ;;  %4637 = vmatprep.subr.bf16.mxu1 %v7442_v50  ;;  %5122 = vrcp.f32 %v3531_v37 }
 0x848   :  { %3691 = vmatpush1.bf16.msra.mxu0 %v5285_v24  ;;  %4638 = vmatpush3.bf16.msra.mxu1 %v5286_v52 }
 0x849   :  { %3692 = vmatprep.subr.bf16.mxu0 %v5287_v41  ;;  %4639 = vmatprep.subr.bf16.mxu1 %v7442_v50 }
 0x84b   :  { %v5117_v21 = vpop.eup %5116 }
 0x84c   :  { %v3538_v7 = vmul.f32 %v5117_v21, %v3536_v28  ;;  %3693 = vmatpush1.bf16.msra.mxu0 %v5289_v23  ;;  %4640 = vmatpush3.bf16.msra.mxu1 %v5290_v29 }
 0x84d   :  { %v5119_v45 = vpop.eup %5118 }
 0x84e   :  { %v3540_v15 = vadd.f32 %v3538_v7, %v7669_v5  ;;  %v3539_v50 = vmul.f32 %v5119_v45, %v3537_v6  ;;  %v5121_v8 = vpop.eup %5120 }
 0x84f   :  { %v5123_v63 = vpop.eup %5122  ;;  %v3544_v48 = vsub.f32 1.0, %v5121_v8  ;;  %v3548_v60 = vmul.f32 %v5121_v8, %v7094_v19  ;;  %v7677_v8 = vld [vmem:[#allocation62_spill] sm:$0xff] }
 0x850   :  { %5124 = vtanh.f32 %v3540_v15  ;;  %v3541_v38 = vadd.f32 %v3539_v50, %v7670_v26  ;;  %v3545_v10 = vsub.f32 1.0, %v5123_v63  ;;  %v3549_v56 = vmul.f32 %v5123_v63, %v7097_v33 }
 0x852   :  { %5126 = vtanh.f32 %v3541_v38 }
 0x85a   :  { %v5125_v35 = vpop.eup %5124 }
 0x85b   :  { %v3546_v9 = vmul.f32 %v5125_v35, %v3544_v48  ;;  %v7678_v35 = vld [vmem:[#allocation63_spill] sm:$0xff] }
 0x85c   :  { %v5127_v27 = vpop.eup %5126 }
 0x85d   :  { %v3550_v0 = vadd.f32 %v3548_v60, %v3546_v9  ;;  %v3547_v49 = vmul.f32 %v5127_v27, %v3545_v10 }
 0x85f   :  { %v3557_v17 = vmul.f32 %v7671_v43, %v3550_v0  ;;  %v3551_v22 = vadd.f32 %v3549_v56, %v3547_v49  ;;  %v3568_v34 = vsub.f32 %v3550_v0, %v7094_v19 }
 0x861   :  { %v3922_v58 = vadd.f32 %v3890_v42, %v3557_v17  ;;  %v3558_v1 = vmul.f32 %v7672_v12, %v3551_v22  ;;  %v3569_v13 = vsub.f32 %v3551_v22, %v7097_v33  ;;  %v3570_v40 = vmul.f32 %v7671_v43, %v3568_v34  ;;  %v7679_v42 = vld [vmem:[#allocation101_spill] sm:$0xff] }
 0x863   :  { %3938 = vst [vmem:[#allocation15 + $0x10] sm:$0xff] %v3922_v58  ;;  %v3923_v31 = vadd.f32 %v3891_v39, %v3558_v1  ;;  %v3571_v18 = vmul.f32 %v7672_v12, %v3569_v13  ;;  %v7201_v32 = vadd.f32 %v3570_v40, %v7094_v19  ;;  %v7680_v13 = vld [vmem:[#allocation102_spill] sm:$0xff]  ;;  %v7681_v39 = vld [vmem:[#allocation100_spill] sm:$0xff] }
 0x865   :  { %3939 = vst [vmem:[#allocation15 + $0x18] sm:$0xff] %v3923_v31  ;;  %v7204_v51 = vadd.f32 %v3571_v18, %v7097_v33 }
 0x867   :  { %v3677_v20 = vpack.c.bf16 %v7204_v51, %v7201_v32 }
 0x869   :  { %3711 = vmatmul.mubr.bf16.vlgmr.msra.gmra.mrb[120].mxu0 %v3677_v20  ;;  %4642 = vmatmul.mubr.bf16.vlgmr.msra.gmra.mrb[96].mxu1 %v3677_v20 }
 0x902   :  { %v3627_v57 = vpop.f32.mrb[116].mxu0  ;;  %v3670_v30 = vpop.f32.mrb[92].mxu1 }
 0x903   :  { %v3768_v46 = vadd.f32 %v7673_v4, %v3627_v57  ;;  %v3629_v36 = vpop.f32.mrb[117].mxu0  ;;  %v4623_v59 = vpop.f32.mrb[93].mxu1  ;;  %v3796_v45 = vadd.f32 %v7140_v61, %v3670_v30  ;;  %v7682_v57 = vld [vmem:[#allocation103_spill] sm:$0xff] }
 0x904   :  { %v3782_v25 = vadd.f32 %v7674_v47, %v3629_v36  ;;  %v3631_v16 = vpop.f32.mrb[118].mxu0  ;;  %v3673_v14 = vpop.f32.mrb[94].mxu1 }
 0x905   :  { %v4173_v19 = vmul.f32 -1.442695, %v3768_v46  ;;  %v3769_v53 = vadd.f32 %v7675_v44, %v3631_v16  ;;  %v3633_v33 = vpop.f32.mrb[119].mxu0  ;;  %v4624_v54 = vpop.f32.mrb[95].mxu1  ;;  %v3797_v26 = vadd.f32 %v7140_v61, %v3673_v14  ;;  %v7684_v44 = vld [vmem:[#allocation72_spill] sm:$0xff] }
 0x906   :  { %v3783_v11 = vadd.f32 %v7676_v2, %v3633_v33  ;;  %v4175_v52 = vmul.f32 -1.442695, %v3782_v25  ;;  %v7683_v25 = vld [vmem:[#allocation24_spill] sm:$0xff] }
 0x907   :  { %5128 = vpow2.f32 %v4173_v19  ;;  %v4174_v24 = vmul.f32 -1.442695, %v3769_v53 }
 0x908   :  { %v4176_v41 = vmul.f32 -1.442695, %v3783_v11  ;;  %v7685_v11 = vld [vmem:[#allocation25_spill] sm:$0xff] }
 0x909   :  { %5130 = vpow2.f32 %v4174_v24 }
 0x90a   :  { %5132 = vpow2.f32 %v4175_v52 }
 0x90b   :  { %5134 = vpow2.f32 %v4176_v41  ;;  %v7686_v41 = vld [vmem:[#allocation73_spill] sm:$0xff] }
 0x911   :  { %v5129_v28 = vpop.eup %5128 }
 0x912   :  { %v3776_v37 = vadd.f32 1.0, %v5129_v28 }
 0x913   :  { %v5131_v21 = vpop.eup %5130 }
 0x914   :  { %5136 = vrcp.f32 %v3776_v37  ;;  %v3777_v7 = vadd.f32 1.0, %v5131_v21  ;;  %v5133_v6 = vpop.eup %5132 }
 0x915   :  { %v5135_v23 = vpop.eup %5134  ;;  %v3790_v29 = vadd.f32 1.0, %v5133_v6 }
 0x916   :  { %5138 = vrcp.f32 %v3777_v7  ;;  %v3791_v5 = vadd.f32 1.0, %v5135_v23 }
 0x917   :  { %5140 = vrcp.f32 %v3790_v29 }
 0x918   :  { %5142 = vrcp.f32 %v3791_v5 }
 0x91e   :  { %v5137_v15 = vpop.eup %5136 }
 0x91f   :  { %v3798_v50 = vmul.f32 %v5137_v15, %v3796_v45 }
 0x920   :  { %v5139_v38 = vpop.eup %5138 }
 0x921   :  { %v3800_v63 = vadd.f32 %v3798_v50, %v7677_v8  ;;  %v3799_v48 = vmul.f32 %v5139_v38, %v3797_v26  ;;  %v5141_v60 = vpop.eup %5140 }
 0x922   :  { %v5143_v10 = vpop.eup %5142  ;;  %v3804_v27 = vsub.f32 1.0, %v5141_v60  ;;  %v3808_v56 = vmul.f32 %v5141_v60, %v7159_v62 }
 0x923   :  { %5144 = vtanh.f32 %v3800_v63  ;;  %v3801_v9 = vadd.f32 %v3799_v48, %v7678_v35  ;;  %v3805_v43 = vsub.f32 1.0, %v5143_v10  ;;  %v3809_v34 = vmul.f32 %v5143_v10, %v7162_v55  ;;  %v7687_v35 = vld [vmem:[#allocation74_spill] sm:$0xff]  ;;  %v7688_v10 = vld [vmem:[#allocation75_spill] sm:$0xff] }
 0x925   :  { %5146 = vtanh.f32 %v3801_v9 }
 0x92d   :  { %v5145_v0 = vpop.eup %5144 }
 0x92e   :  { %v3806_v49 = vmul.f32 %v5145_v0, %v3804_v27 }
 0x92f   :  { %v5147_v17 = vpop.eup %5146 }
 0x930   :  { %v3810_v22 = vadd.f32 %v3808_v56, %v3806_v49  ;;  %v3807_v61 = vmul.f32 %v5147_v17, %v3805_v43 }
 0x932   :  { %v3862_v58 = vmul.f32 %v7679_v42, %v3810_v22  ;;  %v3811_v12 = vadd.f32 %v3809_v34, %v3807_v61  ;;  %v3871_v1 = vsub.f32 %v3810_v22, %v7159_v62 }
 0x934   :  { %v3934_v40 = vadd.f32 %v3862_v58, %v7680_v13  ;;  %v3863_v31 = vmul.f32 %v7681_v39, %v3811_v12  ;;  %v3872_v18 = vsub.f32 %v3811_v12, %v7162_v55  ;;  %v3873_v20 = vmul.f32 %v7679_v42, %v3871_v1  ;;  %v7689_v12 = vld [vmem:[#allocation96_spill] sm:$0xff] }
 0x936   :  { %3950 = vst [vmem:[#allocation15 + $0x70] sm:$0xff] %v3934_v40  ;;  %v3935_v30 = vadd.f32 %v3863_v31, %v7682_v57  ;;  %v3874_v4 = vmul.f32 %v7681_v39, %v3872_v18  ;;  %v3875_v46 = vadd.f32 %v3873_v20, %v7159_v62  ;;  %v3888_v39 = vld [vmem:[#allocation15] sm:$0xff]  ;;  %v7690_v18 = vld [vmem:[#allocation97_spill] sm:$0xff] }
 0x938   :  { %3951 = vst [vmem:[#allocation15 + $0x78] sm:$0xff] %v3935_v30  ;;  %v3876_v36 = vadd.f32 %v3874_v4, %v7162_v55  ;;  %3883 = vst [vmem:[#allocation16] sm:$0xff] %v3875_v46  ;;  %v3889_v4 = vld [vmem:[#allocation15 + $0x8] sm:$0xff] }
 0x93a   :  { %3884 = vst [vmem:[#allocation16 + $0x8] sm:$0xff] %v3876_v36 }
 0x93c   :  { %v3712_v59 = vpop.f32.mrb[120].mxu0  ;;  %v3755_v47 = vpop.f32.mrb[96].mxu1 }
 0x93d   :  { %v3818_v16 = vadd.f32 %v7683_v25, %v3712_v59  ;;  %v3714_v14 = vpop.f32.mrb[121].mxu0  ;;  %v4643_v19 = vpop.f32.mrb[97].mxu1  ;;  %v3846_v50 = vadd.f32 %v7184_v3, %v3755_v47 }
 0x93e   :  { %v3832_v53 = vadd.f32 %v7684_v44, %v3714_v14  ;;  %v3716_v33 = vpop.f32.mrb[122].mxu0  ;;  %v3758_v54 = vpop.f32.mrb[98].mxu1 }
 0x93f   :  { %v4177_v2 = vmul.f32 -1.442695, %v3818_v16  ;;  %v3819_v24 = vadd.f32 %v7685_v11, %v3716_v33  ;;  %v3718_v52 = vpop.f32.mrb[123].mxu0  ;;  %v4644_v62 = vpop.f32.mrb[99].mxu1  ;;  %v3847_v63 = vadd.f32 %v7184_v3, %v3758_v54 }
 0x940   :  { %v3833_v28 = vadd.f32 %v7686_v41, %v3718_v52  ;;  %v4179_v37 = vmul.f32 -1.442695, %v3832_v53 }
 0x941   :  { %5148 = vpow2.f32 %v4177_v2  ;;  %v4178_v55 = vmul.f32 -1.442695, %v3819_v24 }
 0x942   :  { %v4180_v21 = vmul.f32 -1.442695, %v3833_v28 }
 0x943   :  { %5150 = vpow2.f32 %v4178_v55 }
 0x944   :  { %5152 = vpow2.f32 %v4179_v37 }
 0x945   :  { %5154 = vpow2.f32 %v4180_v21 }
 0x94b   :  { %v5149_v7 = vpop.eup %5148 }
 0x94c   :  { %v3826_v6 = vadd.f32 1.0, %v5149_v7 }
 0x94d   :  { %v5151_v23 = vpop.eup %5150 }
 0x94e   :  { %5156 = vrcp.f32 %v3826_v6  ;;  %v3827_v29 = vadd.f32 1.0, %v5151_v23  ;;  %v5153_v45 = vpop.eup %5152 }
 0x94f   :  { %v5155_v5 = vpop.eup %5154  ;;  %v3840_v15 = vadd.f32 1.0, %v5153_v45 }
 0x950   :  { %5158 = vrcp.f32 %v3827_v29  ;;  %v3841_v26 = vadd.f32 1.0, %v5155_v5 }
 0x951   :  { %5160 = vrcp.f32 %v3840_v15 }
 0x952   :  { %5162 = vrcp.f32 %v3841_v26 }
 0x958   :  { %v5157_v38 = vpop.eup %5156 }
 0x959   :  { %v3848_v8 = vmul.f32 %v5157_v38, %v3846_v50 }
 0x95a   :  { %v5159_v48 = vpop.eup %5158 }
 0x95b   :  { %v3850_v9 = vadd.f32 %v3848_v8, %v7687_v35  ;;  %v3849_v60 = vmul.f32 %v5159_v48, %v3847_v63  ;;  %v5161_v0 = vpop.eup %5160 }
 0x95c   :  { %v5163_v49 = vpop.eup %5162  ;;  %v3854_v56 = vsub.f32 1.0, %v5161_v0  ;;  %v3858_v22 = vmul.f32 %v5161_v0, %v7201_v32 }
 0x95d   :  { %5164 = vtanh.f32 %v3850_v9  ;;  %v3851_v27 = vadd.f32 %v3849_v60, %v7688_v10  ;;  %v3855_v61 = vsub.f32 1.0, %v5163_v49  ;;  %v3859_v58 = vmul.f32 %v5163_v49, %v7204_v51 }
 0x95f   :  { %5166 = vtanh.f32 %v3851_v27 }
 0x967   :  { %v5165_v43 = vpop.eup %5164 }
 0x968   :  { %v3856_v17 = vmul.f32 %v5165_v43, %v3854_v56 }
 0x969   :  { %v5167_v34 = vpop.eup %5166 }
 0x96a   :  { %v3860_v42 = vadd.f32 %v3858_v22, %v3856_v17  ;;  %v3857_v3 = vmul.f32 %v5167_v34, %v3855_v61 }
 0x96c   :  { %v3867_v1 = vmul.f32 %v7689_v12, %v3860_v42  ;;  %v3861_v13 = vadd.f32 %v3859_v58, %v3857_v3  ;;  %v3877_v40 = vsub.f32 %v3860_v42, %v7201_v32 }
 0x96e   :  { %v3920_v31 = vadd.f32 %v3888_v39, %v3867_v1  ;;  %v3868_v20 = vmul.f32 %v7690_v18, %v3861_v13  ;;  %v3878_v57 = vsub.f32 %v3861_v13, %v7204_v51  ;;  %v3879_v30 = vmul.f32 %v7689_v12, %v3877_v40 }
 0x970   :  { %3936 = vst [vmem:[#allocation15] sm:$0xff] %v3920_v31  ;;  %v3921_v46 = vadd.f32 %v3889_v4, %v3868_v20  ;;  %v3880_v36 = vmul.f32 %v7690_v18, %v3878_v57  ;;  %v3881_v59 = vadd.f32 %v3879_v30, %v7201_v32 }
 0x972   :  { %3937 = vst [vmem:[#allocation15 + $0x8] sm:$0xff] %v3921_v46  ;;  %v3882_v47 = vadd.f32 %v3880_v36, %v7204_v51  ;;  %3886 = vst [vmem:[#allocation16 + $0x10] sm:$0xff] %v3881_v59 }
 0x973   :  { %5434 = shalt.err (!%p5431_p10)
}
 0x974   :  { %s5435_s15 = scalar_lea.hbm %s7289_s6, 2048 }
 0x975   :  { %p5436_p11 = scmp.ne.s32.totalorder %s7289_s6, %s5435_s15  ;;  %p5439_p12 = scmp.lt.u32.totalorder %s5435_s15, %s7289_s6 }
 0x977   :  { %p5441_p13 = pnand %p5439_p12, %p5436_p11 }
 0x979   :  { %5444 = shalt.err (!%p5441_p13)
}
 0x97a   :  { %3963 = dma.vmem_to_hbm [thread:$0]  %s3958_s9, 2048, %s7289_s6, [#allocation6], %s5480_s11, %s5480_s11, %s5481_s12   ;;  %3887 = vst [vmem:[#allocation16 + $0x18] sm:$0xff] %v3882_v47 }
 0x97b   :  { %s5445_s25 = scalar_lea.vmem %s7246_s18, 512  ;;  %p5450_p1 = scmp.lt.s32.totalorder %s7246_s18, %s7246_s18 }
 0x97c   :  { %p5446_p0 = scmp.ne.s32.totalorder %s7246_s18, %s5445_s25  ;;  %p5451_p2 = scmp.lt.s32.totalorder %s5445_s25, %s5445_s25 }
 0x97e   :  { %p5452_p3 = por %p5451_p2, %p5450_p1 }
 0x980   :  { %p5453_p4 = pnand %p5452_p3, %p5446_p0 }
 0x982   :  { %5456 = shalt.err (!%p5453_p4)
}
 0x983   :  { %s5457_s22 = scalar_lea.hbm %s7290_s7, 512 }
 0x984   :  { %p5458_p5 = scmp.ne.s32.totalorder %s7290_s7, %s5457_s22  ;;  %p5461_p6 = scmp.lt.u32.totalorder %s5457_s22, %s7290_s7 }
 0x986   :  { %p5463_p7 = pnand %p5461_p6, %p5458_p5 }
 0x988   :  { %5466 = shalt.err (!%p5463_p7)
}
 0x989   :  { %3975 = dma.vmem_to_hbm [thread:$0]  %s7246_s18, 512, %s7290_s7, [#allocation17], %s5480_s11, %s5480_s11, %s5481_s12  }
 0x98a   :  { %5475 = dma.done.wait [#allocation6], 2048  }
 0x98b   :  { %5476 = vsyncadd [#allocation6], 4294965248 }
 0x98c   :  { %5477 = dma.done.wait [#allocation17], 512  }
 0x98d   :  { %5478 = vsyncadd [#allocation17], 4294966784 }
 0x98e   :  { %3982 = vsyncpa [#allocation5], 1 }
 0x98f   :  { %3983 = vsyncpa [#allocation8], 1 }
 0x990   :  { %3984 = vsyncpa [#allocation11], 1 }
 0x991   :  { %3985 = vsyncpa [#allocation14], 1 }
 0x992   :  { %3986 = vsyncpa [#allocation6], 1 }
 0x993   :  { %3987 = vsyncpa [#allocation17], 1 }

</bundles_post_ra>
